<compile_context>
chip_gen: v7x
topology: tpu7x:2x2x1
jax: 0.10.0
libtpu: 0.0.40
codegen_flags: <defaults>
</compile_context>

<pallas_src>
import functools
import numpy as np

import jax
import jax.numpy as jnp
from jax.experimental import pallas as pl
from jax.experimental.pallas import tpu as pltpu

# Primes used by torch-ngp's fast_hash (first D entries are used).
_PRIMES = (1, 2654435761, 805459861, 3674653429, 2097192037, 1434869437, 2165219737)


def _as_i32(v):
    """Reinterpret a uint32 constant as int32 (two's complement wrap)."""
    return int(((v + 2 ** 31) % 2 ** 32) - 2 ** 31)


def _round_up(v, m):
    return -(-v // m) * m


def _level_meta(input_dim, num_levels, base_resolution, log2_hashmap_size):
    """Replicates HashEncoder.__init__ offset bookkeeping (all Python ints)."""
    max_params = 2 ** log2_hashmap_size
    metas = []
    off = 0      # row offset in the original concatenated table
    poff = 0     # row offset in the 128-padded level-local (block-diagonal) layout
    for lvl in range(num_levels):
        res = base_resolution * 2 ** lvl
        full = (res + 1) ** input_dim
        params = min(max_params, full)
        pad = _round_up(params, 128)
        metas.append(dict(
            resolution=res,
            hashmap_size=params,
            offset=off,
            # dense indexing is used iff the full grid fits the hashmap; otherwise
            # hashmap_size == 2**log2_hashmap_size (a power of two -> mask with &).
            dense=(full <= params),
            padded_size=pad,
            padded_offset=poff,
        ))
        off += params
        poff += pad
    return metas, off, poff  # (metas, T rows in original table, K_total padded rows)


# ----------------------------------------------------------------------------
# Pallas kernel: one (encoder, batch-tile) grid step, all levels.
#
# coords_ref : [D, TB]        points of this encoder, batch on lanes
# emb_ref    : [L*C, K_total] transposed block-diagonal embedding of this encoder
# out_ref    : [L*C, TB]      features, batch on lanes (lane-dense store)
# acc_ref    : [K_total, TB]  VMEM scratch: weighted one-hot selection matrix
# ----------------------------------------------------------------------------
def _hashgrid_kernel(coords_ref, emb_ref, out_ref, acc_ref, *, metas, D):
    c = coords_ref[...].astype(jnp.float32)          # [D, TB]
    TB = c.shape[1]

    for m in metas:
        res = m['resolution']
        hsize = m['hashmap_size']
        pad = m['padded_size']
        start = m['padded_offset']
        scale = float(res - 1)                       # == 2**lvl * H - 1

        # NOTE: no clamp, matching the original CUDA path; inputs are expected
        # in [0, 1] (for x > 1 dense levels would index past the level extent).
        pos = c * scale + 0.5                        # [D, TB]
        pgf = jnp.floor(pos)
        frac = pos - pgf                             # [D, TB]
        pg = pgf.astype(jnp.int32)                   # [D, TB]

        # Hoist per-dimension weight / index contributions out of the corner loop.
        w_opt = []   # w_opt[d][bit]  -> [1, TB] float32
        i_opt = []   # i_opt[d][bit]  -> [1, TB] int32
        stride = 1
        for d in range(D):
            fd = frac[d:d + 1, :]
            pd = pg[d:d + 1, :]
            w_opt.append((1.0 - fd, fd))
            if m['dense']:
                i_opt.append((pd * stride, (pd + 1) * stride))
                stride *= (res + 1)
            else:
                # int32 multiply wraps like uint32 (two's complement) -- this is
                # load-bearing for matching torch-ngp's fast_hash.
                prime = _as_i32(_PRIMES[d])
                i_opt.append((pd * prime, (pd + 1) * prime))

        iota = jax.lax.broadcasted_iota(jnp.int32, (pad, TB), 0)
        level_acc = jnp.zeros((pad, TB), jnp.float32)
        for corner in range(2 ** D):
            bit0 = corner & 1
            w = w_opt[0][bit0]
            idx = i_opt[0][bit0]
            for d in range(1, D):
                bit = (corner >> d) & 1
                w = w * w_opt[d][bit]
                idx = (idx + i_opt[d][bit]) if m['dense'] else (idx ^ i_opt[d][bit])
            if not m['dense']:
                idx = idx & (hsize - 1)              # hsize is a power of two here
            # weighted one-hot without the bool->f32 cast + extra multiply
            level_acc = level_acc + jnp.where(iota == idx, w, 0.0)

        acc_ref[start:start + pad, :] = level_acc

    # Single block-diagonal matmul: [L*C, K_total] @ [K_total, TB] -> [L*C, TB]
    out_ref[...] = jnp.dot(emb_ref[...], acc_ref[...],
                           preferred_element_type=jnp.float32)


def hashgrid4d_encode_pallas(coords, emb_packed, *, metas, K_total, C, tile_b=128):
    """coords: [E, D, B]; emb_packed: [E, L*C, K_total] -> features [B, E*L*C]."""
    E, D, B = coords.shape
    L = len(metas)
    LC = L * C
    Bp = _round_up(B, tile_b)
    if Bp != B:
        coords = jnp.pad(coords, ((0, 0), (0, 0), (0, Bp - B)))

    kernel = functools.partial(_hashgrid_kernel, metas=metas, D=D)
    out = pl.pallas_call(
        kernel,
        out_shape=jax.ShapeDtypeStruct((E, LC, Bp), jnp.float32),
        grid=(E, Bp // tile_b),
        in_specs=[
            pl.BlockSpec((None, D, tile_b), lambda e, b: (e, 0, b)),        # coords
            pl.BlockSpec((None, LC, K_total), lambda e, b: (e, 0, 0)),      # packed table
        ],
        out_specs=pl.BlockSpec((None, LC, tile_b), lambda e, b: (e, 0, b)),
        scratch_shapes=[pltpu.VMEM((K_total, tile_b), jnp.float32)],
        compiler_params=pltpu.CompilerParams(
            dimension_semantics=("parallel", "parallel")),
    )(coords, emb_packed)

    out = out[:, :, :B]                              # [E, LC, B]
    # [E, LC, B] -> [B, E, LC] -> [B, E*LC]  (== concat over encoders, feature-last)
    return out.transpose(2, 0, 1).reshape(B, E * LC)


# ----------------------------------------------------------------------------
# Pure-JAX reference (same math, explicit row gather) for validation.
# ----------------------------------------------------------------------------
def _hash_encode_ref(x, emb, metas, D, C):
    outs = []
    for m in metas:
        res = m['resolution']
        hsize = m['hashmap_size']
        scale = float(res - 1)
        pos = x * scale + 0.5
        pg_f = jnp.floor(pos)
        frac = pos - pg_f
        pg = pg_f.astype(jnp.int32)
        acc = jnp.zeros((x.shape[0], C), jnp.float32)
        for corner in range(2 ** D):
            w = jnp.ones((x.shape[0],), jnp.float32)
            if m['dense']:
                idx = jnp.zeros((x.shape[0],), jnp.int32)
                stride = 1
                for d in range(D):
                    bit = (corner >> d) & 1
                    w = w * (frac[:, d] if bit else 1.0 - frac[:, d])
                    idx = idx + (pg[:, d] + bit) * stride
                    stride *= (res + 1)
            else:
                h = jnp.zeros((x.shape[0],), jnp.int32)
                for d in range(D):
                    bit = (corner >> d) & 1
                    w = w * (frac[:, d] if bit else 1.0 - frac[:, d])
                    h = h ^ ((pg[:, d] + bit) * _as_i32(_PRIMES[d]))
                idx = h & (hsize - 1)
            idx = idx + m['offset']
            acc = acc + w[:, None] * emb[idx]
        outs.append(acc)
    return jnp.concatenate(outs, axis=-1)


# ----------------------------------------------------------------------------
# HashGrid4D (forward only; the CUDA custom backward is not translated).
# ----------------------------------------------------------------------------
class HashGrid4DPallas:
    def __init__(self, input_dim=3, num_levels=4, level_dim=2, base_resolution=4,
                 log2_hashmap_size=8, decompose=False, reduction='concat',
                 key=jax.random.PRNGKey(0)):
        assert reduction == 'concat', "only the default reduction='concat' is implemented"
        self.input_dim = input_dim
        self.num_levels = num_levels
        self.level_dim = level_dim
        self.base_resolution = base_resolution
        self.decompose = decompose
        self.metas, self.T, self.K_total = _level_meta(
            input_dim, num_levels, base_resolution, log2_hashmap_size)
        self.output_dim = num_levels * level_dim
        self.n_output_dims = self.output_dim + self.output_dim * 3

        # reset_parameters(): uniform(-1e-4, 1e-4), deterministic here.
        std = 1e-4
        keys = jax.random.split(key, 4)
        shape = (self.T, level_dim)
        self.emb_static = jax.random.uniform(keys[0], shape, jnp.float32, -std, std)
        self.emb_dynamic = [
            jax.random.uniform(keys[i + 1], shape, jnp.float32, -std, std)
            for i in range(3)
        ]
        # Pack each encoder's table once into the transposed block-diagonal,
        # 128-padded, lane-dense layout [L*C, K_total] used by the kernel.
        # TODO(synk): for realistic NGP sizes (log2_hashmap_size >= 14) the one-hot
        # matmul / block-diagonal table no longer fits VMEM; that regime needs a
        # DMA-gather kernel (memory_space=pl.ANY) instead.
        self.emb_packed = jnp.stack(
            [self._pack(e) for e in [self.emb_static] + self.emb_dynamic], axis=0)
        # TODO(synk): torch's custom_fwd(cast_inputs=torch.half) only applies under
        # autocast; this implementation runs the forward in float32 throughout.

    def _pack(self, emb):
        C = self.level_dim
        packed = jnp.zeros((self.num_levels * C, self.K_total), jnp.float32)
        for l, m in enumerate(self.metas):
            blk = emb[m['offset']:m['offset'] + m['hashmap_size'], :].astype(jnp.float32).T
            packed = packed.at[l * C:(l + 1) * C,
                               m['padded_offset']:m['padded_offset'] + m['hashmap_size']
                               ].set(blk)
        return packed

    def _plane_coords(self, x, t):
        # [4, D, B]: static (x,y,z) + dynamic planes (x,y,t), (x,z,t), (y,z,t)
        return jnp.stack([
            x.T,
            jnp.stack([x[:, 0], x[:, 1], t], axis=0),
            jnp.stack([x[:, 0], x[:, 2], t], axis=0),
            jnp.stack([x[:, 1], x[:, 2], t], axis=0),
        ], axis=0)

    def __call__(self, x, t):
        coords = self._plane_coords(x, t)
        feats = hashgrid4d_encode_pallas(
            coords, self.emb_packed, metas=self.metas, K_total=self.K_total,
            C=self.level_dim)                                    # [B, 4*L*C]
        if self.decompose:
            LC = self.output_dim
            return [feats[:, :LC], feats[:, LC:]]
        return feats

    def reference(self, x, t):
        D, C = self.input_dim, self.level_dim
        feat_static = _hash_encode_ref(x, self.emb_static, self.metas, D, C)
        t1 = t[:, None]
        xy = jnp.concatenate([x[:, 0:1], x[:, 1:2], t1], axis=-1)
        xz = jnp.concatenate([x[:, 0:1], x[:, 2:3], t1], axis=-1)
        yz = jnp.concatenate([x[:, 1:2], x[:, 2:3], t1], axis=-1)
        f_xyt = _hash_encode_ref(xy, self.emb_dynamic[0], self.metas, D, C)
        f_xzt = _hash_encode_ref(xz, self.emb_dynamic[1], self.metas, D, C)
        f_yzt = _hash_encode_ref(yz, self.emb_dynamic[2], self.metas, D, C)
        feat_dynamic = jnp.concatenate([f_xyt, f_xzt, f_yzt], axis=-1)
        return jnp.concatenate([feat_static, feat_dynamic], axis=-1)


if __name__ == "__main__":
    key = jax.random.PRNGKey(0)
    kx, kt, kp = jax.random.split(key, 3)

    B = 128
    x = jax.random.uniform(kx, (B, 3), jnp.float32)   # points in [0, 1)
    t = jax.random.uniform(kt, (B,), jnp.float32)     # time in [0, 1)

    model = HashGrid4DPallas(input_dim=3, num_levels=4, level_dim=2,
                             base_resolution=4, log2_hashmap_size=8, key=kp)

    out = model(x, t)
    out = jax.block_until_ready(out)

    assert out.shape == (B, model.n_output_dims), out.shape
    ref = model.reference(x, t)
    np.testing.assert_allclose(np.asarray(out), np.asarray(ref),
                               rtol=1e-4, atol=1e-6)
    print("KERNEL_OK")
</pallas_src>

<mosaic_0001>
module attributes {stable_mosaic.version = 11 : i64} {
  func.func @_hashgrid_kernel(%arg0: i32, %arg1: i32, %arg2: memref<1x3x128xf32, #tpu.memory_space<vmem>>, %arg3: memref<1x8x896xf32, #tpu.memory_space<vmem>>, %arg4: memref<1x8x128xf32, #tpu.memory_space<vmem>>, %arg5: memref<896x128xf32, #tpu.memory_space<vmem>>) attributes {dimension_semantics = [#tpu.dimension_semantics<parallel>, #tpu.dimension_semantics<parallel>], iteration_bounds = array<i64: 4, 1>, scalar_prefetch = 0 : i64, scratch_operands = 1 : i64, tpu.core_type = #tpu.core_type<tc>, window_params = [{transform_indices = @transform_0, window_bounds = array<i64: 1, 3, 128>}, {transform_indices = @transform_1, window_bounds = array<i64: 1, 8, 896>}, {transform_indices = @transform_2, window_bounds = array<i64: 1, 8, 128>}]} {
    %c0 = arith.constant 0 : index
    %c0_0 = arith.constant 0 : index
    %c0_1 = arith.constant 0 : index
    %0 = vector.load %arg2[%c0, %c0_0, %c0_1] : memref<1x3x128xf32, #tpu.memory_space<vmem>>, vector<1x3x128xf32>
    %1 = vector.shape_cast %0 : vector<1x3x128xf32> to vector<3x128xf32>
    %cst = arith.constant 3.000000e+00 : f32
    %2 = vector.broadcast %cst : f32 to vector<3x128xf32>
    %3 = arith.mulf %1, %2 : vector<3x128xf32>
    %cst_2 = arith.constant 5.000000e-01 : f32
    %4 = vector.broadcast %cst_2 : f32 to vector<3x128xf32>
    %5 = arith.addf %3, %4 : vector<3x128xf32>
    %6 = math.floor %5 : vector<3x128xf32>
    %7 = arith.subf %5, %6 : vector<3x128xf32>
    %8 = arith.fptosi %6 : vector<3x128xf32> to vector<3x128xi32>
    %9 = vector.extract_strided_slice %7 {offsets = [0, 0], sizes = [1, 128], strides = [1, 1]} : vector<3x128xf32> to vector<1x128xf32>
    %10 = vector.extract_strided_slice %8 {offsets = [0, 0], sizes = [1, 128], strides = [1, 1]} : vector<3x128xi32> to vector<1x128xi32>
    %cst_3 = arith.constant 1.000000e+00 : f32
    %11 = vector.broadcast %cst_3 : f32 to vector<1x128xf32>
    %12 = arith.subf %11, %9 : vector<1x128xf32>
    %c1_i32 = arith.constant 1 : i32
    %13 = vector.broadcast %c1_i32 : i32 to vector<1x128xi32>
    %14 = arith.muli %10, %13 : vector<1x128xi32>
    %c1_i32_4 = arith.constant 1 : i32
    %15 = vector.broadcast %c1_i32_4 : i32 to vector<1x128xi32>
    %16 = arith.addi %10, %15 : vector<1x128xi32>
    %c1_i32_5 = arith.constant 1 : i32
    %17 = vector.broadcast %c1_i32_5 : i32 to vector<1x128xi32>
    %18 = arith.muli %16, %17 : vector<1x128xi32>
    %19 = vector.extract_strided_slice %7 {offsets = [1, 0], sizes = [1, 128], strides = [1, 1]} : vector<3x128xf32> to vector<1x128xf32>
    %20 = vector.extract_strided_slice %8 {offsets = [1, 0], sizes = [1, 128], strides = [1, 1]} : vector<3x128xi32> to vector<1x128xi32>
    %cst_6 = arith.constant 1.000000e+00 : f32
    %21 = vector.broadcast %cst_6 : f32 to vector<1x128xf32>
    %22 = arith.subf %21, %19 : vector<1x128xf32>
    %c5_i32 = arith.constant 5 : i32
    %23 = vector.broadcast %c5_i32 : i32 to vector<1x128xi32>
    %24 = arith.muli %20, %23 : vector<1x128xi32>
    %c1_i32_7 = arith.constant 1 : i32
    %25 = vector.broadcast %c1_i32_7 : i32 to vector<1x128xi32>
    %26 = arith.addi %20, %25 : vector<1x128xi32>
    %c5_i32_8 = arith.constant 5 : i32
    %27 = vector.broadcast %c5_i32_8 : i32 to vector<1x128xi32>
    %28 = arith.muli %26, %27 : vector<1x128xi32>
    %29 = vector.extract_strided_slice %7 {offsets = [2, 0], sizes = [1, 128], strides = [1, 1]} : vector<3x128xf32> to vector<1x128xf32>
    %30 = vector.extract_strided_slice %8 {offsets = [2, 0], sizes = [1, 128], strides = [1, 1]} : vector<3x128xi32> to vector<1x128xi32>
    %cst_9 = arith.constant 1.000000e+00 : f32
    %31 = vector.broadcast %cst_9 : f32 to vector<1x128xf32>
    %32 = arith.subf %31, %29 : vector<1x128xf32>
    %c25_i32 = arith.constant 25 : i32
    %33 = vector.broadcast %c25_i32 : i32 to vector<1x128xi32>
    %34 = arith.muli %30, %33 : vector<1x128xi32>
    %c1_i32_10 = arith.constant 1 : i32
    %35 = vector.broadcast %c1_i32_10 : i32 to vector<1x128xi32>
    %36 = arith.addi %30, %35 : vector<1x128xi32>
    %c25_i32_11 = arith.constant 25 : i32
    %37 = vector.broadcast %c25_i32_11 : i32 to vector<1x128xi32>
    %38 = arith.muli %36, %37 : vector<1x128xi32>
    %39 = tpu.iota {dimensions = array<i32: 0>} : vector<128x128xi32>
    %cst_12 = arith.constant 0.000000e+00 : f32
    %40 = vector.broadcast %cst_12 : f32 to vector<128x128xf32>
    %41 = arith.mulf %12, %22 : vector<1x128xf32>
    %42 = arith.addi %14, %24 : vector<1x128xi32>
    %43 = arith.mulf %41, %32 : vector<1x128xf32>
    %44 = arith.addi %42, %34 : vector<1x128xi32>
    %45 = vector.broadcast %44 : vector<1x128xi32> to vector<128x128xi32>
    %46 = arith.cmpi eq, %39, %45 : vector<128x128xi32>
    %cst_13 = arith.constant 0.000000e+00 : f32
    %47 = vector.shape_cast %43 : vector<1x128xf32> to vector<1x128xf32>
    %48 = vector.broadcast %47 : vector<1x128xf32> to vector<128x128xf32>
    %49 = vector.broadcast %cst_13 : f32 to vector<128x128xf32>
    %50 = arith.select %46, %48, %49 : vector<128x128xi1>, vector<128x128xf32>
    %51 = arith.addf %40, %50 : vector<128x128xf32>
    %52 = arith.mulf %9, %22 : vector<1x128xf32>
    %53 = arith.addi %18, %24 : vector<1x128xi32>
    %54 = arith.mulf %52, %32 : vector<1x128xf32>
    %55 = arith.addi %53, %34 : vector<1x128xi32>
    %56 = vector.broadcast %55 : vector<1x128xi32> to vector<128x128xi32>
    %57 = arith.cmpi eq, %39, %56 : vector<128x128xi32>
    %cst_14 = arith.constant 0.000000e+00 : f32
    %58 = vector.shape_cast %54 : vector<1x128xf32> to vector<1x128xf32>
    %59 = vector.broadcast %58 : vector<1x128xf32> to vector<128x128xf32>
    %60 = vector.broadcast %cst_14 : f32 to vector<128x128xf32>
    %61 = arith.select %57, %59, %60 : vector<128x128xi1>, vector<128x128xf32>
    %62 = arith.addf %51, %61 : vector<128x128xf32>
    %63 = arith.mulf %12, %19 : vector<1x128xf32>
    %64 = arith.addi %14, %28 : vector<1x128xi32>
    %65 = arith.mulf %63, %32 : vector<1x128xf32>
    %66 = arith.addi %64, %34 : vector<1x128xi32>
    %67 = vector.broadcast %66 : vector<1x128xi32> to vector<128x128xi32>
    %68 = arith.cmpi eq, %39, %67 : vector<128x128xi32>
    %cst_15 = arith.constant 0.000000e+00 : f32
    %69 = vector.shape_cast %65 : vector<1x128xf32> to vector<1x128xf32>
    %70 = vector.broadcast %69 : vector<1x128xf32> to vector<128x128xf32>
    %71 = vector.broadcast %cst_15 : f32 to vector<128x128xf32>
    %72 = arith.select %68, %70, %71 : vector<128x128xi1>, vector<128x128xf32>
    %73 = arith.addf %62, %72 : vector<128x128xf32>
    %74 = arith.mulf %9, %19 : vector<1x128xf32>
    %75 = arith.addi %18, %28 : vector<1x128xi32>
    %76 = arith.mulf %74, %32 : vector<1x128xf32>
    %77 = arith.addi %75, %34 : vector<1x128xi32>
    %78 = vector.broadcast %77 : vector<1x128xi32> to vector<128x128xi32>
    %79 = arith.cmpi eq, %39, %78 : vector<128x128xi32>
    %cst_16 = arith.constant 0.000000e+00 : f32
    %80 = vector.shape_cast %76 : vector<1x128xf32> to vector<1x128xf32>
    %81 = vector.broadcast %80 : vector<1x128xf32> to vector<128x128xf32>
    %82 = vector.broadcast %cst_16 : f32 to vector<128x128xf32>
    %83 = arith.select %79, %81, %82 : vector<128x128xi1>, vector<128x128xf32>
    %84 = arith.addf %73, %83 : vector<128x128xf32>
    %85 = arith.mulf %12, %22 : vector<1x128xf32>
    %86 = arith.addi %14, %24 : vector<1x128xi32>
    %87 = arith.mulf %85, %29 : vector<1x128xf32>
    %88 = arith.addi %86, %38 : vector<1x128xi32>
    %89 = vector.broadcast %88 : vector<1x128xi32> to vector<128x128xi32>
    %90 = arith.cmpi eq, %39, %89 : vector<128x128xi32>
    %cst_17 = arith.constant 0.000000e+00 : f32
    %91 = vector.shape_cast %87 : vector<1x128xf32> to vector<1x128xf32>
    %92 = vector.broadcast %91 : vector<1x128xf32> to vector<128x128xf32>
    %93 = vector.broadcast %cst_17 : f32 to vector<128x128xf32>
    %94 = arith.select %90, %92, %93 : vector<128x128xi1>, vector<128x128xf32>
    %95 = arith.addf %84, %94 : vector<128x128xf32>
    %96 = arith.mulf %9, %22 : vector<1x128xf32>
    %97 = arith.addi %18, %24 : vector<1x128xi32>
    %98 = arith.mulf %96, %29 : vector<1x128xf32>
    %99 = arith.addi %97, %38 : vector<1x128xi32>
    %100 = vector.broadcast %99 : vector<1x128xi32> to vector<128x128xi32>
    %101 = arith.cmpi eq, %39, %100 : vector<128x128xi32>
    %cst_18 = arith.constant 0.000000e+00 : f32
    %102 = vector.shape_cast %98 : vector<1x128xf32> to vector<1x128xf32>
    %103 = vector.broadcast %102 : vector<1x128xf32> to vector<128x128xf32>
    %104 = vector.broadcast %cst_18 : f32 to vector<128x128xf32>
    %105 = arith.select %101, %103, %104 : vector<128x128xi1>, vector<128x128xf32>
    %106 = arith.addf %95, %105 : vector<128x128xf32>
    %107 = arith.mulf %12, %19 : vector<1x128xf32>
    %108 = arith.addi %14, %28 : vector<1x128xi32>
    %109 = arith.mulf %107, %29 : vector<1x128xf32>
    %110 = arith.addi %108, %38 : vector<1x128xi32>
    %111 = vector.broadcast %110 : vector<1x128xi32> to vector<128x128xi32>
    %112 = arith.cmpi eq, %39, %111 : vector<128x128xi32>
    %cst_19 = arith.constant 0.000000e+00 : f32
    %113 = vector.shape_cast %109 : vector<1x128xf32> to vector<1x128xf32>
    %114 = vector.broadcast %113 : vector<1x128xf32> to vector<128x128xf32>
    %115 = vector.broadcast %cst_19 : f32 to vector<128x128xf32>
    %116 = arith.select %112, %114, %115 : vector<128x128xi1>, vector<128x128xf32>
    %117 = arith.addf %106, %116 : vector<128x128xf32>
    %118 = arith.mulf %9, %19 : vector<1x128xf32>
    %119 = arith.addi %18, %28 : vector<1x128xi32>
    %120 = arith.mulf %118, %29 : vector<1x128xf32>
    %121 = arith.addi %119, %38 : vector<1x128xi32>
    %122 = vector.broadcast %121 : vector<1x128xi32> to vector<128x128xi32>
    %123 = arith.cmpi eq, %39, %122 : vector<128x128xi32>
    %cst_20 = arith.constant 0.000000e+00 : f32
    %124 = vector.shape_cast %120 : vector<1x128xf32> to vector<1x128xf32>
    %125 = vector.broadcast %124 : vector<1x128xf32> to vector<128x128xf32>
    %126 = vector.broadcast %cst_20 : f32 to vector<128x128xf32>
    %127 = arith.select %123, %125, %126 : vector<128x128xi1>, vector<128x128xf32>
    %128 = arith.addf %117, %127 : vector<128x128xf32>
    %c0_21 = arith.constant 0 : index
    %c0_22 = arith.constant 0 : index
    %129 = vector.load %arg5[%c0_21, %c0_22] : memref<896x128xf32, #tpu.memory_space<vmem>>, vector<128x128xf32>
    tpu.vector_store %arg5[%c0_21, %c0_22], %128 {strides = array<i32>} : memref<896x128xf32, #tpu.memory_space<vmem>>, vector<128x128xf32>,
    %cst_23 = arith.constant 7.000000e+00 : f32
    %130 = vector.broadcast %cst_23 : f32 to vector<3x128xf32>
    %131 = arith.mulf %1, %130 : vector<3x128xf32>
    %cst_24 = arith.constant 5.000000e-01 : f32
    %132 = vector.broadcast %cst_24 : f32 to vector<3x128xf32>
    %133 = arith.addf %131, %132 : vector<3x128xf32>
    %134 = math.floor %133 : vector<3x128xf32>
    %135 = arith.subf %133, %134 : vector<3x128xf32>
    %136 = arith.fptosi %134 : vector<3x128xf32> to vector<3x128xi32>
    %137 = vector.extract_strided_slice %135 {offsets = [0, 0], sizes = [1, 128], strides = [1, 1]} : vector<3x128xf32> to vector<1x128xf32>
    %138 = vector.extract_strided_slice %136 {offsets = [0, 0], sizes = [1, 128], strides = [1, 1]} : vector<3x128xi32> to vector<1x128xi32>
    %cst_25 = arith.constant 1.000000e+00 : f32
    %139 = vector.broadcast %cst_25 : f32 to vector<1x128xf32>
    %140 = arith.subf %139, %137 : vector<1x128xf32>
    %c1_i32_26 = arith.constant 1 : i32
    %141 = vector.broadcast %c1_i32_26 : i32 to vector<1x128xi32>
    %142 = arith.muli %138, %141 : vector<1x128xi32>
    %c1_i32_27 = arith.constant 1 : i32
    %143 = vector.broadcast %c1_i32_27 : i32 to vector<1x128xi32>
    %144 = arith.addi %138, %143 : vector<1x128xi32>
    %c1_i32_28 = arith.constant 1 : i32
    %145 = vector.broadcast %c1_i32_28 : i32 to vector<1x128xi32>
    %146 = arith.muli %144, %145 : vector<1x128xi32>
    %147 = vector.extract_strided_slice %135 {offsets = [1, 0], sizes = [1, 128], strides = [1, 1]} : vector<3x128xf32> to vector<1x128xf32>
    %148 = vector.extract_strided_slice %136 {offsets = [1, 0], sizes = [1, 128], strides = [1, 1]} : vector<3x128xi32> to vector<1x128xi32>
    %cst_29 = arith.constant 1.000000e+00 : f32
    %149 = vector.broadcast %cst_29 : f32 to vector<1x128xf32>
    %150 = arith.subf %149, %147 : vector<1x128xf32>
    %c-1640531535_i32 = arith.constant -1640531535 : i32
    %151 = vector.broadcast %c-1640531535_i32 : i32 to vector<1x128xi32>
    %152 = arith.muli %148, %151 : vector<1x128xi32>
    %c1_i32_30 = arith.constant 1 : i32
    %153 = vector.broadcast %c1_i32_30 : i32 to vector<1x128xi32>
    %154 = arith.addi %148, %153 : vector<1x128xi32>
    %c-1640531535_i32_31 = arith.constant -1640531535 : i32
    %155 = vector.broadcast %c-1640531535_i32_31 : i32 to vector<1x128xi32>
    %156 = arith.muli %154, %155 : vector<1x128xi32>
    %157 = vector.extract_strided_slice %135 {offsets = [2, 0], sizes = [1, 128], strides = [1, 1]} : vector<3x128xf32> to vector<1x128xf32>
    %158 = vector.extract_strided_slice %136 {offsets = [2, 0], sizes = [1, 128], strides = [1, 1]} : vector<3x128xi32> to vector<1x128xi32>
    %cst_32 = arith.constant 1.000000e+00 : f32
    %159 = vector.broadcast %cst_32 : f32 to vector<1x128xf32>
    %160 = arith.subf %159, %157 : vector<1x128xf32>
    %c805459861_i32 = arith.constant 805459861 : i32
    %161 = vector.broadcast %c805459861_i32 : i32 to vector<1x128xi32>
    %162 = arith.muli %158, %161 : vector<1x128xi32>
    %c1_i32_33 = arith.constant 1 : i32
    %163 = vector.broadcast %c1_i32_33 : i32 to vector<1x128xi32>
    %164 = arith.addi %158, %163 : vector<1x128xi32>
    %c805459861_i32_34 = arith.constant 805459861 : i32
    %165 = vector.broadcast %c805459861_i32_34 : i32 to vector<1x128xi32>
    %166 = arith.muli %164, %165 : vector<1x128xi32>
    %167 = tpu.iota {dimensions = array<i32: 0>} : vector<256x128xi32>
    %cst_35 = arith.constant 0.000000e+00 : f32
    %168 = vector.broadcast %cst_35 : f32 to vector<256x128xf32>
    %169 = arith.mulf %140, %150 : vector<1x128xf32>
    %170 = arith.xori %142, %152 : vector<1x128xi32>
    %171 = arith.mulf %169, %160 : vector<1x128xf32>
    %172 = arith.xori %170, %162 : vector<1x128xi32>
    %c255_i32 = arith.constant 255 : i32
    %173 = vector.broadcast %c255_i32 : i32 to vector<1x128xi32>
    %174 = arith.andi %172, %173 : vector<1x128xi32>
    %175 = vector.broadcast %174 : vector<1x128xi32> to vector<256x128xi32>
    %176 = arith.cmpi eq, %167, %175 : vector<256x128xi32>
    %cst_36 = arith.constant 0.000000e+00 : f32
    %177 = vector.shape_cast %171 : vector<1x128xf32> to vector<1x128xf32>
    %178 = vector.broadcast %177 : vector<1x128xf32> to vector<256x128xf32>
    %179 = vector.broadcast %cst_36 : f32 to vector<256x128xf32>
    %180 = arith.select %176, %178, %179 : vector<256x128xi1>, vector<256x128xf32>
    %181 = arith.addf %168, %180 : vector<256x128xf32>
    %182 = arith.mulf %137, %150 : vector<1x128xf32>
    %183 = arith.xori %146, %152 : vector<1x128xi32>
    %184 = arith.mulf %182, %160 : vector<1x128xf32>
    %185 = arith.xori %183, %162 : vector<1x128xi32>
    %c255_i32_37 = arith.constant 255 : i32
    %186 = vector.broadcast %c255_i32_37 : i32 to vector<1x128xi32>
    %187 = arith.andi %185, %186 : vector<1x128xi32>
    %188 = vector.broadcast %187 : vector<1x128xi32> to vector<256x128xi32>
    %189 = arith.cmpi eq, %167, %188 : vector<256x128xi32>
    %cst_38 = arith.constant 0.000000e+00 : f32
    %190 = vector.shape_cast %184 : vector<1x128xf32> to vector<1x128xf32>
    %191 = vector.broadcast %190 : vector<1x128xf32> to vector<256x128xf32>
    %192 = vector.broadcast %cst_38 : f32 to vector<256x128xf32>
    %193 = arith.select %189, %191, %192 : vector<256x128xi1>, vector<256x128xf32>
    %194 = arith.addf %181, %193 : vector<256x128xf32>
    %195 = arith.mulf %140, %147 : vector<1x128xf32>
    %196 = arith.xori %142, %156 : vector<1x128xi32>
    %197 = arith.mulf %195, %160 : vector<1x128xf32>
    %198 = arith.xori %196, %162 : vector<1x128xi32>
    %c255_i32_39 = arith.constant 255 : i32
    %199 = vector.broadcast %c255_i32_39 : i32 to vector<1x128xi32>
    %200 = arith.andi %198, %199 : vector<1x128xi32>
    %201 = vector.broadcast %200 : vector<1x128xi32> to vector<256x128xi32>
    %202 = arith.cmpi eq, %167, %201 : vector<256x128xi32>
    %cst_40 = arith.constant 0.000000e+00 : f32
    %203 = vector.shape_cast %197 : vector<1x128xf32> to vector<1x128xf32>
    %204 = vector.broadcast %203 : vector<1x128xf32> to vector<256x128xf32>
    %205 = vector.broadcast %cst_40 : f32 to vector<256x128xf32>
    %206 = arith.select %202, %204, %205 : vector<256x128xi1>, vector<256x128xf32>
    %207 = arith.addf %194, %206 : vector<256x128xf32>
    %208 = arith.mulf %137, %147 : vector<1x128xf32>
    %209 = arith.xori %146, %156 : vector<1x128xi32>
    %210 = arith.mulf %208, %160 : vector<1x128xf32>
    %211 = arith.xori %209, %162 : vector<1x128xi32>
    %c255_i32_41 = arith.constant 255 : i32
    %212 = vector.broadcast %c255_i32_41 : i32 to vector<1x128xi32>
    %213 = arith.andi %211, %212 : vector<1x128xi32>
    %214 = vector.broadcast %213 : vector<1x128xi32> to vector<256x128xi32>
    %215 = arith.cmpi eq, %167, %214 : vector<256x128xi32>
    %cst_42 = arith.constant 0.000000e+00 : f32
    %216 = vector.shape_cast %210 : vector<1x128xf32> to vector<1x128xf32>
    %217 = vector.broadcast %216 : vector<1x128xf32> to vector<256x128xf32>
    %218 = vector.broadcast %cst_42 : f32 to vector<256x128xf32>
    %219 = arith.select %215, %217, %218 : vector<256x128xi1>, vector<256x128xf32>
    %220 = arith.addf %207, %219 : vector<256x128xf32>
    %221 = arith.mulf %140, %150 : vector<1x128xf32>
    %222 = arith.xori %142, %152 : vector<1x128xi32>
    %223 = arith.mulf %221, %157 : vector<1x128xf32>
    %224 = arith.xori %222, %166 : vector<1x128xi32>
    %c255_i32_43 = arith.constant 255 : i32
    %225 = vector.broadcast %c255_i32_43 : i32 to vector<1x128xi32>
    %226 = arith.andi %224, %225 : vector<1x128xi32>
    %227 = vector.broadcast %226 : vector<1x128xi32> to vector<256x128xi32>
    %228 = arith.cmpi eq, %167, %227 : vector<256x128xi32>
    %cst_44 = arith.constant 0.000000e+00 : f32
    %229 = vector.shape_cast %223 : vector<1x128xf32> to vector<1x128xf32>
    %230 = vector.broadcast %229 : vector<1x128xf32> to vector<256x128xf32>
    %231 = vector.broadcast %cst_44 : f32 to vector<256x128xf32>
    %232 = arith.select %228, %230, %231 : vector<256x128xi1>, vector<256x128xf32>
    %233 = arith.addf %220, %232 : vector<256x128xf32>
    %234 = arith.mulf %137, %150 : vector<1x128xf32>
    %235 = arith.xori %146, %152 : vector<1x128xi32>
    %236 = arith.mulf %234, %157 : vector<1x128xf32>
    %237 = arith.xori %235, %166 : vector<1x128xi32>
    %c255_i32_45 = arith.constant 255 : i32
    %238 = vector.broadcast %c255_i32_45 : i32 to vector<1x128xi32>
    %239 = arith.andi %237, %238 : vector<1x128xi32>
    %240 = vector.broadcast %239 : vector<1x128xi32> to vector<256x128xi32>
    %241 = arith.cmpi eq, %167, %240 : vector<256x128xi32>
    %cst_46 = arith.constant 0.000000e+00 : f32
    %242 = vector.shape_cast %236 : vector<1x128xf32> to vector<1x128xf32>
    %243 = vector.broadcast %242 : vector<1x128xf32> to vector<256x128xf32>
    %244 = vector.broadcast %cst_46 : f32 to vector<256x128xf32>
    %245 = arith.select %241, %243, %244 : vector<256x128xi1>, vector<256x128xf32>
    %246 = arith.addf %233, %245 : vector<256x128xf32>
    %247 = arith.mulf %140, %147 : vector<1x128xf32>
    %248 = arith.xori %142, %156 : vector<1x128xi32>
    %249 = arith.mulf %247, %157 : vector<1x128xf32>
    %250 = arith.xori %248, %166 : vector<1x128xi32>
    %c255_i32_47 = arith.constant 255 : i32
    %251 = vector.broadcast %c255_i32_47 : i32 to vector<1x128xi32>
    %252 = arith.andi %250, %251 : vector<1x128xi32>
    %253 = vector.broadcast %252 : vector<1x128xi32> to vector<256x128xi32>
    %254 = arith.cmpi eq, %167, %253 : vector<256x128xi32>
    %cst_48 = arith.constant 0.000000e+00 : f32
    %255 = vector.shape_cast %249 : vector<1x128xf32> to vector<1x128xf32>
    %256 = vector.broadcast %255 : vector<1x128xf32> to vector<256x128xf32>
    %257 = vector.broadcast %cst_48 : f32 to vector<256x128xf32>
    %258 = arith.select %254, %256, %257 : vector<256x128xi1>, vector<256x128xf32>
    %259 = arith.addf %246, %258 : vector<256x128xf32>
    %260 = arith.mulf %137, %147 : vector<1x128xf32>
    %261 = arith.xori %146, %156 : vector<1x128xi32>
    %262 = arith.mulf %260, %157 : vector<1x128xf32>
    %263 = arith.xori %261, %166 : vector<1x128xi32>
    %c255_i32_49 = arith.constant 255 : i32
    %264 = vector.broadcast %c255_i32_49 : i32 to vector<1x128xi32>
    %265 = arith.andi %263, %264 : vector<1x128xi32>
    %266 = vector.broadcast %265 : vector<1x128xi32> to vector<256x128xi32>
    %267 = arith.cmpi eq, %167, %266 : vector<256x128xi32>
    %cst_50 = arith.constant 0.000000e+00 : f32
    %268 = vector.shape_cast %262 : vector<1x128xf32> to vector<1x128xf32>
    %269 = vector.broadcast %268 : vector<1x128xf32> to vector<256x128xf32>
    %270 = vector.broadcast %cst_50 : f32 to vector<256x128xf32>
    %271 = arith.select %267, %269, %270 : vector<256x128xi1>, vector<256x128xf32>
    %272 = arith.addf %259, %271 : vector<256x128xf32>
    %c128 = arith.constant 128 : index
    %c0_51 = arith.constant 0 : index
    %273 = vector.load %arg5[%c128, %c0_51] : memref<896x128xf32, #tpu.memory_space<vmem>>, vector<256x128xf32>
    tpu.vector_store %arg5[%c128, %c0_51], %272 {strides = array<i32>} : memref<896x128xf32, #tpu.memory_space<vmem>>, vector<256x128xf32>,
    %cst_52 = arith.constant 1.500000e+01 : f32
    %274 = vector.broadcast %cst_52 : f32 to vector<3x128xf32>
    %275 = arith.mulf %1, %274 : vector<3x128xf32>
    %cst_53 = arith.constant 5.000000e-01 : f32
    %276 = vector.broadcast %cst_53 : f32 to vector<3x128xf32>
    %277 = arith.addf %275, %276 : vector<3x128xf32>
    %278 = math.floor %277 : vector<3x128xf32>
    %279 = arith.subf %277, %278 : vector<3x128xf32>
    %280 = arith.fptosi %278 : vector<3x128xf32> to vector<3x128xi32>
    %281 = vector.extract_strided_slice %279 {offsets = [0, 0], sizes = [1, 128], strides = [1, 1]} : vector<3x128xf32> to vector<1x128xf32>
    %282 = vector.extract_strided_slice %280 {offsets = [0, 0], sizes = [1, 128], strides = [1, 1]} : vector<3x128xi32> to vector<1x128xi32>
    %cst_54 = arith.constant 1.000000e+00 : f32
    %283 = vector.broadcast %cst_54 : f32 to vector<1x128xf32>
    %284 = arith.subf %283, %281 : vector<1x128xf32>
    %c1_i32_55 = arith.constant 1 : i32
    %285 = vector.broadcast %c1_i32_55 : i32 to vector<1x128xi32>
    %286 = arith.muli %282, %285 : vector<1x128xi32>
    %c1_i32_56 = arith.constant 1 : i32
    %287 = vector.broadcast %c1_i32_56 : i32 to vector<1x128xi32>
    %288 = arith.addi %282, %287 : vector<1x128xi32>
    %c1_i32_57 = arith.constant 1 : i32
    %289 = vector.broadcast %c1_i32_57 : i32 to vector<1x128xi32>
    %290 = arith.muli %288, %289 : vector<1x128xi32>
    %291 = vector.extract_strided_slice %279 {offsets = [1, 0], sizes = [1, 128], strides = [1, 1]} : vector<3x128xf32> to vector<1x128xf32>
    %292 = vector.extract_strided_slice %280 {offsets = [1, 0], sizes = [1, 128], strides = [1, 1]} : vector<3x128xi32> to vector<1x128xi32>
    %cst_58 = arith.constant 1.000000e+00 : f32
    %293 = vector.broadcast %cst_58 : f32 to vector<1x128xf32>
    %294 = arith.subf %293, %291 : vector<1x128xf32>
    %c-1640531535_i32_59 = arith.constant -1640531535 : i32
    %295 = vector.broadcast %c-1640531535_i32_59 : i32 to vector<1x128xi32>
    %296 = arith.muli %292, %295 : vector<1x128xi32>
    %c1_i32_60 = arith.constant 1 : i32
    %297 = vector.broadcast %c1_i32_60 : i32 to vector<1x128xi32>
    %298 = arith.addi %292, %297 : vector<1x128xi32>
    %c-1640531535_i32_61 = arith.constant -1640531535 : i32
    %299 = vector.broadcast %c-1640531535_i32_61 : i32 to vector<1x128xi32>
    %300 = arith.muli %298, %299 : vector<1x128xi32>
    %301 = vector.extract_strided_slice %279 {offsets = [2, 0], sizes = [1, 128], strides = [1, 1]} : vector<3x128xf32> to vector<1x128xf32>
    %302 = vector.extract_strided_slice %280 {offsets = [2, 0], sizes = [1, 128], strides = [1, 1]} : vector<3x128xi32> to vector<1x128xi32>
    %cst_62 = arith.constant 1.000000e+00 : f32
    %303 = vector.broadcast %cst_62 : f32 to vector<1x128xf32>
    %304 = arith.subf %303, %301 : vector<1x128xf32>
    %c805459861_i32_63 = arith.constant 805459861 : i32
    %305 = vector.broadcast %c805459861_i32_63 : i32 to vector<1x128xi32>
    %306 = arith.muli %302, %305 : vector<1x128xi32>
    %c1_i32_64 = arith.constant 1 : i32
    %307 = vector.broadcast %c1_i32_64 : i32 to vector<1x128xi32>
    %308 = arith.addi %302, %307 : vector<1x128xi32>
    %c805459861_i32_65 = arith.constant 805459861 : i32
    %309 = vector.broadcast %c805459861_i32_65 : i32 to vector<1x128xi32>
    %310 = arith.muli %308, %309 : vector<1x128xi32>
    %311 = tpu.iota {dimensions = array<i32: 0>} : vector<256x128xi32>
    %cst_66 = arith.constant 0.000000e+00 : f32
    %312 = vector.broadcast %cst_66 : f32 to vector<256x128xf32>
    %313 = arith.mulf %284, %294 : vector<1x128xf32>
    %314 = arith.xori %286, %296 : vector<1x128xi32>
    %315 = arith.mulf %313, %304 : vector<1x128xf32>
    %316 = arith.xori %314, %306 : vector<1x128xi32>
    %c255_i32_67 = arith.constant 255 : i32
    %317 = vector.broadcast %c255_i32_67 : i32 to vector<1x128xi32>
    %318 = arith.andi %316, %317 : vector<1x128xi32>
    %319 = vector.broadcast %318 : vector<1x128xi32> to vector<256x128xi32>
    %320 = arith.cmpi eq, %311, %319 : vector<256x128xi32>
    %cst_68 = arith.constant 0.000000e+00 : f32
    %321 = vector.shape_cast %315 : vector<1x128xf32> to vector<1x128xf32>
    %322 = vector.broadcast %321 : vector<1x128xf32> to vector<256x128xf32>
    %323 = vector.broadcast %cst_68 : f32 to vector<256x128xf32>
    %324 = arith.select %320, %322, %323 : vector<256x128xi1>, vector<256x128xf32>
    %325 = arith.addf %312, %324 : vector<256x128xf32>
    %326 = arith.mulf %281, %294 : vector<1x128xf32>
    %327 = arith.xori %290, %296 : vector<1x128xi32>
    %328 = arith.mulf %326, %304 : vector<1x128xf32>
    %329 = arith.xori %327, %306 : vector<1x128xi32>
    %c255_i32_69 = arith.constant 255 : i32
    %330 = vector.broadcast %c255_i32_69 : i32 to vector<1x128xi32>
    %331 = arith.andi %329, %330 : vector<1x128xi32>
    %332 = vector.broadcast %331 : vector<1x128xi32> to vector<256x128xi32>
    %333 = arith.cmpi eq, %311, %332 : vector<256x128xi32>
    %cst_70 = arith.constant 0.000000e+00 : f32
    %334 = vector.shape_cast %328 : vector<1x128xf32> to vector<1x128xf32>
    %335 = vector.broadcast %334 : vector<1x128xf32> to vector<256x128xf32>
    %336 = vector.broadcast %cst_70 : f32 to vector<256x128xf32>
    %337 = arith.select %333, %335, %336 : vector<256x128xi1>, vector<256x128xf32>
    %338 = arith.addf %325, %337 : vector<256x128xf32>
    %339 = arith.mulf %284, %291 : vector<1x128xf32>
    %340 = arith.xori %286, %300 : vector<1x128xi32>
    %341 = arith.mulf %339, %304 : vector<1x128xf32>
    %342 = arith.xori %340, %306 : vector<1x128xi32>
    %c255_i32_71 = arith.constant 255 : i32
    %343 = vector.broadcast %c255_i32_71 : i32 to vector<1x128xi32>
    %344 = arith.andi %342, %343 : vector<1x128xi32>
    %345 = vector.broadcast %344 : vector<1x128xi32> to vector<256x128xi32>
    %346 = arith.cmpi eq, %311, %345 : vector<256x128xi32>
    %cst_72 = arith.constant 0.000000e+00 : f32
    %347 = vector.shape_cast %341 : vector<1x128xf32> to vector<1x128xf32>
    %348 = vector.broadcast %347 : vector<1x128xf32> to vector<256x128xf32>
    %349 = vector.broadcast %cst_72 : f32 to vector<256x128xf32>
    %350 = arith.select %346, %348, %349 : vector<256x128xi1>, vector<256x128xf32>
    %351 = arith.addf %338, %350 : vector<256x128xf32>
    %352 = arith.mulf %281, %291 : vector<1x128xf32>
    %353 = arith.xori %290, %300 : vector<1x128xi32>
    %354 = arith.mulf %352, %304 : vector<1x128xf32>
    %355 = arith.xori %353, %306 : vector<1x128xi32>
    %c255_i32_73 = arith.constant 255 : i32
    %356 = vector.broadcast %c255_i32_73 : i32 to vector<1x128xi32>
    %357 = arith.andi %355, %356 : vector<1x128xi32>
    %358 = vector.broadcast %357 : vector<1x128xi32> to vector<256x128xi32>
    %359 = arith.cmpi eq, %311, %358 : vector<256x128xi32>
    %cst_74 = arith.constant 0.000000e+00 : f32
    %360 = vector.shape_cast %354 : vector<1x128xf32> to vector<1x128xf32>
    %361 = vector.broadcast %360 : vector<1x128xf32> to vector<256x128xf32>
    %362 = vector.broadcast %cst_74 : f32 to vector<256x128xf32>
    %363 = arith.select %359, %361, %362 : vector<256x128xi1>, vector<256x128xf32>
    %364 = arith.addf %351, %363 : vector<256x128xf32>
    %365 = arith.mulf %284, %294 : vector<1x128xf32>
    %366 = arith.xori %286, %296 : vector<1x128xi32>
    %367 = arith.mulf %365, %301 : vector<1x128xf32>
    %368 = arith.xori %366, %310 : vector<1x128xi32>
    %c255_i32_75 = arith.constant 255 : i32
    %369 = vector.broadcast %c255_i32_75 : i32 to vector<1x128xi32>
    %370 = arith.andi %368, %369 : vector<1x128xi32>
    %371 = vector.broadcast %370 : vector<1x128xi32> to vector<256x128xi32>
    %372 = arith.cmpi eq, %311, %371 : vector<256x128xi32>
    %cst_76 = arith.constant 0.000000e+00 : f32
    %373 = vector.shape_cast %367 : vector<1x128xf32> to vector<1x128xf32>
    %374 = vector.broadcast %373 : vector<1x128xf32> to vector<256x128xf32>
    %375 = vector.broadcast %cst_76 : f32 to vector<256x128xf32>
    %376 = arith.select %372, %374, %375 : vector<256x128xi1>, vector<256x128xf32>
    %377 = arith.addf %364, %376 : vector<256x128xf32>
    %378 = arith.mulf %281, %294 : vector<1x128xf32>
    %379 = arith.xori %290, %296 : vector<1x128xi32>
    %380 = arith.mulf %378, %301 : vector<1x128xf32>
    %381 = arith.xori %379, %310 : vector<1x128xi32>
    %c255_i32_77 = arith.constant 255 : i32
    %382 = vector.broadcast %c255_i32_77 : i32 to vector<1x128xi32>
    %383 = arith.andi %381, %382 : vector<1x128xi32>
    %384 = vector.broadcast %383 : vector<1x128xi32> to vector<256x128xi32>
    %385 = arith.cmpi eq, %311, %384 : vector<256x128xi32>
    %cst_78 = arith.constant 0.000000e+00 : f32
    %386 = vector.shape_cast %380 : vector<1x128xf32> to vector<1x128xf32>
    %387 = vector.broadcast %386 : vector<1x128xf32> to vector<256x128xf32>
    %388 = vector.broadcast %cst_78 : f32 to vector<256x128xf32>
    %389 = arith.select %385, %387, %388 : vector<256x128xi1>, vector<256x128xf32>
    %390 = arith.addf %377, %389 : vector<256x128xf32>
    %391 = arith.mulf %284, %291 : vector<1x128xf32>
    %392 = arith.xori %286, %300 : vector<1x128xi32>
    %393 = arith.mulf %391, %301 : vector<1x128xf32>
    %394 = arith.xori %392, %310 : vector<1x128xi32>
    %c255_i32_79 = arith.constant 255 : i32
    %395 = vector.broadcast %c255_i32_79 : i32 to vector<1x128xi32>
    %396 = arith.andi %394, %395 : vector<1x128xi32>
    %397 = vector.broadcast %396 : vector<1x128xi32> to vector<256x128xi32>
    %398 = arith.cmpi eq, %311, %397 : vector<256x128xi32>
    %cst_80 = arith.constant 0.000000e+00 : f32
    %399 = vector.shape_cast %393 : vector<1x128xf32> to vector<1x128xf32>
    %400 = vector.broadcast %399 : vector<1x128xf32> to vector<256x128xf32>
    %401 = vector.broadcast %cst_80 : f32 to vector<256x128xf32>
    %402 = arith.select %398, %400, %401 : vector<256x128xi1>, vector<256x128xf32>
    %403 = arith.addf %390, %402 : vector<256x128xf32>
    %404 = arith.mulf %281, %291 : vector<1x128xf32>
    %405 = arith.xori %290, %300 : vector<1x128xi32>
    %406 = arith.mulf %404, %301 : vector<1x128xf32>
    %407 = arith.xori %405, %310 : vector<1x128xi32>
    %c255_i32_81 = arith.constant 255 : i32
    %408 = vector.broadcast %c255_i32_81 : i32 to vector<1x128xi32>
    %409 = arith.andi %407, %408 : vector<1x128xi32>
    %410 = vector.broadcast %409 : vector<1x128xi32> to vector<256x128xi32>
    %411 = arith.cmpi eq, %311, %410 : vector<256x128xi32>
    %cst_82 = arith.constant 0.000000e+00 : f32
    %412 = vector.shape_cast %406 : vector<1x128xf32> to vector<1x128xf32>
    %413 = vector.broadcast %412 : vector<1x128xf32> to vector<256x128xf32>
    %414 = vector.broadcast %cst_82 : f32 to vector<256x128xf32>
    %415 = arith.select %411, %413, %414 : vector<256x128xi1>, vector<256x128xf32>
    %416 = arith.addf %403, %415 : vector<256x128xf32>
    %c384 = arith.constant 384 : index
    %c0_83 = arith.constant 0 : index
    %417 = vector.load %arg5[%c384, %c0_83] : memref<896x128xf32, #tpu.memory_space<vmem>>, vector<256x128xf32>
    tpu.vector_store %arg5[%c384, %c0_83], %416 {strides = array<i32>} : memref<896x128xf32, #tpu.memory_space<vmem>>, vector<256x128xf32>,
    %cst_84 = arith.constant 3.100000e+01 : f32
    %418 = vector.broadcast %cst_84 : f32 to vector<3x128xf32>
    %419 = arith.mulf %1, %418 : vector<3x128xf32>
    %cst_85 = arith.constant 5.000000e-01 : f32
    %420 = vector.broadcast %cst_85 : f32 to vector<3x128xf32>
    %421 = arith.addf %419, %420 : vector<3x128xf32>
    %422 = math.floor %421 : vector<3x128xf32>
    %423 = arith.subf %421, %422 : vector<3x128xf32>
    %424 = arith.fptosi %422 : vector<3x128xf32> to vector<3x128xi32>
    %425 = vector.extract_strided_slice %423 {offsets = [0, 0], sizes = [1, 128], strides = [1, 1]} : vector<3x128xf32> to vector<1x128xf32>
    %426 = vector.extract_strided_slice %424 {offsets = [0, 0], sizes = [1, 128], strides = [1, 1]} : vector<3x128xi32> to vector<1x128xi32>
    %cst_86 = arith.constant 1.000000e+00 : f32
    %427 = vector.broadcast %cst_86 : f32 to vector<1x128xf32>
    %428 = arith.subf %427, %425 : vector<1x128xf32>
    %c1_i32_87 = arith.constant 1 : i32
    %429 = vector.broadcast %c1_i32_87 : i32 to vector<1x128xi32>
    %430 = arith.muli %426, %429 : vector<1x128xi32>
    %c1_i32_88 = arith.constant 1 : i32
    %431 = vector.broadcast %c1_i32_88 : i32 to vector<1x128xi32>
    %432 = arith.addi %426, %431 : vector<1x128xi32>
    %c1_i32_89 = arith.constant 1 : i32
    %433 = vector.broadcast %c1_i32_89 : i32 to vector<1x128xi32>
    %434 = arith.muli %432, %433 : vector<1x128xi32>
    %435 = vector.extract_strided_slice %423 {offsets = [1, 0], sizes = [1, 128], strides = [1, 1]} : vector<3x128xf32> to vector<1x128xf32>
    %436 = vector.extract_strided_slice %424 {offsets = [1, 0], sizes = [1, 128], strides = [1, 1]} : vector<3x128xi32> to vector<1x128xi32>
    %cst_90 = arith.constant 1.000000e+00 : f32
    %437 = vector.broadcast %cst_90 : f32 to vector<1x128xf32>
    %438 = arith.subf %437, %435 : vector<1x128xf32>
    %c-1640531535_i32_91 = arith.constant -1640531535 : i32
    %439 = vector.broadcast %c-1640531535_i32_91 : i32 to vector<1x128xi32>
    %440 = arith.muli %436, %439 : vector<1x128xi32>
    %c1_i32_92 = arith.constant 1 : i32
    %441 = vector.broadcast %c1_i32_92 : i32 to vector<1x128xi32>
    %442 = arith.addi %436, %441 : vector<1x128xi32>
    %c-1640531535_i32_93 = arith.constant -1640531535 : i32
    %443 = vector.broadcast %c-1640531535_i32_93 : i32 to vector<1x128xi32>
    %444 = arith.muli %442, %443 : vector<1x128xi32>
    %445 = vector.extract_strided_slice %423 {offsets = [2, 0], sizes = [1, 128], strides = [1, 1]} : vector<3x128xf32> to vector<1x128xf32>
    %446 = vector.extract_strided_slice %424 {offsets = [2, 0], sizes = [1, 128], strides = [1, 1]} : vector<3x128xi32> to vector<1x128xi32>
    %cst_94 = arith.constant 1.000000e+00 : f32
    %447 = vector.broadcast %cst_94 : f32 to vector<1x128xf32>
    %448 = arith.subf %447, %445 : vector<1x128xf32>
    %c805459861_i32_95 = arith.constant 805459861 : i32
    %449 = vector.broadcast %c805459861_i32_95 : i32 to vector<1x128xi32>
    %450 = arith.muli %446, %449 : vector<1x128xi32>
    %c1_i32_96 = arith.constant 1 : i32
    %451 = vector.broadcast %c1_i32_96 : i32 to vector<1x128xi32>
    %452 = arith.addi %446, %451 : vector<1x128xi32>
    %c805459861_i32_97 = arith.constant 805459861 : i32
    %453 = vector.broadcast %c805459861_i32_97 : i32 to vector<1x128xi32>
    %454 = arith.muli %452, %453 : vector<1x128xi32>
    %455 = tpu.iota {dimensions = array<i32: 0>} : vector<256x128xi32>
    %cst_98 = arith.constant 0.000000e+00 : f32
    %456 = vector.broadcast %cst_98 : f32 to vector<256x128xf32>
    %457 = arith.mulf %428, %438 : vector<1x128xf32>
    %458 = arith.xori %430, %440 : vector<1x128xi32>
    %459 = arith.mulf %457, %448 : vector<1x128xf32>
    %460 = arith.xori %458, %450 : vector<1x128xi32>
    %c255_i32_99 = arith.constant 255 : i32
    %461 = vector.broadcast %c255_i32_99 : i32 to vector<1x128xi32>
    %462 = arith.andi %460, %461 : vector<1x128xi32>
    %463 = vector.broadcast %462 : vector<1x128xi32> to vector<256x128xi32>
    %464 = arith.cmpi eq, %455, %463 : vector<256x128xi32>
    %cst_100 = arith.constant 0.000000e+00 : f32
    %465 = vector.shape_cast %459 : vector<1x128xf32> to vector<1x128xf32>
    %466 = vector.broadcast %465 : vector<1x128xf32> to vector<256x128xf32>
    %467 = vector.broadcast %cst_100 : f32 to vector<256x128xf32>
    %468 = arith.select %464, %466, %467 : vector<256x128xi1>, vector<256x128xf32>
    %469 = arith.addf %456, %468 : vector<256x128xf32>
    %470 = arith.mulf %425, %438 : vector<1x128xf32>
    %471 = arith.xori %434, %440 : vector<1x128xi32>
    %472 = arith.mulf %470, %448 : vector<1x128xf32>
    %473 = arith.xori %471, %450 : vector<1x128xi32>
    %c255_i32_101 = arith.constant 255 : i32
    %474 = vector.broadcast %c255_i32_101 : i32 to vector<1x128xi32>
    %475 = arith.andi %473, %474 : vector<1x128xi32>
    %476 = vector.broadcast %475 : vector<1x128xi32> to vector<256x128xi32>
    %477 = arith.cmpi eq, %455, %476 : vector<256x128xi32>
    %cst_102 = arith.constant 0.000000e+00 : f32
    %478 = vector.shape_cast %472 : vector<1x128xf32> to vector<1x128xf32>
    %479 = vector.broadcast %478 : vector<1x128xf32> to vector<256x128xf32>
    %480 = vector.broadcast %cst_102 : f32 to vector<256x128xf32>
    %481 = arith.select %477, %479, %480 : vector<256x128xi1>, vector<256x128xf32>
    %482 = arith.addf %469, %481 : vector<256x128xf32>
    %483 = arith.mulf %428, %435 : vector<1x128xf32>
    %484 = arith.xori %430, %444 : vector<1x128xi32>
    %485 = arith.mulf %483, %448 : vector<1x128xf32>
    %486 = arith.xori %484, %450 : vector<1x128xi32>
    %c255_i32_103 = arith.constant 255 : i32
    %487 = vector.broadcast %c255_i32_103 : i32 to vector<1x128xi32>
    %488 = arith.andi %486, %487 : vector<1x128xi32>
    %489 = vector.broadcast %488 : vector<1x128xi32> to vector<256x128xi32>
    %490 = arith.cmpi eq, %455, %489 : vector<256x128xi32>
    %cst_104 = arith.constant 0.000000e+00 : f32
    %491 = vector.shape_cast %485 : vector<1x128xf32> to vector<1x128xf32>
    %492 = vector.broadcast %491 : vector<1x128xf32> to vector<256x128xf32>
    %493 = vector.broadcast %cst_104 : f32 to vector<256x128xf32>
    %494 = arith.select %490, %492, %493 : vector<256x128xi1>, vector<256x128xf32>
    %495 = arith.addf %482, %494 : vector<256x128xf32>
    %496 = arith.mulf %425, %435 : vector<1x128xf32>
    %497 = arith.xori %434, %444 : vector<1x128xi32>
    %498 = arith.mulf %496, %448 : vector<1x128xf32>
    %499 = arith.xori %497, %450 : vector<1x128xi32>
    %c255_i32_105 = arith.constant 255 : i32
    %500 = vector.broadcast %c255_i32_105 : i32 to vector<1x128xi32>
    %501 = arith.andi %499, %500 : vector<1x128xi32>
    %502 = vector.broadcast %501 : vector<1x128xi32> to vector<256x128xi32>
    %503 = arith.cmpi eq, %455, %502 : vector<256x128xi32>
    %cst_106 = arith.constant 0.000000e+00 : f32
    %504 = vector.shape_cast %498 : vector<1x128xf32> to vector<1x128xf32>
    %505 = vector.broadcast %504 : vector<1x128xf32> to vector<256x128xf32>
    %506 = vector.broadcast %cst_106 : f32 to vector<256x128xf32>
    %507 = arith.select %503, %505, %506 : vector<256x128xi1>, vector<256x128xf32>
    %508 = arith.addf %495, %507 : vector<256x128xf32>
    %509 = arith.mulf %428, %438 : vector<1x128xf32>
    %510 = arith.xori %430, %440 : vector<1x128xi32>
    %511 = arith.mulf %509, %445 : vector<1x128xf32>
    %512 = arith.xori %510, %454 : vector<1x128xi32>
    %c255_i32_107 = arith.constant 255 : i32
    %513 = vector.broadcast %c255_i32_107 : i32 to vector<1x128xi32>
    %514 = arith.andi %512, %513 : vector<1x128xi32>
    %515 = vector.broadcast %514 : vector<1x128xi32> to vector<256x128xi32>
    %516 = arith.cmpi eq, %455, %515 : vector<256x128xi32>
    %cst_108 = arith.constant 0.000000e+00 : f32
    %517 = vector.shape_cast %511 : vector<1x128xf32> to vector<1x128xf32>
    %518 = vector.broadcast %517 : vector<1x128xf32> to vector<256x128xf32>
    %519 = vector.broadcast %cst_108 : f32 to vector<256x128xf32>
    %520 = arith.select %516, %518, %519 : vector<256x128xi1>, vector<256x128xf32>
    %521 = arith.addf %508, %520 : vector<256x128xf32>
    %522 = arith.mulf %425, %438 : vector<1x128xf32>
    %523 = arith.xori %434, %440 : vector<1x128xi32>
    %524 = arith.mulf %522, %445 : vector<1x128xf32>
    %525 = arith.xori %523, %454 : vector<1x128xi32>
    %c255_i32_109 = arith.constant 255 : i32
    %526 = vector.broadcast %c255_i32_109 : i32 to vector<1x128xi32>
    %527 = arith.andi %525, %526 : vector<1x128xi32>
    %528 = vector.broadcast %527 : vector<1x128xi32> to vector<256x128xi32>
    %529 = arith.cmpi eq, %455, %528 : vector<256x128xi32>
    %cst_110 = arith.constant 0.000000e+00 : f32
    %530 = vector.shape_cast %524 : vector<1x128xf32> to vector<1x128xf32>
    %531 = vector.broadcast %530 : vector<1x128xf32> to vector<256x128xf32>
    %532 = vector.broadcast %cst_110 : f32 to vector<256x128xf32>
    %533 = arith.select %529, %531, %532 : vector<256x128xi1>, vector<256x128xf32>
    %534 = arith.addf %521, %533 : vector<256x128xf32>
    %535 = arith.mulf %428, %435 : vector<1x128xf32>
    %536 = arith.xori %430, %444 : vector<1x128xi32>
    %537 = arith.mulf %535, %445 : vector<1x128xf32>
    %538 = arith.xori %536, %454 : vector<1x128xi32>
    %c255_i32_111 = arith.constant 255 : i32
    %539 = vector.broadcast %c255_i32_111 : i32 to vector<1x128xi32>
    %540 = arith.andi %538, %539 : vector<1x128xi32>
    %541 = vector.broadcast %540 : vector<1x128xi32> to vector<256x128xi32>
    %542 = arith.cmpi eq, %455, %541 : vector<256x128xi32>
    %cst_112 = arith.constant 0.000000e+00 : f32
    %543 = vector.shape_cast %537 : vector<1x128xf32> to vector<1x128xf32>
    %544 = vector.broadcast %543 : vector<1x128xf32> to vector<256x128xf32>
    %545 = vector.broadcast %cst_112 : f32 to vector<256x128xf32>
    %546 = arith.select %542, %544, %545 : vector<256x128xi1>, vector<256x128xf32>
    %547 = arith.addf %534, %546 : vector<256x128xf32>
    %548 = arith.mulf %425, %435 : vector<1x128xf32>
    %549 = arith.xori %434, %444 : vector<1x128xi32>
    %550 = arith.mulf %548, %445 : vector<1x128xf32>
    %551 = arith.xori %549, %454 : vector<1x128xi32>
    %c255_i32_113 = arith.constant 255 : i32
    %552 = vector.broadcast %c255_i32_113 : i32 to vector<1x128xi32>
    %553 = arith.andi %551, %552 : vector<1x128xi32>
    %554 = vector.broadcast %553 : vector<1x128xi32> to vector<256x128xi32>
    %555 = arith.cmpi eq, %455, %554 : vector<256x128xi32>
    %cst_114 = arith.constant 0.000000e+00 : f32
    %556 = vector.shape_cast %550 : vector<1x128xf32> to vector<1x128xf32>
    %557 = vector.broadcast %556 : vector<1x128xf32> to vector<256x128xf32>
    %558 = vector.broadcast %cst_114 : f32 to vector<256x128xf32>
    %559 = arith.select %555, %557, %558 : vector<256x128xi1>, vector<256x128xf32>
    %560 = arith.addf %547, %559 : vector<256x128xf32>
    %c640 = arith.constant 640 : index
    %c0_115 = arith.constant 0 : index
    %561 = vector.load %arg5[%c640, %c0_115] : memref<896x128xf32, #tpu.memory_space<vmem>>, vector<256x128xf32>
    tpu.vector_store %arg5[%c640, %c0_115], %560 {strides = array<i32>} : memref<896x128xf32, #tpu.memory_space<vmem>>, vector<256x128xf32>,
    %c0_116 = arith.constant 0 : index
    %c0_117 = arith.constant 0 : index
    %c0_118 = arith.constant 0 : index
    %562 = vector.load %arg3[%c0_116, %c0_117, %c0_118] : memref<1x8x896xf32, #tpu.memory_space<vmem>>, vector<1x8x896xf32>
    %563 = vector.shape_cast %562 : vector<1x8x896xf32> to vector<8x896xf32>
    %c0_119 = arith.constant 0 : index
    %c0_120 = arith.constant 0 : index
    %564 = vector.load %arg5[%c0_119, %c0_120] : memref<896x128xf32, #tpu.memory_space<vmem>>, vector<896x128xf32>
    %cst_121 = arith.constant dense<0.000000e+00> : vector<8x128xf32>
    %565 = tpu.matmul %563, %564, %cst_121 {dimension_numbers = #tpu.dot_dimension_numbers<[1], [0], [0], [1], [0, 0, 1, 1], [], []>} : vector<8x896xf32>, vector<896x128xf32>, vector<8x128xf32> -> vector<8x128xf32>
    %c0_122 = arith.constant 0 : index
    %c0_123 = arith.constant 0 : index
    %c0_124 = arith.constant 0 : index
    %566 = vector.load %arg4[%c0_122, %c0_123, %c0_124] : memref<1x8x128xf32, #tpu.memory_space<vmem>>, vector<1x8x128xf32>
    %567 = vector.shape_cast %566 : vector<1x8x128xf32> to vector<8x128xf32>
    %568 = vector.shape_cast %565 : vector<8x128xf32> to vector<1x8x128xf32>
    tpu.vector_store %arg4[%c0_122, %c0_123, %c0_124], %568 {strides = array<i32>} : memref<1x8x128xf32, #tpu.memory_space<vmem>>, vector<1x8x128xf32>,
    return
  }
  func.func @transform_0(%arg0: i32, %arg1: i32) -> (i32, i32, i32) {
    %c0_i32 = arith.constant 0 : i32
    %c0_i32_0 = arith.constant 0 : i32
    return %arg0, %c0_i32, %arg1 : i32, i32, i32
  }
  func.func @transform_1(%arg0: i32, %arg1: i32) -> (i32, i32, i32) {
    %c0_i32 = arith.constant 0 : i32
    %c0_i32_0 = arith.constant 0 : i32
    %c0_i32_1 = arith.constant 0 : i32
    return %arg0, %c0_i32, %c0_i32_0 : i32, i32, i32
  }
  func.func @transform_2(%arg0: i32, %arg1: i32) -> (i32, i32, i32) {
    %c0_i32 = arith.constant 0 : i32
    %c0_i32_0 = arith.constant 0 : i32
    return %arg0, %c0_i32, %arg1 : i32, i32, i32
  }
}

</mosaic_0001>

<bundles_post_ra>
// kernel: tpu_custom_call.1
= control target key start
LH: loop header
LB: loop body
LE: loop exit
PB: predicated region body
PF: predicated region fallthrough
CT: control target
= control target key end

     0   :  { %7 = vsyncpa [#allocation4], 0  ;;  %s7769_s0 = inlined_call_operand.vmem [shape: f32[4,3,128], index: 0, kind: input, shape index: {}]   ;;  %s7770_s1 = inlined_call_operand.hbm [shape: f32[4,8,896], index: 1, kind: input, shape index: {}]   ;;  %s7771_s2 = inlined_call_operand.hbm [shape: f32[4,8,128], index: 2, kind: output, shape index: {}]  }
   0x1   :  { %9 = vsyncpa [#allocation4 + $0x1], 0 }
   0x2   :  { %10 = vsyncpa [#allocation5], 0 }
   0x3   :  { %12 = vsyncpa [#allocation5 + $0x1], 0  ;;  %s4520_s9 = smov 0   ;;  %s4522_s10 = smov 0  }
   0x4   :  { %s4524_s11 = smov 0   ;;  %s4526_s12 = smov 0  }
   0x5   :  { %s4528_s13 = smov 0   ;;  %s4530_s14 = smov 0  }
   0x6 LB: > { %s4021_s15 = sadd.s32 4294967295, %s4498_s14   ;;  %s4022_s16 = sadd.s32 4294967294, %s4498_s14   ;;  %s4498_s14 = sphi %s4530_s14, %s18_s14   ;;  %s4494_s13 = sphi %s4528_s13, %s8055_s13   ;;  %s4490_s12 = sphi %s4526_s12, %s8054_s12   ;;  %s4486_s11 = sphi %s4524_s11, %s8053_s11   ;;  %s4482_s10 = sphi %s4522_s10, %s8052_s10   ;;  %s4478_s9 = sphi %s4520_s9, %s8051_s9  }
   0x7   : > { %s30_s17 = sadd.s32 1, %s4494_s13  ;;  %s65_s18 = sadd.s32 1, %s4486_s11 }
   0x8   : > { %p32_p0 = scmp.ge.s32.totalorder %s30_s17, 4  ;;  %p72_p1 = scmp.ne.s32.totalorder %s4486_s11, %s4482_s10 }
   0x9   : > { %p73_p2 = scmp.eq.s32.totalorder %s4498_s14, 0  ;;  %p78_p3 = scmp.ne.s32.totalorder %s4482_s10, %s4478_s9 }
   0xa   : > { %s8057_s17 = smov (%p32_p0, %s30_s17), 0  ;;  %p79_p5 = scmp.eq.s32.totalorder %s4021_s15, 0 }
   0xb   : > { %p4561_p4 = por %p73_p2, %p72_p1  ;;  %s62_s20 = ssub.s32 %s4494_s13, %s8057_s17 }
   0xc   : > { %p104_p6 = scmp.eq.s32.totalorder %s4021_s15, 3  ;;  %p63_p7 = scmp.eq.s32.totalorder %s62_s20, 0 }
   0xd   : > { %p4567_p8 = por %p79_p5, %p78_p3  ;;  %p110_p10 = scmp.eq.s32.totalorder %s4022_s16, 3 }
   0xe   : > { %p4571_p9 = por %p104_p6, %p72_p1  ;;  %p4333_p12 = scmp.lt.s32.totalorder %s4498_s14, 4 }
   0xf   : > { %s4576_s23 = scalar_select %p63_p7, %s4486_s11, %s65_s18  }
  0x10   : > { %s7898_s22 = scalar_select %p4571_p9, 1, 0 }
  0x11   : > { %p4578_p11 = por %p110_p10, %p78_p3  ;;  %s140_s25 = sand.u32 1, %s4486_s11  }
  0x12   : > { %s4310_s26 = smul.u32 56, %s140_s25  ;;  %p4587_p13 = pnand %p4333_p12, %p4561_p4 }
  0x13   : > { %s7899_s24 = scalar_select %p4578_p11, 1, 0 }
  0x14   : > { %s4311_s27 = smul.u32 896, %s4494_s13  ;;  %s144_s4 = scalar_lea.vmem [#allocation3], %s4310_s26 }
  0x15   : > { %s152_s5 = sshll.u32 %s144_s4, 4  ;;  %s141_s6 = scalar_lea.sflag [#allocation4], %s140_s25  ;;  %s4597_s5 = int_to_ptr.vmem [resolvable:$true] %s152_s5 }
  0x16   : > { %s4595_s3 = scalar_lea.hbm %s7770_s1, %s4311_s27  ;;  %p4388_p2 = pneg %p4587_p13 }
  0x17   : > { %s4386_s7 = scalar_lea.hbm %s4595_s3, 896  ;;  %s4391_s16 = scalar_lea.hbm %s7770_s1, 3584 }
  0x18   : > { %p4387_p1 = scmp.ne.s32.totalorder %s4595_s3, %s4386_s7  ;;  %p4392_p5 = scmp.lt.u32.totalorder %s4595_s3, %s7770_s1 }
  0x19   : > { %p4393_p6 = scmp.lt.u32.totalorder %s4391_s16, %s4386_s7  ;;  %p4395_p10 = scmp.lt.u32.totalorder %s4386_s7, %s4595_s3 }
  0x1a   : > { %p4389_p3 = pnand %p4388_p2, %p4387_p1 }
  0x1b   : > { %p4394_p7 = por %p4393_p6, %p4392_p5 }
  0x1c   : > { %p4390_p4 = pneg %p4389_p3 }
  0x1d   : > { %p4396_p12 = por %p4395_p10, %p4394_p7 }
  0x1f   : > { %p4397_p0 = pnand %p4396_p12, %p4390_p4 }
  0x21   : > { %4400 = shalt.err (!%p4397_p0)
}
  0x22   : > { %s4401_s20 = scalar_lea.vmem %s4597_s5, 896  ;;  %s4500_s25 = smov [#allocation3]  }
  0x23   : > { %p4402_p1 = scmp.ne.s32.totalorder %s4597_s5, %s4401_s20  ;;  %s4406_s26 = sshll.u32 %s4500_s25, 4  ;;  %s4407_s26 = int_to_ptr.vmem [resolvable:$false] %s4406_s26 }
  0x24   : > { %s4408_s27 = scalar_lea.vmem %s4407_s26, 1792  ;;  %p4409_p9 = scmp.lt.s32.totalorder %s4597_s5, %s4407_s26 }
  0x25   : > { %p4404_p3 = pnand %p4402_p1, %p4388_p2  ;;  %p4410_p5 = scmp.lt.s32.totalorder %s4408_s27, %s4401_s20 }
  0x27   : > { %p4405_p11 = pneg %p4404_p3  ;;  %p4411_p6 = por %p4410_p5, %p4409_p9 }
  0x29   : > { %p4412_p7 = pnand %p4411_p6, %p4405_p11 }
  0x2b   : > { %4415 = shalt.err (!%p4412_p7)
}
  0x2c   : > { %4328 = dma.hbm_to_vmem [thread:$0]  (!%p4587_p13), %s4595_s3, 896, %s4597_s5, %s141_s6  }
  0x2d   : > { %p157_p0 = scmp.lt.s32.totalorder %s4498_s14, 5  ;;  %p7901_p4 = scmp.ge.s32.totalorder %s4498_s14, 1 }
  0x2f   : > { %p158_p2 = pnand %p7901_p4, %p157_p0 }
  0x31   : > { %161 = sbr.rel (%p158_p2) target bundleno = 1040 (0x410), region = 28 }
  0x38   : > { %s4628_s29 = sand.u32 1, %s4482_s10  }
  0x39   : > { %s4312_s30 = smul.u32 56, %s4628_s29  ;;  %s164_s4 = scalar_lea.sflag [#allocation4], %s4628_s29 }
  0x3b   : > { %s4632_s7 = scalar_lea.vmem [#allocation3], %s4312_s30 }
  0x3c   : > { %4469 = dma.done.wait (%p4567_p8), %s164_s4, 896  }
  0x3d   : > { %4471 = vsyncadd (%p4567_p8), %s164_s4, 4294966400  ;;  %p195_p9 = scmp.lt.s32.totalorder %s4490_s12, 3  ;;  %v214_v0 = vlaneseq  ;;  %s4027_s21 = sshll.u32 %s4628_s29, 3 }
  0x3e   : > { %s4030_s15 = sshll.u32 %s4490_s12, 7  ;;  %s194_s16 = scalar_lea.vmem [#allocation6], %s4027_s21 }
  0x3f   : > { %s196_s28 = scalar_select %p195_p9, %s4490_s12, 3  ;;  %v4643_v2 = vshrl.u32 %v214_v0, 7 }
  0x40   : > { %s3927_s18 = sshll.u32 %s194_s16, 4  ;;  %s7721_s25 = scalar_lea.hbm %s7771_s2, %s4030_s15  ;;  %s7723_s18 = int_to_ptr.vmem [resolvable:$true] %s3927_s18 }
  0x41   : > { %s4028_s3 = sshll.u32 %s196_s28, 2  ;;  %7902 = vst [vmem:[#allocation9_spill] sm:$0xff] %v4643_v2  ;;  %v4646_v11 = vsub.s32 0, %v4643_v2  ;;  %v4649_v16 = vadd.s32 8, %v4643_v2  ;;  %v4652_v17 = vadd.s32 128, %v4643_v2  ;;  %v4655_v18 = vadd.s32 136, %v4643_v2 }
  0x42   : > { %s201_s8 = scalar_lea.vmem %s7769_s0, %s4028_s3  ;;  %v4658_v19 = vadd.s32 16, %v4643_v2  ;;  %v4669_v27 = vadd.s32 24, %v4643_v2  ;;  %s3913_s26 = scalar_lea.sflag [#allocation5], %s4628_s29 }
  0x43   : > { %v202_v1 = vld [vmem:[%s201_s8] sm:$0x7]  ;;  %7903 = vst [vmem:[#allocation10_spill] sm:$0xff] %v4649_v16  ;;  %7904 = vst [vmem:[#allocation11_spill] sm:$0xff] %v4652_v17  ;;  %s4416_s27 = scalar_lea.vmem %s7723_s18, 128  ;;  %p8049_p11 = scmp.ne.s32.totalorder %s7898_s22, 0 }
  0x44   : > { %v733_v3 = vmul.f32 7.0, %v202_v1  ;;  %v1670_v4 = vmul.f32 15.0, %v202_v1  ;;  %v2591_v5 = vmul.f32 31.0, %v202_v1  ;;  %v203_v6 = vmul.f32 3.0, %v202_v1  ;;  %7905 = vst [vmem:[#allocation12_spill] sm:$0xff] %v4655_v18  ;;  %7906 = vst [vmem:[#allocation13_spill] sm:$0xff] %v4658_v19  ;;  %p4417_p8 = scmp.ne.s32.totalorder %s7723_s18, %s4416_s27 }
  0x45   : > { %7908 = vst [vmem:[#allocation15_spill] sm:$0xff] %v4669_v27  ;;  %s4504_s12 = smov [#allocation6]  }
  0x46   : > { %v734_v7 = vadd.f32 0.5, %v733_v3  ;;  %v1671_v8 = vadd.f32 0.5, %v1670_v4  ;;  %v2592_v9 = vadd.f32 0.5, %v2591_v5  ;;  %v204_v10 = vadd.f32 0.5, %v203_v6  ;;  %p4418_p13 = pnand %p4417_p8, %p8049_p11  ;;  %s4420_s30 = sshll.u32 %s4504_s12, 4  ;;  %s4421_s30 = int_to_ptr.vmem [resolvable:$false] %s4420_s30 }
  0x47   : > { %s4422_s4 = scalar_lea.vmem %s4421_s30, 256  ;;  %p4423_p12 = scmp.lt.s32.totalorder %s7723_s18, %s4421_s30 }
  0x48   : > { %v735_v12 = vfloor.f32 %v734_v7  ;;  %v1672_v13 = vfloor.f32 %v1671_v8  ;;  %v2593_v14 = vfloor.f32 %v2592_v9  ;;  %v205_v15 = vfloor.f32 %v204_v10  ;;  %p4419_p10 = pneg %p4418_p13  ;;  %p4424_p1 = scmp.lt.s32.totalorder %s4422_s4, %s4416_s27 }
  0x4a   : > { %v736_v20 = vsub.f32 %v734_v7, %v735_v12  ;;  %v4315_v21 = vtrunc.f32 %v735_v12  ;;  %v4660_v22 = vsub.f32 %v1671_v8, %v1672_v13  ;;  %v4317_v23 = vtrunc.f32 %v1672_v13  ;;  %p4425_p3 = por %p4424_p1, %p4423_p12 }
  0x4b   : > { %v4662_v24 = vsub.f32 %v2592_v9, %v2593_v14  ;;  %v4664_v25 = vtrunc.f32 %v2593_v14  ;;  %v4666_v26 = vsub.f32 %v204_v10, %v205_v15  ;;  %v4671_v31 = vtrunc.f32 %v205_v15 }
  0x4c   : > { %v4316_v28 = vcvt.f32.s32 %v4315_v21  ;;  %v738_v29 = vsub.f32 1.0, %v736_v20  ;;  %v986_v30 = vrot.slane %v736_v20, 1  ;;  %v1207_v32 = vrot.slane %v736_v20, 2  ;;  %p4426_p5 = pnand %p4425_p3, %p4419_p10 }
  0x4d   : > { %7907 = vst [vmem:[#allocation14_spill] sm:$0xff] %v4666_v26  ;;  %7909 = vst [vmem:[#allocation16_spill] sm:$0xff] %v4671_v31  ;;  %v4673_v33 = vcvt.f32.s32 %v4317_v23  ;;  %v4676_v34 = vsub.f32 1.0, %v4660_v22  ;;  %v1907_v35 = vrot.slane %v4660_v22, 1  ;;  %v4680_v43 = vrot.slane %v4660_v22, 2 }
  0x4e   : > { %v739_v36 = vadd.s32 1, %v4316_v28  ;;  %v740_v37 = vmul.u32 2654435761, %v4316_v28  ;;  %v742_v38 = vmul.u32 805459861, %v4316_v28  ;;  %v761_v39 = vrot.slane %v738_v29, 1 }
  0x4f   : > { %v766_v40 = vrot.slane %v738_v29, 2  ;;  %v988_v41 = vmul.f32 %v986_v30, %v738_v29  ;;  %v1098_v42 = vmul.f32 %v986_v30, %v736_v20  ;;  %v4689_v59 = vadd.s32 1, %v4673_v33 }
  0x50   : > { %v741_v44 = vmul.u32 2654435761, %v739_v36  ;;  %v743_v45 = vmul.u32 805459861, %v739_v36  ;;  %v763_v46 = vmul.f32 %v761_v39, %v738_v29  ;;  %v764_v47 = vrot.slane %v740_v37, 1 }
  0x51   : > { %v769_v48 = vrot.slane %v742_v38, 2  ;;  %v876_v49 = vmul.f32 %v761_v39, %v736_v20  ;;  %v991_v50 = vmul.f32 %v988_v41, %v766_v40  ;;  %v1100_v51 = vmul.f32 %v1098_v42, %v766_v40 }
  0x52   : > { %v765_v52 = vxor.u32 %v4316_v28, %v764_v47  ;;  %v768_v53 = vmul.f32 %v766_v40, %v763_v46  ;;  %v877_v54 = vxor.u32 %v764_v47, %v739_v36  ;;  %v989_v55 = vrot.slane %v741_v44, 1 }
  0x53   : > { %v878_v56 = vmul.f32 %v876_v49, %v766_v40  ;;  %v4683_v57 = vrot.slane %v991_v50, %v4646_v11  ;;  %v4686_v58 = vrot.slane %v1100_v51, %v4646_v11  ;;  %v1209_v63 = vmul.f32 %v1207_v32, %v763_v46 }
  0x54   : > { %v770_v60 = vxor.u32 %v769_v48, %v765_v52  ;;  %v879_v61 = vxor.u32 %v877_v54, %v769_v48  ;;  %v990_v62 = vxor.u32 %v4316_v28, %v989_v55  ;;  %v4692_v0 = vrot.slane %v768_v53, %v4646_v11 }
  0x55   : > { %v4695_v1 = vrot.slane %v878_v56, %v4646_v11  ;;  %v1099_v3 = vxor.u32 %v989_v55, %v739_v36  ;;  %v1210_v4 = vrot.slane %v743_v45, 2  ;;  %v1317_v8 = vmul.f32 %v1207_v32, %v876_v49 }
  0x56   : > { %7910 = vst [vmem:[#allocation17_spill] sm:$0xff] %v4692_v0  ;;  %v771_v5 = vand.u32 255, %v770_v60  ;;  %v880_v6 = vand.u32 255, %v879_v61  ;;  %v992_v7 = vxor.u32 %v990_v62, %v769_v48  ;;  %v1424_v13 = vmul.f32 %v1207_v32, %v988_v41 }
  0x57   : > { %v1101_v9 = vxor.u32 %v1099_v3, %v769_v48  ;;  %v1211_v10 = vxor.u32 %v1210_v4, %v765_v52  ;;  %v1318_v12 = vxor.u32 %v1210_v4, %v877_v54  ;;  %v4704_v21 = vrot.slane %v1209_v63, %v4646_v11 }
  0x58   : > { %v4698_v14 = vrot.slane %v771_v5, %v4646_v11  ;;  %v4701_v15 = vrot.slane %v880_v6, %v4646_v11  ;;  %v993_v20 = vand.u32 255, %v992_v7  ;;  %v1425_v30 = vxor.u32 %v1210_v4, %v990_v62 }
  0x59   : > { %v1102_v23 = vand.u32 255, %v1101_v9  ;;  %v1212_v28 = vand.u32 255, %v1211_v10  ;;  %v1319_v29 = vand.u32 255, %v1318_v12  ;;  %v4710_v37 = vrot.slane %v1317_v8, %v4646_v11 }
  0x5a   : > { %7911 = vst [vmem:[#allocation18_spill] sm:$0xff] %v4701_v15  ;;  %v4707_v36 = vrot.slane %v993_v20, %v4646_v11  ;;  %v1531_v38 = vmul.f32 %v1207_v32, %v1098_v42  ;;  %v1532_v39 = vxor.u32 %v1210_v4, %v1099_v3  ;;  %v1426_v44 = vand.u32 255, %v1425_v30 }
  0x5b   : > { %v4713_v40 = vrot.slane %v1102_v23, %v4646_v11  ;;  %v4716_v41 = vrot.slane %v1212_v28, %v4646_v11  ;;  %v4719_v45 = vrot.slane %v1424_v13, %v4646_v11  ;;  %v4722_v46 = vrot.slane %v1319_v29, %v4646_v11 }
  0x5c   : > { %v1533_v47 = vand.u32 255, %v1532_v39  ;;  %v1677_v48 = vmul.u32 2654435761, %v4673_v33  ;;  %v1678_v49 = vmul.u32 2654435761, %v4689_v59  ;;  %v4727_v32 = vrot.slane %v1426_v44, %v4646_v11 }
  0x5d   : > { %v4730_v42 = vrot.slane %v1531_v38, %v4646_v11  ;;  %v1679_v50 = vmul.u32 805459861, %v4673_v33  ;;  %v1682_v51 = vrot.slane %v4676_v34, 1  ;;  %v1680_v52 = vmul.u32 805459861, %v4689_v59 }
  0x5e   : > { %v1685_v53 = vrot.slane %v1677_v48, 1  ;;  %v1687_v54 = vrot.slane %v4676_v34, 2  ;;  %v1909_v55 = vmul.f32 %v1907_v35, %v4676_v34  ;;  %v1910_v62 = vrot.slane %v1678_v49, 1 }
  0x5f   : > { %7912 = vst [vmem:[#allocation19_spill] sm:$0xff] %v4730_v42  ;;  %v1684_v56 = vmul.f32 %v1682_v51, %v4676_v34  ;;  %v1690_v60 = vrot.slane %v1679_v50, 2  ;;  %v1797_v61 = vmul.f32 %v1682_v51, %v4660_v22  ;;  %v2019_v5 = vmul.f32 %v1907_v35, %v4660_v22 }
  0x60   : > { %v1686_v63 = vxor.u32 %v4673_v33, %v1685_v53  ;;  %v1798_v3 = vxor.u32 %v1685_v53, %v4689_v59  ;;  %v1912_v4 = vmul.f32 %v1909_v55, %v1687_v54  ;;  %v1911_v8 = vxor.u32 %v4673_v33, %v1910_v62 }
  0x61   : > { %v1689_v6 = vmul.f32 %v1687_v54, %v1684_v56  ;;  %v1799_v7 = vmul.f32 %v1797_v61, %v1687_v54  ;;  %v2020_v9 = vxor.u32 %v1910_v62, %v4689_v59  ;;  %v4749_v34 = vrot.slane %v1533_v47, %v4646_v11 }
  0x62   : > { %v1691_v10 = vxor.u32 %v1690_v60, %v1686_v63  ;;  %v1800_v12 = vxor.u32 %v1798_v3, %v1690_v60  ;;  %v2021_v13 = vmul.f32 %v2019_v5, %v1687_v54  ;;  %v1913_v23 = vxor.u32 %v1911_v8, %v1690_v60 }
  0x63   : > { %7913 = vst [vmem:[#allocation20_spill] sm:$0xff] %v4749_v34  ;;  %v4752_v20 = vrot.slane %v1689_v6, %v4646_v11  ;;  %v4755_v28 = vrot.slane %v1912_v4, %v4646_v11  ;;  %v2022_v22 = vxor.u32 %v2020_v9, %v1690_v60  ;;  %v4758_v33 = vrot.slane %v1799_v7, %v4646_v11 }
  0x64   : > { %v1692_v35 = vand.u32 255, %v1691_v10  ;;  %v1801_v29 = vand.u32 255, %v1800_v12  ;;  %v2130_v59 = vmul.f32 %v4680_v43, %v1684_v56  ;;  %v1914_v30 = vand.u32 255, %v1913_v23 }
  0x65   : > { %v2023_v38 = vand.u32 255, %v2022_v22  ;;  %v2131_v39 = vrot.slane %v1680_v52, 2  ;;  %v2238_v44 = vmul.f32 %v4680_v43, %v1797_v61  ;;  %v4769_v49 = vrot.slane %v2021_v13, %v4646_v11 }
  0x66   : > { %v4763_v47 = vrot.slane %v1692_v35, %v4646_v11  ;;  %v4766_v48 = vrot.slane %v1801_v29, %v4646_v11  ;;  %v2345_v50 = vmul.f32 %v4680_v43, %v1909_v55  ;;  %v4773_v51 = vrot.slane %v1914_v30, %v4646_v11 }
  0x67   : > { %v2132_v53 = vxor.u32 %v2131_v39, %v1686_v63  ;;  %v4776_v54 = vrot.slane %v2130_v59, %v4646_v11  ;;  %v2239_v52 = vxor.u32 %v2131_v39, %v1798_v3  ;;  %v4779_v56 = vrot.slane %v2023_v38, %v4646_v11 }
  0x68   : > { %7914 = vst [vmem:[#allocation21_spill] sm:$0xff] %v4763_v47  ;;  %7915 = vst [vmem:[#allocation22_spill] sm:$0xff] %v4766_v48  ;;  %v4782_v60 = vrot.slane %v2238_v44, %v4646_v11  ;;  %v2346_v61 = vxor.u32 %v2131_v39, %v1911_v8  ;;  %v2452_v62 = vmul.f32 %v4680_v43, %v2019_v5  ;;  %v4320_v7 = vcvt.f32.s32 %v4664_v25 }
  0x69   : > { %v2133_v4 = vand.u32 255, %v2132_v53  ;;  %v2240_v6 = vand.u32 255, %v2239_v52  ;;  %v2453_v55 = vxor.u32 %v2131_v39, %v2020_v9  ;;  %v4787_v63 = vrot.slane %v2345_v50, %v4646_v11 }
  0x6a   : > { %v2347_v10 = vand.u32 255, %v2346_v61  ;;  %v4790_v3 = vrot.slane %v2452_v62, %v4646_v11  ;;  %v2596_v12 = vsub.f32 1.0, %v4662_v24  ;;  %v2597_v43 = vadd.s32 1, %v4320_v7 }
  0x6b   : > { %v4794_v13 = vrot.slane %v2133_v4, %v4646_v11  ;;  %v4797_v8 = vrot.slane %v2240_v6, %v4646_v11  ;;  %v2828_v5 = vrot.slane %v4662_v24, 1  ;;  %v2454_v9 = vand.u32 255, %v2453_v55 }
  0x6c   : > { %7916 = vst [vmem:[#allocation23_spill] sm:$0xff] %v4790_v3  ;;  %v2598_v25 = vmul.u32 2654435761, %v4320_v7  ;;  %v2600_v23 = vmul.u32 805459861, %v4320_v7  ;;  %v2603_v22 = vrot.slane %v2596_v12, 1  ;;  %v4801_v35 = vrot.slane %v2347_v10, %v4646_v11 }
  0x6d   : > { %v2599_v29 = vmul.u32 2654435761, %v2597_v43  ;;  %v2601_v59 = vmul.u32 805459861, %v2597_v43  ;;  %v2608_v30 = vrot.slane %v2596_v12, 2  ;;  %v2830_v53 = vmul.f32 %v2828_v5, %v2596_v12 }
  0x6e   : > { %v2605_v38 = vmul.f32 %v2603_v22, %v2596_v12  ;;  %v2606_v39 = vrot.slane %v2598_v25, 1  ;;  %v2611_v44 = vrot.slane %v2600_v23, 2  ;;  %v2718_v50 = vmul.f32 %v2603_v22, %v4662_v24 }
  0x6f   : > { %v2831_v52 = vrot.slane %v2599_v29, 1  ;;  %v2940_v61 = vmul.f32 %v2828_v5, %v4662_v24  ;;  %v3049_v62 = vrot.slane %v4662_v24, 2  ;;  %v2833_v19 = vmul.f32 %v2830_v53, %v2608_v30 }
  0x70   : > { %v2607_v4 = vxor.u32 %v4320_v7, %v2606_v39  ;;  %v2610_v6 = vmul.f32 %v2608_v30, %v2605_v38  ;;  %v2719_v55 = vxor.u32 %v2606_v39, %v2597_v43  ;;  %v2720_v27 = vmul.f32 %v2718_v50, %v2608_v30 }
  0x71   : > { %v2832_v10 = vxor.u32 %v4320_v7, %v2831_v52  ;;  %v2941_v18 = vxor.u32 %v2831_v52, %v2597_v43  ;;  %v2942_v17 = vmul.f32 %v2940_v61, %v2608_v30  ;;  %v4807_v26 = vrot.slane %v2454_v9, %v4646_v11 }
  0x72   : > { %v2612_v25 = vxor.u32 %v2611_v44, %v2607_v4  ;;  %v4810_v23 = vrot.slane %v2610_v6, %v4646_v11  ;;  %v2721_v12 = vxor.u32 %v2719_v55, %v2611_v44  ;;  %v4813_v5 = vrot.slane %v2720_v27, %v4646_v11 }
  0x73   : > { %v2834_v24 = vxor.u32 %v2832_v10, %v2611_v44  ;;  %v4816_v22 = vrot.slane %v2833_v19, %v4646_v11  ;;  %v2943_v29 = vxor.u32 %v2941_v18, %v2611_v44  ;;  %v3051_v43 = vmul.f32 %v3049_v62, %v2605_v38 }
  0x74   : > { %7917 = vst [vmem:[#allocation24_spill] sm:$0xff] %v4810_v23  ;;  %7918 = vst [vmem:[#allocation25_spill] sm:$0xff] %v4813_v5  ;;  %v2613_v7 = vand.u32 255, %v2612_v25  ;;  %v2722_v39 = vand.u32 255, %v2721_v12  ;;  %v3052_v30 = vrot.slane %v2601_v59, 2  ;;  %v4819_v31 = vrot.slane %v2942_v17, %v4646_v11 }
  0x75   : > { %7919 = vst [vmem:[#allocation26_spill] sm:$0xff] %v4816_v22  ;;  %v2835_v52 = vand.u32 255, %v2834_v24  ;;  %v2944_v9 = vand.u32 255, %v2943_v29  ;;  %v3159_v6 = vmul.f32 %v3049_v62, %v2718_v50  ;;  %v3266_v19 = vmul.f32 %v3049_v62, %v2830_v53 }
  0x76   : > { %7920 = vst [vmem:[#allocation27_spill] sm:$0xff] %v4819_v31  ;;  %v4822_v23 = vrot.slane %v2613_v7, %v4646_v11  ;;  %v4825_v27 = vrot.slane %v2722_v39, %v4646_v11  ;;  %v3053_v5 = vxor.u32 %v3052_v30, %v2607_v4  ;;  %v4834_v59 = vrot.slane %v3051_v43, %v4646_v11 }
  0x77   : > { %v4828_v44 = vrot.slane %v2835_v52, %v4646_v11  ;;  %v4831_v38 = vrot.slane %v2944_v9, %v4646_v11  ;;  %v3160_v17 = vxor.u32 %v3052_v30, %v2719_v55  ;;  %v4837_v50 = vrot.slane %v3159_v6, %v4646_v11 }
  0x78   : > { %7921 = vst [vmem:[#allocation28_spill] sm:$0xff] %v4822_v23  ;;  %7922 = vst [vmem:[#allocation29_spill] sm:$0xff] %v4825_v27  ;;  %v3054_v25 = vand.u32 255, %v3053_v5  ;;  %v3267_v12 = vxor.u32 %v3052_v30, %v2832_v10  ;;  %v3373_v24 = vmul.f32 %v3049_v62, %v2940_v61  ;;  %v3374_v7 = vxor.u32 %v3052_v30, %v2941_v18 }
  0x79   : > { %7923 = vst [vmem:[#allocation30_spill] sm:$0xff] %v4828_v44  ;;  %7924 = vst [vmem:[#allocation31_spill] sm:$0xff] %v4831_v38  ;;  %v3161_v29 = vand.u32 255, %v3160_v17  ;;  %vm776_vm0 = vcmp.eq.s32.totalorder %v4643_v2, %v4698_v14  ;;  %vm777_vm1 = vcmp.eq.s32.totalorder %v4649_v16, %v4698_v14  ;;  %v4847_v55 = vrot.slane %v3266_v19, %v4646_v11 }
  0x7a   : > { %7925 = vst [vmem:[#allocation32_spill] sm:$0xff] %v4834_v59  ;;  %7926 = vst [vmem:[#allocation33_spill] sm:$0xff] %v4837_v50  ;;  %v4844_v53 = vrot.slane %v3054_v25, %v4646_v11  ;;  %v3268_v4 = vand.u32 255, %v3267_v12  ;;  %v812_v5 = vsel %vm776_vm0, %v4692_v0, 0.0  ;;  %v4854_v18 = vrot.slane %v3373_v24, %v4646_v11 }
  0x7b   : > { %7928 = vst [vmem:[#allocation35_spill] sm:$0xff] %v4847_v55  ;;  %v4851_v10 = vrot.slane %v3161_v29, %v4646_v11  ;;  %v813_v61 = vsel %vm777_vm1, %v4692_v0, 0.0  ;;  %vm885_vm2 = vcmp.eq.s32.totalorder %v4643_v2, %v4701_v15  ;;  %v4859_v62 = vand.u32 255, %v3374_v7 }
  0x7c   : > { %7927 = vst [vmem:[#allocation34_spill] sm:$0xff] %v4844_v53  ;;  %7930 = vst [vmem:[#allocation37_spill] sm:$0xff] %v4854_v18  ;;  %vm886_vm3 = vcmp.eq.s32.totalorder %v4649_v16, %v4701_v15  ;;  %v921_v39 = vsel %vm885_vm2, %v4695_v1, 0.0  ;;  %vm998_vm4 = vcmp.eq.s32.totalorder %v4643_v2, %v4707_v36  ;;  %v4867_v43 = vrot.slane %v3268_v4, %v4646_v11 }
  0x7d   : > { %7929 = vst [vmem:[#allocation36_spill] sm:$0xff] %v4851_v10  ;;  %v922_v30 = vsel %vm886_vm3, %v4695_v1, 0.0  ;;  %v953_v52 = vadd.f32 %v921_v39, %v812_v5  ;;  %vm999_vm5 = vcmp.eq.s32.totalorder %v4649_v16, %v4707_v36  ;;  %v1034_v6 = vsel %vm998_vm4, %v4683_v57, 0.0 }
  0x7e   : > { %7931 = vst [vmem:[#allocation38_spill] sm:$0xff] %v4867_v43  ;;  %v954_v9 = vadd.f32 %v922_v30, %v813_v61  ;;  %v1035_v19 = vsel %vm999_vm5, %v4683_v57, 0.0  ;;  %vm1107_vm6 = vcmp.eq.s32.totalorder %v4643_v2, %v4713_v40  ;;  %vm1108_vm7 = vcmp.eq.s32.totalorder %v4649_v16, %v4713_v40 }
  0x7f   : > { %v1066_v17 = vadd.f32 %v1034_v6, %v953_v52  ;;  %v1143_v25 = vsel %vm1107_vm6, %v4686_v58, 0.0  ;;  %vm1217_vm8 = vcmp.eq.s32.totalorder %v4643_v2, %v4716_v41  ;;  %v1144_v24 = vsel %vm1108_vm7, %v4686_v58, 0.0 }
  0x80   : > { %v1067_v12 = vadd.f32 %v1035_v19, %v954_v9  ;;  %vm1218_vm9 = vcmp.eq.s32.totalorder %v4649_v16, %v4716_v41  ;;  %v1253_v29 = vsel %vm1217_vm8, %v4704_v21, 0.0  ;;  %vm1324_vm10 = vcmp.eq.s32.totalorder %v4643_v2, %v4722_v46 }
  0x81   : > { %v1175_v7 = vadd.f32 %v1143_v25, %v1066_v17  ;;  %v1254_v4 = vsel %vm1218_vm9, %v4704_v21, 0.0  ;;  %vm1325_vm11 = vcmp.eq.s32.totalorder %v4649_v16, %v4722_v46  ;;  %v1360_v61 = vsel %vm1324_vm10, %v4710_v37, 0.0 }
  0x82   : > { %v1176_v5 = vadd.f32 %v1144_v24, %v1067_v12  ;;  %v1361_v39 = vsel %vm1325_vm11, %v4710_v37, 0.0  ;;  %vm1431_vm12 = vcmp.eq.s32.totalorder %v4643_v2, %v4727_v32  ;;  %vm1432_vm13 = vcmp.eq.s32.totalorder %v4649_v16, %v4727_v32 }
  0x83   : > { %v1285_v30 = vadd.f32 %v1253_v29, %v1175_v7  ;;  %v1467_v52 = vsel %vm1431_vm12, %v4719_v45, 0.0  ;;  %vm1538_vm14 = vcmp.eq.s32.totalorder %v4643_v2, %v4749_v34  ;;  %v1468_v6 = vsel %vm1432_vm13, %v4719_v45, 0.0 }
  0x84   : > { %v1286_v9 = vadd.f32 %v1254_v4, %v1176_v5  ;;  %vm1539_vm15 = vcmp.eq.s32.totalorder %v4649_v16, %v4749_v34  ;;  %v1574_v19 = vsel %vm1538_vm14, %v4730_v42, 0.0  ;;  %vm1697_vm0 = vcmp.eq.s32.totalorder %v4643_v2, %v4763_v47 }
  0x85   : > { %v1392_v17 = vadd.f32 %v1360_v61, %v1285_v30  ;;  %v1575_v25 = vsel %vm1539_vm15, %v4730_v42, 0.0  ;;  %vm1698_vm1 = vcmp.eq.s32.totalorder %v4649_v16, %v4763_v47  ;;  %v1733_v24 = vsel %vm1697_vm0, %v4752_v20, 0.0 }
  0x86   : > { %v1393_v12 = vadd.f32 %v1361_v39, %v1286_v9  ;;  %v1734_v29 = vsel %vm1698_vm1, %v4752_v20, 0.0  ;;  %vm1806_vm2 = vcmp.eq.s32.totalorder %v4643_v2, %v4766_v48  ;;  %vm1807_vm3 = vcmp.eq.s32.totalorder %v4649_v16, %v4766_v48 }
  0x87   : > { %v1499_v7 = vadd.f32 %v1467_v52, %v1392_v17  ;;  %v1842_v4 = vsel %vm1806_vm2, %v4758_v33, 0.0  ;;  %vm1919_vm4 = vcmp.eq.s32.totalorder %v4643_v2, %v4773_v51  ;;  %v1843_v61 = vsel %vm1807_vm3, %v4758_v33, 0.0 }
  0x88   : > { %v1500_v5 = vadd.f32 %v1468_v6, %v1393_v12  ;;  %v1874_v39 = vadd.f32 %v1842_v4, %v1733_v24  ;;  %vm1920_vm5 = vcmp.eq.s32.totalorder %v4649_v16, %v4773_v51  ;;  %v1875_v9 = vadd.f32 %v1843_v61, %v1734_v29 }
  0x89   : > { %v1606_v30 = vadd.f32 %v1574_v19, %v1499_v7  ;;  %v1955_v18 = vsel %vm1919_vm4, %v4755_v28, 0.0  ;;  %v1956_v52 = vsel %vm1920_vm5, %v4755_v28, 0.0  ;;  %vm2028_vm6 = vcmp.eq.s32.totalorder %v4643_v2, %v4779_v56 }
  0x8a   : > { %v1607_v17 = vadd.f32 %v1575_v25, %v1500_v5  ;;  %v1987_v55 = vadd.f32 %v1955_v18, %v1874_v39  ;;  %vm2029_vm7 = vcmp.eq.s32.totalorder %v4649_v16, %v4779_v56  ;;  %v1988_v6 = vadd.f32 %v1956_v52, %v1875_v9 }
  0x8b   : > { %v2064_v12 = vsel %vm2028_vm6, %v4769_v49, 0.0  ;;  %v2065_v24 = vsel %vm2029_vm7, %v4769_v49, 0.0  ;;  %vm2138_vm8 = vcmp.eq.s32.totalorder %v4643_v2, %v4794_v13  ;;  %vm2139_vm9 = vcmp.eq.s32.totalorder %v4649_v16, %v4794_v13 }
  0x8c   : > { %v4190_v19 = vpack.c.bf16 %v1607_v17, %v1606_v30  ;;  %v2096_v29 = vadd.f32 %v2064_v12, %v1987_v55  ;;  %v2174_v18 = vsel %vm2138_vm8, %v4776_v54, 0.0  ;;  %v2097_v25 = vadd.f32 %v2065_v24, %v1988_v6  ;;  %v7933_v12 = vld [vmem:[#allocation16_spill] sm:$0xff] }
  0x8d   : > { %v2175_v7 = vsel %vm2139_vm9, %v4776_v54, 0.0  ;;  %vm2245_vm10 = vcmp.eq.s32.totalorder %v4643_v2, %v4797_v8  ;;  %vm2246_vm11 = vcmp.eq.s32.totalorder %v4649_v16, %v4797_v8  ;;  %vm2352_vm12 = vcmp.eq.s32.totalorder %v4643_v2, %v4801_v35 }
  0x8e   : > { %4191 = vmatprep.subr.bf16.mxu0 %v4190_v19  ;;  %v2206_v4 = vadd.f32 %v2174_v18, %v2096_v29  ;;  %v2281_v5 = vsel %vm2245_vm10, %v4782_v60, 0.0  ;;  %v2282_v55 = vsel %vm2246_vm11, %v4782_v60, 0.0  ;;  %v2207_v61 = vadd.f32 %v2175_v7, %v2097_v25  ;;  %v7934_v19 = vld [vmem:[#allocation14_spill] sm:$0xff] }
  0x8f   : > { %vm2353_vm13 = vcmp.eq.s32.totalorder %v4649_v16, %v4801_v35  ;;  %v2388_v39 = vsel %vm2352_vm12, %v4787_v63, 0.0  ;;  %vm2459_vm14 = vcmp.eq.s32.totalorder %v4643_v2, %v4807_v26  ;;  %v4949_v30 = vrot.slane %v4859_v62, %v4646_v11 }
  0x90   : > { %v2313_v9 = vadd.f32 %v2281_v5, %v2206_v4  ;;  %v2389_v52 = vsel %vm2353_vm13, %v4787_v63, 0.0  ;;  %vm2460_vm15 = vcmp.eq.s32.totalorder %v4649_v16, %v4807_v26  ;;  %v2314_v17 = vadd.f32 %v2282_v55, %v2207_v61 }
  0x91   : > { %7932 = vst [vmem:[#allocation39_spill] sm:$0xff] %v4949_v30  ;;  %v2495_v6 = vsel %vm2459_vm14, %v4790_v3, 0.0  ;;  %v4314_v24 = vcvt.f32.s32 %v7933_v12  ;;  %v208_v29 = vsub.f32 1.0, %v7934_v19  ;;  %v2496_v25 = vsel %vm2460_vm15, %v4790_v3, 0.0 }
  0x92   : > { %v2420_v18 = vadd.f32 %v2388_v39, %v2313_v9  ;;  %v359_v7 = vrot.slane %v7934_v19, 1  ;;  %v4960_v62 = vrot.slane %v7934_v19, 2  ;;  %v2421_v4 = vadd.f32 %v2389_v52, %v2314_v17 }
  0x93   : > { %v209_v5 = vadd.s32 1, %v4314_v24  ;;  %v210_v30 = vmul.u32 5, %v4314_v24  ;;  %v212_v50 = vmul.u32 25, %v4314_v24  ;;  %v232_v55 = vrot.slane %v208_v29, 1 }
  0x94   : > { %v2527_v43 = vadd.f32 %v2495_v6, %v2420_v18  ;;  %v237_v61 = vrot.slane %v208_v29, 2  ;;  %v361_v10 = vmul.f32 %v359_v7, %v208_v29  ;;  %v2528_v59 = vadd.f32 %v2496_v25, %v2421_v4 }
  0x95   : > { %v211_v12 = vmul.u32 5, %v209_v5  ;;  %v213_v53 = vmul.u32 25, %v209_v5  ;;  %v235_v31 = vrot.slane %v210_v30, 1  ;;  %v234_v39 = vmul.f32 %v232_v55, %v208_v29 }
  0x96   : > { %v240_v9 = vrot.slane %v212_v50, 2  ;;  %v298_v38 = vmul.f32 %v232_v55, %v7934_v19  ;;  %v364_v22 = vmul.f32 %v361_v10, %v237_v61  ;;  %v4222_v44 = vpack.c.bf16 %v2528_v59, %v2527_v43 }
  0x97   : > { %v236_v27 = vadd.s32 %v4314_v24, %v235_v31  ;;  %v299_v23 = vadd.s32 %v235_v31, %v209_v5  ;;  %v362_v52 = vrot.slane %v211_v12, 1  ;;  %v239_v17 = vmul.f32 %v237_v61, %v234_v39 }
  0x98   : > { %v300_v3 = vmul.f32 %v298_v38, %v237_v61  ;;  %v4964_v6 = vrot.slane %v364_v22, %v4646_v11  ;;  %v422_v18 = vmul.f32 %v359_v7, %v7934_v19  ;;  %4223 = vmatprep.subr.bf16.mxu1 %v4222_v44  ;;  %v484_v43 = vmul.f32 %v4960_v62, %v234_v39  ;;  %v7940_v39 = vld [vmem:[#allocation11_spill] sm:$0xff] }
  0x99   : > { %v241_v25 = vadd.s32 %v240_v9, %v236_v27  ;;  %v301_v4 = vadd.s32 %v299_v23, %v240_v9  ;;  %v363_v30 = vadd.s32 %v4314_v24, %v362_v52  ;;  %v423_v29 = vadd.s32 %v362_v52, %v209_v5 }
  0x9a   : > { %7935 = vst [vmem:[#allocation16_spill] sm:$0xff] %v4964_v6  ;;  %v4968_v50 = vrot.slane %v239_v17, %v4646_v11  ;;  %v4971_v59 = vrot.slane %v300_v3, %v4646_v11  ;;  %v424_v31 = vmul.f32 %v422_v18, %v237_v61  ;;  %v485_v7 = vrot.slane %v213_v53, 2 }
  0x9b   : > { %v4975_v55 = vrot.slane %v241_v25, %v4646_v11  ;;  %v4978_v22 = vrot.slane %v301_v4, %v4646_v11  ;;  %v365_v44 = vadd.s32 %v363_v30, %v240_v9  ;;  %v425_v19 = vadd.s32 %v423_v29, %v240_v9 }
  0x9c   : > { %7936 = vst [vmem:[#allocation14_spill] sm:$0xff] %v4968_v50  ;;  %7937 = vst [vmem:[#allocation40_spill] sm:$0xff] %v4971_v59  ;;  %v4981_v24 = vrot.slane %v424_v31, %v4646_v11  ;;  %v4984_v5 = vrot.slane %v484_v43, %v4646_v11  ;;  %v543_v3 = vmul.f32 %v4960_v62, %v298_v38 }
  0x9d   : > { %7938 = vst [vmem:[#allocation41_spill] sm:$0xff] %v4975_v55  ;;  %7939 = vst [vmem:[#allocation42_spill] sm:$0xff] %v4978_v22  ;;  %vm246_vm0 = vcmp.eq.s32.totalorder %v4643_v2, %v4975_v55  ;;  %vm247_vm1 = vcmp.eq.s32.totalorder %v4649_v16, %v4975_v55  ;;  %vm306_vm2 = vcmp.eq.s32.totalorder %v4643_v2, %v4978_v22 }
  0x9e   : > { %vm307_vm3 = vcmp.eq.s32.totalorder %v4649_v16, %v4978_v22  ;;  %v266_v61 = vsel %vm246_vm0, %v4968_v50, 0.0  ;;  %v267_v53 = vsel %vm247_vm1, %v4968_v50, 0.0  ;;  %v326_v12 = vsel %vm306_vm2, %v4971_v59, 0.0 }
  0x9f   : > { %v327_v38 = vsel %vm307_vm3, %v4971_v59, 0.0  ;;  %vm792_vm4 = vcmp.eq.s32.totalorder %v7940_v39, %v4698_v14  ;;  %v342_v9 = vadd.f32 %v326_v12, %v266_v61  ;;  %v5002_v17 = vrot.slane %v365_v44, %v4646_v11 }
  0xa0   : > { %v343_v52 = vadd.f32 %v327_v38, %v267_v53  ;;  %v5005_v25 = vrot.slane %v425_v19, %v4646_v11  ;;  %v486_v4 = vadd.s32 %v485_v7, %v236_v27  ;;  %v544_v31 = vadd.s32 %v485_v7, %v299_v23 }
  0xa1   : > { %7941 = vst [vmem:[#allocation43_spill] sm:$0xff] %v5002_v17  ;;  %v5008_v43 = vrot.slane %v543_v3, %v4646_v11  ;;  %v601_v22 = vmul.f32 %v4960_v62, %v361_v10  ;;  %vm370_vm5 = vcmp.eq.s32.totalorder %v4643_v2, %v5002_v17  ;;  %vm371_vm6 = vcmp.eq.s32.totalorder %v4649_v16, %v5002_v17 }
  0xa2   : > { %7942 = vst [vmem:[#allocation44_spill] sm:$0xff] %v5005_v25  ;;  %vm430_vm7 = vcmp.eq.s32.totalorder %v4643_v2, %v5005_v25  ;;  %vm431_vm8 = vcmp.eq.s32.totalorder %v4649_v16, %v5005_v25  ;;  %v390_v27 = vsel %vm370_vm5, %v4964_v6, 0.0  ;;  %v391_v23 = vsel %vm371_vm6, %v4964_v6, 0.0 }
  0xa3   : > { %v450_v44 = vsel %vm430_vm7, %v4981_v24, 0.0  ;;  %v451_v10 = vsel %vm431_vm8, %v4981_v24, 0.0  ;;  %v406_v19 = vadd.f32 %v390_v27, %v342_v9  ;;  %v407_v3 = vadd.f32 %v391_v23, %v343_v52 }
  0xa4   : > { %v5024_v61 = vrot.slane %v486_v4, %v4646_v11  ;;  %v5027_v53 = vrot.slane %v544_v31, %v4646_v11  ;;  %v602_v12 = vadd.s32 %v485_v7, %v363_v30  ;;  %v5030_v38 = vrot.slane %v601_v22, %v4646_v11  ;;  %v7943_v31 = vld [vmem:[#allocation12_spill] sm:$0xff] }
  0xa5   : > { %v659_v25 = vmul.f32 %v4960_v62, %v422_v18  ;;  %v660_v17 = vadd.s32 %v485_v7, %v423_v29  ;;  %v466_v6 = vadd.f32 %v450_v44, %v406_v19  ;;  %v467_v59 = vadd.f32 %v451_v10, %v407_v3 }
  0xa6   : > { %vm491_vm9 = vcmp.eq.s32.totalorder %v4643_v2, %v5024_v61  ;;  %vm492_vm10 = vcmp.eq.s32.totalorder %v4649_v16, %v5024_v61  ;;  %vm549_vm11 = vcmp.eq.s32.totalorder %v4643_v2, %v5027_v53  ;;  %vm550_vm12 = vcmp.eq.s32.totalorder %v4649_v16, %v5027_v53 }
  0xa7   : > { %v511_v9 = vsel %vm491_vm9, %v4984_v5, 0.0  ;;  %v512_v52 = vsel %vm492_vm10, %v4984_v5, 0.0  ;;  %v569_v30 = vsel %vm549_vm11, %v5008_v43, 0.0  ;;  %v570_v29 = vsel %vm550_vm12, %v5008_v43, 0.0 }
  0xa8   : > { %v527_v62 = vadd.f32 %v511_v9, %v466_v6  ;;  %v528_v18 = vadd.f32 %v512_v52, %v467_v59  ;;  %v5046_v22 = vrot.slane %v602_v12, %v4646_v11  ;;  %v5049_v7 = vrot.slane %v660_v17, %v4646_v11 }
  0xa9   : > { %v5052_v4 = vrot.slane %v659_v25, %v4646_v11  ;;  %vm793_vm13 = vcmp.eq.s32.totalorder %v7943_v31, %v4698_v14  ;;  %v828_v6 = vsel %vm792_vm4, %v4692_v0, 0.0  ;;  %vm901_vm2 = vcmp.eq.s32.totalorder %v7940_v39, %v4701_v15 }
  0xaa   : > { %v585_v27 = vadd.f32 %v569_v30, %v527_v62  ;;  %v586_v23 = vadd.f32 %v570_v29, %v528_v18  ;;  %v829_v59 = vsel %vm793_vm13, %v4692_v0, 0.0  ;;  %vm607_vm14 = vcmp.eq.s32.totalorder %v4643_v2, %v5046_v22 }
  0xab   : > { %vm608_vm15 = vcmp.eq.s32.totalorder %v4649_v16, %v5046_v22  ;;  %vm665_vm0 = vcmp.eq.s32.totalorder %v4643_v2, %v5049_v7  ;;  %vm666_vm1 = vcmp.eq.s32.totalorder %v4649_v16, %v5049_v7  ;;  %v627_v11 = vsel %vm607_vm14, %v5030_v38, 0.0 }
  0xac   : > { %v628_v17 = vsel %vm608_vm15, %v5030_v38, 0.0  ;;  %v685_v25 = vsel %vm665_vm0, %v5052_v4, 0.0  ;;  %v686_v44 = vsel %vm666_vm1, %v5052_v4, 0.0  ;;  %v643_v10 = vadd.f32 %v627_v11, %v585_v27 }
  0xad   : > { %v644_v19 = vadd.f32 %v628_v17, %v586_v23  ;;  %vm902_vm3 = vcmp.eq.s32.totalorder %v7943_v31, %v4701_v15  ;;  %v937_v3 = vsel %vm901_vm2, %v4695_v1, 0.0  ;;  %vm1014_vm4 = vcmp.eq.s32.totalorder %v7940_v39, %v4707_v36 }
  0xae   : > { %v938_v12 = vsel %vm902_vm3, %v4695_v1, 0.0  ;;  %vm1015_vm5 = vcmp.eq.s32.totalorder %v7943_v31, %v4707_v36  ;;  %v701_v9 = vadd.f32 %v685_v25, %v643_v10  ;;  %v969_v62 = vadd.f32 %v937_v3, %v828_v6 }
  0xaf   : > { %v702_v52 = vadd.f32 %v686_v44, %v644_v19  ;;  %v970_v18 = vadd.f32 %v938_v12, %v829_v59  ;;  %v1050_v30 = vsel %vm1014_vm4, %v4683_v57, 0.0  ;;  %v1051_v29 = vsel %vm1015_vm5, %v4683_v57, 0.0 }
  0xb0   : > { %vm1123_vm6 = vcmp.eq.s32.totalorder %v7940_v39, %v4713_v40  ;;  %vm1124_vm7 = vcmp.eq.s32.totalorder %v7943_v31, %v4713_v40  ;;  %v1082_v23 = vadd.f32 %v1050_v30, %v969_v62  ;;  %vm1233_vm8 = vcmp.eq.s32.totalorder %v7940_v39, %v4716_v41 }
  0xb1   : > { %v4192_v27 = vpack.c.bf16 %v702_v52, %v701_v9  ;;  %v1083_v11 = vadd.f32 %v1051_v29, %v970_v18  ;;  %v1159_v17 = vsel %vm1123_vm6, %v4686_v58, 0.0  ;;  %v1160_v25 = vsel %vm1124_vm7, %v4686_v58, 0.0  ;;  %v7944_v18 = vld [vmem:[#allocation13_spill] sm:$0xff] }
  0xb2   : > { %vm1234_vm9 = vcmp.eq.s32.totalorder %v7943_v31, %v4716_v41  ;;  %vm1340_vm10 = vcmp.eq.s32.totalorder %v7940_v39, %v4722_v46  ;;  %v1191_v6 = vadd.f32 %v1159_v17, %v1082_v23  ;;  %v1269_v44 = vsel %vm1233_vm8, %v4704_v21, 0.0 }
  0xb3   : > { %4193 = vmatpush3.bf16.msra.mxu0 %v4192_v27  ;;  %v1192_v59 = vadd.f32 %v1160_v25, %v1083_v11  ;;  %v1270_v10 = vsel %vm1234_vm9, %v4704_v21, 0.0  ;;  %vm1341_vm11 = vcmp.eq.s32.totalorder %v7943_v31, %v4722_v46  ;;  %v1376_v19 = vsel %vm1340_vm10, %v4710_v37, 0.0  ;;  %v7945_v11 = vld [vmem:[#allocation15_spill] sm:$0xff] }
  0xb4   : > { %vm1447_vm12 = vcmp.eq.s32.totalorder %v7940_v39, %v4727_v32  ;;  %vm1448_vm13 = vcmp.eq.s32.totalorder %v7943_v31, %v4727_v32  ;;  %v1301_v3 = vadd.f32 %v1269_v44, %v1191_v6  ;;  %v1377_v9 = vsel %vm1341_vm11, %v4710_v37, 0.0 }
  0xb5   : > { %v1302_v12 = vadd.f32 %v1270_v10, %v1192_v59  ;;  %v1483_v52 = vsel %vm1447_vm12, %v4719_v45, 0.0  ;;  %v1484_v62 = vsel %vm1448_vm13, %v4719_v45, 0.0  ;;  %vm1554_vm14 = vcmp.eq.s32.totalorder %v7940_v39, %v4749_v34 }
  0xb6   : > { %vm1555_vm15 = vcmp.eq.s32.totalorder %v7943_v31, %v4749_v34  ;;  %vm778_vm0 = vcmp.eq.s32.totalorder %v7944_v18, %v4698_v14  ;;  %v1408_v30 = vadd.f32 %v1376_v19, %v1301_v3  ;;  %v1590_v27 = vsel %vm1554_vm14, %v4730_v42, 0.0 }
  0xb7   : > { %v1409_v29 = vadd.f32 %v1377_v9, %v1302_v12  ;;  %v1591_v23 = vsel %vm1555_vm15, %v4730_v42, 0.0  ;;  %vm779_vm1 = vcmp.eq.s32.totalorder %v7945_v11, %v4698_v14  ;;  %v814_v17 = vsel %vm778_vm0, %v4692_v0, 0.0 }
  0xb8   : > { %vm887_vm2 = vcmp.eq.s32.totalorder %v7944_v18, %v4701_v15  ;;  %vm888_vm3 = vcmp.eq.s32.totalorder %v7945_v11, %v4701_v15  ;;  %v1515_v25 = vadd.f32 %v1483_v52, %v1408_v30  ;;  %v815_v59 = vsel %vm779_vm1, %v4692_v0, 0.0 }
  0xb9   : > { %v1516_v6 = vadd.f32 %v1484_v62, %v1409_v29  ;;  %v923_v44 = vsel %vm887_vm2, %v4695_v1, 0.0  ;;  %v924_v10 = vsel %vm888_vm3, %v4695_v1, 0.0  ;;  %vm1000_vm4 = vcmp.eq.s32.totalorder %v7944_v18, %v4707_v36 }
  0xba   : > { %v955_v19 = vadd.f32 %v923_v44, %v814_v17  ;;  %vm1001_vm5 = vcmp.eq.s32.totalorder %v7945_v11, %v4707_v36  ;;  %v1622_v3 = vadd.f32 %v1590_v27, %v1515_v25  ;;  %v956_v9 = vadd.f32 %v924_v10, %v815_v59 }
  0xbb   : > { %v1623_v12 = vadd.f32 %v1591_v23, %v1516_v6  ;;  %v1036_v31 = vsel %vm1000_vm4, %v4683_v57, 0.0  ;;  %v1037_v52 = vsel %vm1001_vm5, %v4683_v57, 0.0  ;;  %vm1109_vm6 = vcmp.eq.s32.totalorder %v7944_v18, %v4713_v40 }
  0xbc   : > { %v1068_v62 = vadd.f32 %v1036_v31, %v955_v19  ;;  %vm1110_vm7 = vcmp.eq.s32.totalorder %v7945_v11, %v4713_v40  ;;  %v1069_v29 = vadd.f32 %v1037_v52, %v956_v9  ;;  %v1145_v17 = vsel %vm1109_vm6, %v4686_v58, 0.0 }
  0xbd   : > { %v4224_v30 = vpack.c.bf16 %v1623_v12, %v1622_v3  ;;  %v1146_v44 = vsel %vm1110_vm7, %v4686_v58, 0.0  ;;  %vm1219_vm8 = vcmp.eq.s32.totalorder %v7944_v18, %v4716_v41  ;;  %vm1220_vm9 = vcmp.eq.s32.totalorder %v7945_v11, %v4716_v41 }
  0xbe   : > { %v1177_v27 = vadd.f32 %v1145_v17, %v1068_v62  ;;  %vm1326_vm10 = vcmp.eq.s32.totalorder %v7944_v18, %v4722_v46  ;;  %v1178_v31 = vadd.f32 %v1146_v44, %v1069_v29  ;;  %v1255_v23 = vsel %vm1219_vm8, %v4704_v21, 0.0 }
  0xbf   : > { %4225 = vmatpush3.bf16.msra.mxu1 %v4224_v30  ;;  %v1256_v25 = vsel %vm1220_vm9, %v4704_v21, 0.0  ;;  %vm1327_vm11 = vcmp.eq.s32.totalorder %v7945_v11, %v4722_v46  ;;  %v1362_v59 = vsel %vm1326_vm10, %v4710_v37, 0.0  ;;  %vm1433_vm12 = vcmp.eq.s32.totalorder %v7944_v18, %v4727_v32 }
  0xc0   : > { %v1287_v6 = vadd.f32 %v1255_v23, %v1177_v27  ;;  %v1363_v10 = vsel %vm1327_vm11, %v4710_v37, 0.0  ;;  %v1288_v19 = vadd.f32 %v1256_v25, %v1178_v31  ;;  %vm1434_vm13 = vcmp.eq.s32.totalorder %v7945_v11, %v4727_v32 }
  0xc1   : > { %v1469_v3 = vsel %vm1433_vm12, %v4719_v45, 0.0  ;;  %vm1540_vm14 = vcmp.eq.s32.totalorder %v7944_v18, %v4749_v34  ;;  %v1470_v9 = vsel %vm1434_vm13, %v4719_v45, 0.0  ;;  %vm1541_vm15 = vcmp.eq.s32.totalorder %v7945_v11, %v4749_v34 }
  0xc2   : > { %v1394_v12 = vadd.f32 %v1362_v59, %v1287_v6  ;;  %v1576_v52 = vsel %vm1540_vm14, %v4730_v42, 0.0  ;;  %v1395_v62 = vadd.f32 %v1363_v10, %v1288_v19  ;;  %v1577_v30 = vsel %vm1541_vm15, %v4730_v42, 0.0 }
  0xc3   : > { %vm1699_vm0 = vcmp.eq.s32.totalorder %v7944_v18, %v4763_v47  ;;  %vm1700_vm1 = vcmp.eq.s32.totalorder %v7945_v11, %v4763_v47  ;;  %vm1808_vm2 = vcmp.eq.s32.totalorder %v7944_v18, %v4766_v48  ;;  %vm1809_vm3 = vcmp.eq.s32.totalorder %v7945_v11, %v4766_v48 }
  0xc4   : > { %v1501_v29 = vadd.f32 %v1469_v3, %v1394_v12  ;;  %v1735_v17 = vsel %vm1699_vm0, %v4752_v20, 0.0  ;;  %v1736_v44 = vsel %vm1700_vm1, %v4752_v20, 0.0  ;;  %v1502_v27 = vadd.f32 %v1470_v9, %v1395_v62 }
  0xc5   : > { %v1844_v31 = vsel %vm1808_vm2, %v4758_v33, 0.0  ;;  %vm1921_vm4 = vcmp.eq.s32.totalorder %v7944_v18, %v4773_v51  ;;  %v1845_v25 = vsel %vm1809_vm3, %v4758_v33, 0.0  ;;  %vm1922_vm5 = vcmp.eq.s32.totalorder %v7945_v11, %v4773_v51 }
  0xc6   : > { %v1608_v23 = vadd.f32 %v1576_v52, %v1501_v29  ;;  %v1876_v6 = vadd.f32 %v1844_v31, %v1735_v17  ;;  %v1609_v59 = vadd.f32 %v1577_v30, %v1502_v27  ;;  %v1877_v10 = vadd.f32 %v1845_v25, %v1736_v44 }
  0xc7   : > { %v1957_v19 = vsel %vm1921_vm4, %v4755_v28, 0.0  ;;  %v1958_v3 = vsel %vm1922_vm5, %v4755_v28, 0.0  ;;  %vm2030_vm6 = vcmp.eq.s32.totalorder %v7944_v18, %v4779_v56  ;;  %vm2031_vm7 = vcmp.eq.s32.totalorder %v7945_v11, %v4779_v56 }
  0xc8   : > { %v1989_v12 = vadd.f32 %v1957_v19, %v1876_v6  ;;  %vm2140_vm8 = vcmp.eq.s32.totalorder %v7944_v18, %v4794_v13  ;;  %v4194_v9 = vpack.c.bf16 %v1609_v59, %v1608_v23  ;;  %v1990_v52 = vadd.f32 %v1958_v3, %v1877_v10  ;;  %v7946_v3 = vld [vmem:[#allocation23_spill] sm:$0xff] }
  0xc9   : > { %v2066_v62 = vsel %vm2030_vm6, %v4769_v49, 0.0  ;;  %v2067_v30 = vsel %vm2031_vm7, %v4769_v49, 0.0  ;;  %vm2141_vm9 = vcmp.eq.s32.totalorder %v7945_v11, %v4794_v13  ;;  %v2176_v17 = vsel %vm2140_vm8, %v4776_v54, 0.0 }
  0xca   : > { %v2098_v29 = vadd.f32 %v2066_v62, %v1989_v12  ;;  %vm2247_vm10 = vcmp.eq.s32.totalorder %v7944_v18, %v4797_v8  ;;  %4195 = vmatprep.subr.bf16.mxu0 %v4194_v9  ;;  %v2099_v44 = vadd.f32 %v2067_v30, %v1990_v52  ;;  %v2177_v27 = vsel %vm2141_vm9, %v4776_v54, 0.0 }
  0xcb   : > { %vm2248_vm11 = vcmp.eq.s32.totalorder %v7945_v11, %v4797_v8  ;;  %v2283_v31 = vsel %vm2247_vm10, %v4782_v60, 0.0  ;;  %vm2354_vm12 = vcmp.eq.s32.totalorder %v7944_v18, %v4801_v35  ;;  %vm2355_vm13 = vcmp.eq.s32.totalorder %v7945_v11, %v4801_v35 }
  0xcc   : > { %v2208_v23 = vadd.f32 %v2176_v17, %v2098_v29  ;;  %v2284_v25 = vsel %vm2248_vm11, %v4782_v60, 0.0  ;;  %v2209_v6 = vadd.f32 %v2177_v27, %v2099_v44  ;;  %v2390_v59 = vsel %vm2354_vm12, %v4787_v63, 0.0  ;;  %v7947_v17 = vld [vmem:[#allocation42_spill] sm:$0xff]  ;;  %v7948_v27 = vld [vmem:[#allocation40_spill] sm:$0xff] }
  0xcd   : > { %v2391_v10 = vsel %vm2355_vm13, %v4787_v63, 0.0  ;;  %vm2461_vm14 = vcmp.eq.s32.totalorder %v7944_v18, %v4807_v26  ;;  %vm2462_vm15 = vcmp.eq.s32.totalorder %v7945_v11, %v4807_v26  ;;  %vm248_vm0 = vcmp.eq.s32.totalorder %v7944_v18, %v4975_v55 }
  0xce   : > { %v2315_v19 = vadd.f32 %v2283_v31, %v2208_v23  ;;  %v2497_v12 = vsel %vm2461_vm14, %v7946_v3, 0.0  ;;  %v2316_v9 = vadd.f32 %v2284_v25, %v2209_v6  ;;  %v2498_v52 = vsel %vm2462_vm15, %v7946_v3, 0.0  ;;  %v7949_v25 = vld [vmem:[#allocation43_spill] sm:$0xff] }
  0xcf   : > { %vm249_vm1 = vcmp.eq.s32.totalorder %v7945_v11, %v4975_v55  ;;  %v268_v62 = vsel %vm248_vm0, %v4968_v50, 0.0  ;;  %vm308_vm2 = vcmp.eq.s32.totalorder %v7944_v18, %v7947_v17  ;;  %vm309_vm3 = vcmp.eq.s32.totalorder %v7945_v11, %v7947_v17  ;;  %v7951_v17 = vld [vmem:[#allocation44_spill] sm:$0xff] }
  0xd0   : > { %v2422_v30 = vadd.f32 %v2390_v59, %v2315_v19  ;;  %v269_v29 = vsel %vm249_vm1, %v4968_v50, 0.0  ;;  %v2423_v44 = vadd.f32 %v2391_v10, %v2316_v9  ;;  %v328_v31 = vsel %vm308_vm2, %v7948_v27, 0.0  ;;  %v7950_v19 = vld [vmem:[#allocation16_spill] sm:$0xff] }
  0xd1   : > { %v329_v23 = vsel %vm309_vm3, %v7948_v27, 0.0  ;;  %vm372_vm4 = vcmp.eq.s32.totalorder %v7944_v18, %v7949_v25  ;;  %v344_v39 = vadd.f32 %v328_v31, %v268_v62  ;;  %vm373_vm5 = vcmp.eq.s32.totalorder %v7945_v11, %v7949_v25 }
  0xd2   : > { %v2529_v6 = vadd.f32 %v2497_v12, %v2422_v30  ;;  %v345_v16 = vadd.f32 %v329_v23, %v269_v29  ;;  %v2530_v59 = vadd.f32 %v2498_v52, %v2423_v44  ;;  %v392_v50 = vsel %vm372_vm4, %v7950_v19, 0.0 }
  0xd3   : > { %v393_v3 = vsel %vm373_vm5, %v7950_v19, 0.0  ;;  %vm432_vm6 = vcmp.eq.s32.totalorder %v7944_v18, %v7951_v17  ;;  %v408_v10 = vadd.f32 %v392_v50, %v344_v39  ;;  %vm433_vm7 = vcmp.eq.s32.totalorder %v7945_v11, %v7951_v17 }
  0xd4   : > { %v409_v9 = vadd.f32 %v393_v3, %v345_v16  ;;  %v452_v12 = vsel %vm432_vm6, %v4981_v24, 0.0  ;;  %v4226_v62 = vpack.c.bf16 %v2530_v59, %v2529_v6  ;;  %v453_v30 = vsel %vm433_vm7, %v4981_v24, 0.0 }
  0xd5   : > { %vm493_vm8 = vcmp.eq.s32.totalorder %v7944_v18, %v5024_v61  ;;  %vm494_vm9 = vcmp.eq.s32.totalorder %v7945_v11, %v5024_v61  ;;  %v468_v52 = vadd.f32 %v452_v12, %v408_v10  ;;  %vm551_vm10 = vcmp.eq.s32.totalorder %v7944_v18, %v5027_v53 }
  0xd6   : > { %v469_v29 = vadd.f32 %v453_v30, %v409_v9  ;;  %v513_v44 = vsel %vm493_vm8, %v4984_v5, 0.0  ;;  %v514_v16 = vsel %vm494_vm9, %v4984_v5, 0.0  ;;  %4227 = vmatprep.subr.bf16.mxu1 %v4226_v62  ;;  %vm552_vm11 = vcmp.eq.s32.totalorder %v7945_v11, %v5027_v53 }
  0xd7   : > { %vm609_vm12 = vcmp.eq.s32.totalorder %v7944_v18, %v5046_v22  ;;  %vm610_vm13 = vcmp.eq.s32.totalorder %v7945_v11, %v5046_v22  ;;  %v529_v50 = vadd.f32 %v513_v44, %v468_v52  ;;  %v571_v3 = vsel %vm551_vm10, %v5008_v43, 0.0 }
  0xd8   : > { %v530_v39 = vadd.f32 %v514_v16, %v469_v29  ;;  %v572_v31 = vsel %vm552_vm11, %v5008_v43, 0.0  ;;  %v629_v23 = vsel %vm609_vm12, %v5030_v38, 0.0  ;;  %v630_v6 = vsel %vm610_vm13, %v5030_v38, 0.0 }
  0xd9   : > { %vm667_vm14 = vcmp.eq.s32.totalorder %v7944_v18, %v5049_v7  ;;  %vm668_vm15 = vcmp.eq.s32.totalorder %v7945_v11, %v5049_v7  ;;  %v587_v59 = vadd.f32 %v571_v3, %v529_v50  ;;  %v5260_v62 = vadd.s32 144, %v4643_v2 }
  0xda   : > { %v588_v10 = vadd.f32 %v572_v31, %v530_v39  ;;  %v687_v9 = vsel %vm667_vm14, %v5052_v4, 0.0  ;;  %v688_v12 = vsel %vm668_vm15, %v5052_v4, 0.0  ;;  %v5263_v30 = vadd.s32 152, %v4643_v2 }
  0xdb   : > { %7952 = vst [vmem:[#allocation40_spill] sm:$0xff] %v5260_v62  ;;  %v5266_v52 = vadd.s32 32, %v4643_v2  ;;  %v5269_v29 = vadd.s32 40, %v4643_v2  ;;  %v645_v44 = vadd.f32 %v629_v23, %v587_v59  ;;  %v5272_v50 = vadd.s32 160, %v4643_v2 }
  0xdc   : > { %7953 = vst [vmem:[#allocation43_spill] sm:$0xff] %v5263_v30  ;;  %v646_v16 = vadd.f32 %v630_v6, %v588_v10  ;;  %v5275_v39 = vadd.s32 168, %v4643_v2  ;;  %vm794_vm0 = vcmp.eq.s32.totalorder %v5260_v62, %v4698_v14  ;;  %vm795_vm1 = vcmp.eq.s32.totalorder %v5263_v30, %v4698_v14 }
  0xdd   : > { %7954 = vst [vmem:[#allocation16_spill] sm:$0xff] %v5266_v52  ;;  %7955 = vst [vmem:[#allocation44_spill] sm:$0xff] %v5269_v29  ;;  %vm903_vm2 = vcmp.eq.s32.totalorder %v5260_v62, %v4701_v15  ;;  %vm904_vm3 = vcmp.eq.s32.totalorder %v5263_v30, %v4701_v15  ;;  %v703_v3 = vadd.f32 %v687_v9, %v645_v44  ;;  %v830_v23 = vsel %vm794_vm0, %v4692_v0, 0.0 }
  0xde   : > { %7956 = vst [vmem:[#allocation45_spill] sm:$0xff] %v5272_v50  ;;  %7957 = vst [vmem:[#allocation46_spill] sm:$0xff] %v5275_v39  ;;  %v704_v31 = vadd.f32 %v688_v12, %v646_v16  ;;  %v831_v6 = vsel %vm795_vm1, %v4692_v0, 0.0  ;;  %v939_v59 = vsel %vm903_vm2, %v4695_v1, 0.0  ;;  %v940_v10 = vsel %vm904_vm3, %v4695_v1, 0.0 }
  0xdf   : > { %vm1016_vm4 = vcmp.eq.s32.totalorder %v5260_v62, %v4707_v36  ;;  %vm1017_vm5 = vcmp.eq.s32.totalorder %v5263_v30, %v4707_v36  ;;  %v971_v18 = vadd.f32 %v939_v59, %v830_v23  ;;  %v972_v2 = vadd.f32 %v940_v10, %v831_v6 }
  0xe0   : > { %v4196_v11 = vpack.c.bf16 %v704_v31, %v703_v3  ;;  %v1052_v9 = vsel %vm1016_vm4, %v4683_v57, 0.0  ;;  %v1053_v12 = vsel %vm1017_vm5, %v4683_v57, 0.0  ;;  %vm1125_vm6 = vcmp.eq.s32.totalorder %v5260_v62, %v4713_v40 }
  0xe1   : > { %vm1126_vm7 = vcmp.eq.s32.totalorder %v5263_v30, %v4713_v40  ;;  %vm1235_vm8 = vcmp.eq.s32.totalorder %v5260_v62, %v4716_v41  ;;  %v1084_v44 = vadd.f32 %v1052_v9, %v971_v18  ;;  %v1085_v16 = vadd.f32 %v1053_v12, %v972_v2 }
  0xe2   : > { %4197 = vmatpush3.bf16.msra.mxu0 %v4196_v11  ;;  %v1161_v3 = vsel %vm1125_vm6, %v4686_v58, 0.0  ;;  %v1162_v31 = vsel %vm1126_vm7, %v4686_v58, 0.0  ;;  %vm1236_vm9 = vcmp.eq.s32.totalorder %v5263_v30, %v4716_v41  ;;  %v1271_v23 = vsel %vm1235_vm8, %v4704_v21, 0.0 }
  0xe3   : > { %vm1342_vm10 = vcmp.eq.s32.totalorder %v5260_v62, %v4722_v46  ;;  %vm1343_vm11 = vcmp.eq.s32.totalorder %v5263_v30, %v4722_v46  ;;  %v1193_v6 = vadd.f32 %v1161_v3, %v1084_v44  ;;  %v1194_v59 = vadd.f32 %v1162_v31, %v1085_v16 }
  0xe4   : > { %v1272_v18 = vsel %vm1236_vm9, %v4704_v21, 0.0  ;;  %v1378_v2 = vsel %vm1342_vm10, %v4710_v37, 0.0  ;;  %v1379_v11 = vsel %vm1343_vm11, %v4710_v37, 0.0  ;;  %vm1449_vm12 = vcmp.eq.s32.totalorder %v5260_v62, %v4727_v32 }
  0xe5   : > { %vm1450_vm13 = vcmp.eq.s32.totalorder %v5263_v30, %v4727_v32  ;;  %vm1556_vm14 = vcmp.eq.s32.totalorder %v5260_v62, %v4749_v34  ;;  %v1303_v10 = vadd.f32 %v1271_v23, %v1193_v6  ;;  %v1304_v9 = vadd.f32 %v1272_v18, %v1194_v59 }
  0xe6   : > { %v1485_v12 = vsel %vm1449_vm12, %v4719_v45, 0.0  ;;  %v1486_v44 = vsel %vm1450_vm13, %v4719_v45, 0.0  ;;  %vm1557_vm15 = vcmp.eq.s32.totalorder %v5263_v30, %v4749_v34  ;;  %v1592_v16 = vsel %vm1556_vm14, %v4730_v42, 0.0 }
  0xe7   : > { %vm780_vm0 = vcmp.eq.s32.totalorder %v5266_v52, %v4698_v14  ;;  %vm781_vm1 = vcmp.eq.s32.totalorder %v5269_v29, %v4698_v14  ;;  %v1410_v3 = vadd.f32 %v1378_v2, %v1303_v10  ;;  %v1411_v31 = vadd.f32 %v1379_v11, %v1304_v9 }
  0xe8   : > { %v1593_v23 = vsel %vm1557_vm15, %v4730_v42, 0.0  ;;  %v816_v6 = vsel %vm780_vm0, %v4692_v0, 0.0  ;;  %v817_v59 = vsel %vm781_vm1, %v4692_v0, 0.0  ;;  %vm889_vm2 = vcmp.eq.s32.totalorder %v5266_v52, %v4701_v15 }
  0xe9   : > { %vm890_vm3 = vcmp.eq.s32.totalorder %v5269_v29, %v4701_v15  ;;  %vm1002_vm4 = vcmp.eq.s32.totalorder %v5266_v52, %v4707_v36  ;;  %v1517_v18 = vadd.f32 %v1485_v12, %v1410_v3  ;;  %v1518_v30 = vadd.f32 %v1486_v44, %v1411_v31 }
  0xea   : > { %v925_v2 = vsel %vm889_vm2, %v4695_v1, 0.0  ;;  %v926_v11 = vsel %vm890_vm3, %v4695_v1, 0.0  ;;  %vm1003_vm5 = vcmp.eq.s32.totalorder %v5269_v29, %v4707_v36  ;;  %v1038_v62 = vsel %vm1002_vm4, %v4683_v57, 0.0 }
  0xeb   : > { %v957_v10 = vadd.f32 %v925_v2, %v816_v6  ;;  %v958_v9 = vadd.f32 %v926_v11, %v817_v59  ;;  %v1624_v0 = vadd.f32 %v1592_v16, %v1517_v18  ;;  %v1625_v39 = vadd.f32 %v1593_v23, %v1518_v30 }
  0xec   : > { %v1039_v15 = vsel %vm1003_vm5, %v4683_v57, 0.0  ;;  %vm1111_vm6 = vcmp.eq.s32.totalorder %v5266_v52, %v4713_v40  ;;  %vm1112_vm7 = vcmp.eq.s32.totalorder %v5269_v29, %v4713_v40  ;;  %vm1221_vm8 = vcmp.eq.s32.totalorder %v5266_v52, %v4716_v41 }
  0xed   : > { %v1070_v12 = vadd.f32 %v1038_v62, %v957_v10  ;;  %v1071_v44 = vadd.f32 %v1039_v15, %v958_v9  ;;  %v1147_v3 = vsel %vm1111_vm6, %v4686_v58, 0.0  ;;  %v4228_v31 = vpack.c.bf16 %v1625_v39, %v1624_v0 }
  0xee   : > { %v1148_v6 = vsel %vm1112_vm7, %v4686_v58, 0.0  ;;  %vm1222_vm9 = vcmp.eq.s32.totalorder %v5269_v29, %v4716_v41  ;;  %v1257_v23 = vsel %vm1221_vm8, %v4704_v21, 0.0  ;;  %vm1328_vm10 = vcmp.eq.s32.totalorder %v5266_v52, %v4722_v46 }
  0xef   : > { %v1179_v30 = vadd.f32 %v1147_v3, %v1070_v12  ;;  %v1180_v16 = vadd.f32 %v1148_v6, %v1071_v44  ;;  %v1258_v15 = vsel %vm1222_vm9, %v4704_v21, 0.0  ;;  %4229 = vmatpush3.bf16.msra.mxu1 %v4228_v31  ;;  %vm1329_vm11 = vcmp.eq.s32.totalorder %v5269_v29, %v4722_v46 }
  0xf0   : > { %vm1435_vm12 = vcmp.eq.s32.totalorder %v5266_v52, %v4727_v32  ;;  %vm1436_vm13 = vcmp.eq.s32.totalorder %v5269_v29, %v4727_v32  ;;  %v1364_v39 = vsel %vm1328_vm10, %v4710_v37, 0.0  ;;  %v1365_v59 = vsel %vm1329_vm11, %v4710_v37, 0.0 }
  0xf1   : > { %v1289_v0 = vadd.f32 %v1257_v23, %v1179_v30  ;;  %v1290_v62 = vadd.f32 %v1258_v15, %v1180_v16  ;;  %v1471_v18 = vsel %vm1435_vm12, %v4719_v45, 0.0  ;;  %v1472_v2 = vsel %vm1436_vm13, %v4719_v45, 0.0 }
  0xf2   : > { %vm1542_vm14 = vcmp.eq.s32.totalorder %v5266_v52, %v4749_v34  ;;  %vm1543_vm15 = vcmp.eq.s32.totalorder %v5269_v29, %v4749_v34  ;;  %vm1701_vm0 = vcmp.eq.s32.totalorder %v5266_v52, %v4763_v47  ;;  %vm1702_vm1 = vcmp.eq.s32.totalorder %v5269_v29, %v4763_v47 }
  0xf3   : > { %v1396_v11 = vadd.f32 %v1364_v39, %v1289_v0  ;;  %v1397_v10 = vadd.f32 %v1365_v59, %v1290_v62  ;;  %v1578_v9 = vsel %vm1542_vm14, %v4730_v42, 0.0  ;;  %v1579_v12 = vsel %vm1543_vm15, %v4730_v42, 0.0 }
  0xf4   : > { %vm1810_vm2 = vcmp.eq.s32.totalorder %v5266_v52, %v4766_v48  ;;  %vm1811_vm3 = vcmp.eq.s32.totalorder %v5269_v29, %v4766_v48  ;;  %v1737_v31 = vsel %vm1701_vm0, %v4752_v20, 0.0  ;;  %v1738_v6 = vsel %vm1702_vm1, %v4752_v20, 0.0 }
  0xf5   : > { %v1503_v44 = vadd.f32 %v1471_v18, %v1396_v11  ;;  %v1504_v3 = vadd.f32 %v1472_v2, %v1397_v10  ;;  %v1846_v30 = vsel %vm1810_vm2, %v4758_v33, 0.0  ;;  %v1847_v16 = vsel %vm1811_vm3, %v4758_v33, 0.0 }
  0xf6   : > { %vm1923_vm4 = vcmp.eq.s32.totalorder %v5266_v52, %v4773_v51  ;;  %vm1924_vm5 = vcmp.eq.s32.totalorder %v5269_v29, %v4773_v51  ;;  %v1878_v0 = vadd.f32 %v1846_v30, %v1737_v31  ;;  %v1879_v62 = vadd.f32 %v1847_v16, %v1738_v6 }
  0xf7   : > { %v1610_v23 = vadd.f32 %v1578_v9, %v1503_v44  ;;  %v1611_v15 = vadd.f32 %v1579_v12, %v1504_v3  ;;  %v1959_v39 = vsel %vm1923_vm4, %v4755_v28, 0.0  ;;  %v1960_v59 = vsel %vm1924_vm5, %v4755_v28, 0.0 }
  0xf8   : > { %vm2032_vm6 = vcmp.eq.s32.totalorder %v5266_v52, %v4779_v56  ;;  %vm2033_vm7 = vcmp.eq.s32.totalorder %v5269_v29, %v4779_v56  ;;  %v1991_v2 = vadd.f32 %v1959_v39, %v1878_v0  ;;  %v1992_v11 = vadd.f32 %v1960_v59, %v1879_v62  ;;  %v7958_v59 = vld [vmem:[#allocation23_spill] sm:$0xff] }
  0xf9   : > { %v4198_v18 = vpack.c.bf16 %v1611_v15, %v1610_v23  ;;  %v2068_v10 = vsel %vm2032_vm6, %v4769_v49, 0.0  ;;  %v2069_v9 = vsel %vm2033_vm7, %v4769_v49, 0.0  ;;  %vm2142_vm8 = vcmp.eq.s32.totalorder %v5266_v52, %v4794_v13 }
  0xfa   : > { %vm2143_vm9 = vcmp.eq.s32.totalorder %v5269_v29, %v4794_v13  ;;  %vm2249_vm10 = vcmp.eq.s32.totalorder %v5266_v52, %v4797_v8  ;;  %v2100_v12 = vadd.f32 %v2068_v10, %v1991_v2  ;;  %v2101_v44 = vadd.f32 %v2069_v9, %v1992_v11  ;;  %v7959_v11 = vld [vmem:[#allocation14_spill] sm:$0xff] }
  0xfb   : > { %4199 = vmatprep.subr.bf16.mxu0 %v4198_v18  ;;  %v2178_v3 = vsel %vm2142_vm8, %v4776_v54, 0.0  ;;  %v2179_v31 = vsel %vm2143_vm9, %v4776_v54, 0.0  ;;  %vm2250_vm11 = vcmp.eq.s32.totalorder %v5269_v29, %v4797_v8  ;;  %v2285_v6 = vsel %vm2249_vm10, %v4782_v60, 0.0  ;;  %v7960_v9 = vld [vmem:[#allocation42_spill] sm:$0xff] }
  0xfc   : > { %vm2356_vm12 = vcmp.eq.s32.totalorder %v5266_v52, %v4801_v35  ;;  %vm2357_vm13 = vcmp.eq.s32.totalorder %v5269_v29, %v4801_v35  ;;  %v2210_v30 = vadd.f32 %v2178_v3, %v2100_v12  ;;  %v2211_v16 = vadd.f32 %v2179_v31, %v2101_v44 }
  0xfd   : > { %v2286_v23 = vsel %vm2250_vm11, %v4782_v60, 0.0  ;;  %v2392_v15 = vsel %vm2356_vm12, %v4787_v63, 0.0  ;;  %v2393_v0 = vsel %vm2357_vm13, %v4787_v63, 0.0  ;;  %vm2463_vm14 = vcmp.eq.s32.totalorder %v5266_v52, %v4807_v26 }
  0xfe   : > { %vm2464_vm15 = vcmp.eq.s32.totalorder %v5269_v29, %v4807_v26  ;;  %vm250_vm0 = vcmp.eq.s32.totalorder %v5266_v52, %v4975_v55  ;;  %v2317_v62 = vadd.f32 %v2285_v6, %v2210_v30  ;;  %v2318_v39 = vadd.f32 %v2286_v23, %v2211_v16 }
  0xff   : > { %v2499_v18 = vsel %vm2463_vm14, %v7958_v59, 0.0  ;;  %v2500_v2 = vsel %vm2464_vm15, %v7958_v59, 0.0  ;;  %vm251_vm1 = vcmp.eq.s32.totalorder %v5269_v29, %v4975_v55  ;;  %v270_v10 = vsel %vm250_vm0, %v7959_v11, 0.0 }
 0x100   : > { %vm310_vm2 = vcmp.eq.s32.totalorder %v5266_v52, %v7960_v9  ;;  %vm311_vm3 = vcmp.eq.s32.totalorder %v5269_v29, %v7960_v9  ;;  %v2424_v12 = vadd.f32 %v2392_v15, %v2317_v62  ;;  %v2425_v44 = vadd.f32 %v2393_v0, %v2318_v39 }
 0x101   : > { %v271_v3 = vsel %vm251_vm1, %v7959_v11, 0.0  ;;  %v330_v31 = vsel %vm310_vm2, %v7948_v27, 0.0  ;;  %v331_v6 = vsel %vm311_vm3, %v7948_v27, 0.0  ;;  %vm374_vm4 = vcmp.eq.s32.totalorder %v5266_v52, %v7949_v25 }
 0x102   : > { %v346_v30 = vadd.f32 %v330_v31, %v270_v10  ;;  %vm375_vm5 = vcmp.eq.s32.totalorder %v5269_v29, %v7949_v25  ;;  %v2531_v16 = vadd.f32 %v2499_v18, %v2424_v12  ;;  %v2532_v23 = vadd.f32 %v2500_v2, %v2425_v44 }
 0x103   : > { %v347_v55 = vadd.f32 %v331_v6, %v271_v3  ;;  %v394_v9 = vsel %vm374_vm4, %v7950_v19, 0.0  ;;  %v395_v15 = vsel %vm375_vm5, %v7950_v19, 0.0  ;;  %vm434_vm6 = vcmp.eq.s32.totalorder %v5266_v52, %v7951_v17 }
 0x104   : > { %v410_v0 = vadd.f32 %v394_v9, %v346_v30  ;;  %vm435_vm7 = vcmp.eq.s32.totalorder %v5269_v29, %v7951_v17  ;;  %v4230_v62 = vpack.c.bf16 %v2532_v23, %v2531_v16  ;;  %v454_v10 = vsel %vm434_vm6, %v4981_v24, 0.0 }
 0x105   : > { %v411_v39 = vadd.f32 %v395_v15, %v347_v55  ;;  %v455_v31 = vsel %vm435_vm7, %v4981_v24, 0.0  ;;  %vm495_vm8 = vcmp.eq.s32.totalorder %v5266_v52, %v5024_v61  ;;  %vm496_vm9 = vcmp.eq.s32.totalorder %v5269_v29, %v5024_v61 }
 0x106   : > { %v470_v18 = vadd.f32 %v454_v10, %v410_v0  ;;  %vm553_vm10 = vcmp.eq.s32.totalorder %v5266_v52, %v5027_v53  ;;  %4231 = vmatprep.subr.bf16.mxu1 %v4230_v62  ;;  %v515_v9 = vsel %vm495_vm8, %v4984_v5, 0.0  ;;  %v516_v55 = vsel %vm496_vm9, %v4984_v5, 0.0 }
 0x107   : > { %v471_v2 = vadd.f32 %v455_v31, %v411_v39  ;;  %vm554_vm11 = vcmp.eq.s32.totalorder %v5269_v29, %v5027_v53  ;;  %v573_v44 = vsel %vm553_vm10, %v5008_v43, 0.0  ;;  %vm611_vm12 = vcmp.eq.s32.totalorder %v5266_v52, %v5046_v22  ;;  %v7961_v39 = vld [vmem:[#allocation46_spill] sm:$0xff]  ;;  %v7962_v31 = vld [vmem:[#allocation17_spill] sm:$0xff] }
 0x108   : > { %v531_v12 = vadd.f32 %v515_v9, %v470_v18  ;;  %v574_v3 = vsel %vm554_vm11, %v5008_v43, 0.0  ;;  %vm612_vm13 = vcmp.eq.s32.totalorder %v5269_v29, %v5046_v22  ;;  %v631_v30 = vsel %vm611_vm12, %v5030_v38, 0.0  ;;  %v7963_v9 = vld [vmem:[#allocation18_spill] sm:$0xff] }
 0x109   : > { %v532_v6 = vadd.f32 %v516_v55, %v471_v2  ;;  %vm669_vm14 = vcmp.eq.s32.totalorder %v5266_v52, %v5049_v7  ;;  %v632_v23 = vsel %vm612_vm13, %v5030_v38, 0.0  ;;  %vm670_vm15 = vcmp.eq.s32.totalorder %v5269_v29, %v5049_v7 }
 0x10a   : > { %v589_v16 = vadd.f32 %v573_v44, %v531_v12  ;;  %v689_v15 = vsel %vm669_vm14, %v5052_v4, 0.0  ;;  %v690_v62 = vsel %vm670_vm15, %v5052_v4, 0.0  ;;  %vm796_vm0 = vcmp.eq.s32.totalorder %v5272_v50, %v4698_v14 }
 0x10b   : > { %v590_v0 = vadd.f32 %v574_v3, %v532_v6  ;;  %vm797_vm1 = vcmp.eq.s32.totalorder %v7961_v39, %v4698_v14  ;;  %v832_v18 = vsel %vm796_vm0, %v7962_v31, 0.0  ;;  %vm905_vm2 = vcmp.eq.s32.totalorder %v5272_v50, %v7963_v9 }
 0x10c   : > { %v647_v10 = vadd.f32 %v631_v30, %v589_v16  ;;  %v833_v2 = vsel %vm797_vm1, %v7962_v31, 0.0  ;;  %vm906_vm3 = vcmp.eq.s32.totalorder %v7961_v39, %v7963_v9  ;;  %v941_v12 = vsel %vm905_vm2, %v4695_v1, 0.0 }
 0x10d   : > { %v648_v55 = vadd.f32 %v632_v23, %v590_v0  ;;  %vm1018_vm4 = vcmp.eq.s32.totalorder %v5272_v50, %v4707_v36  ;;  %v942_v3 = vsel %vm906_vm3, %v4695_v1, 0.0  ;;  %v973_v6 = vadd.f32 %v941_v12, %v832_v18 }
 0x10e   : > { %v705_v44 = vadd.f32 %v689_v15, %v647_v10  ;;  %vm1019_vm5 = vcmp.eq.s32.totalorder %v7961_v39, %v4707_v36  ;;  %v974_v16 = vadd.f32 %v942_v3, %v833_v2  ;;  %v1054_v29 = vsel %vm1018_vm4, %v4683_v57, 0.0 }
 0x10f   : > { %v706_v30 = vadd.f32 %v690_v62, %v648_v55  ;;  %v1055_v23 = vsel %vm1019_vm5, %v4683_v57, 0.0  ;;  %v1086_v0 = vadd.f32 %v1054_v29, %v973_v6  ;;  %vm1127_vm6 = vcmp.eq.s32.totalorder %v5272_v50, %v4713_v40 }
 0x110   : > { %vm1128_vm7 = vcmp.eq.s32.totalorder %v7961_v39, %v4713_v40  ;;  %vm1237_vm8 = vcmp.eq.s32.totalorder %v5272_v50, %v4716_v41  ;;  %v1087_v10 = vadd.f32 %v1055_v23, %v974_v16  ;;  %v1163_v18 = vsel %vm1127_vm6, %v4686_v58, 0.0 }
 0x111   : > { %v4200_v15 = vpack.c.bf16 %v706_v30, %v705_v44  ;;  %v1164_v62 = vsel %vm1128_vm7, %v4686_v58, 0.0  ;;  %v1195_v2 = vadd.f32 %v1163_v18, %v1086_v0  ;;  %vm1238_vm9 = vcmp.eq.s32.totalorder %v7961_v39, %v4716_v41 }
 0x112   : > { %v1273_v29 = vsel %vm1237_vm8, %v4704_v21, 0.0  ;;  %vm1344_vm10 = vcmp.eq.s32.totalorder %v5272_v50, %v4722_v46  ;;  %v1196_v55 = vadd.f32 %v1164_v62, %v1087_v10  ;;  %v1274_v12 = vsel %vm1238_vm9, %v4704_v21, 0.0  ;;  %v7964_v10 = vld [vmem:[#allocation9_spill] sm:$0xff] }
 0x113   : > { %4201 = vmatpush3.bf16.msra.mxu0 %v4200_v15  ;;  %vm1345_vm11 = vcmp.eq.s32.totalorder %v7961_v39, %v4722_v46  ;;  %v1380_v44 = vsel %vm1344_vm10, %v4710_v37, 0.0  ;;  %v1305_v3 = vadd.f32 %v1273_v29, %v1195_v2  ;;  %vm1451_vm12 = vcmp.eq.s32.totalorder %v5272_v50, %v4727_v32 }
 0x114   : > { %v1381_v6 = vsel %vm1345_vm11, %v4710_v37, 0.0  ;;  %vm1452_vm13 = vcmp.eq.s32.totalorder %v7961_v39, %v4727_v32  ;;  %v1306_v30 = vadd.f32 %v1274_v12, %v1196_v55  ;;  %v1487_v16 = vsel %vm1451_vm12, %v4719_v45, 0.0 }
 0x115   : > { %v1488_v23 = vsel %vm1452_vm13, %v4719_v45, 0.0  ;;  %vm1558_vm14 = vcmp.eq.s32.totalorder %v5272_v50, %v4749_v34  ;;  %v1412_v0 = vadd.f32 %v1380_v44, %v1305_v3  ;;  %vm1559_vm15 = vcmp.eq.s32.totalorder %v7961_v39, %v4749_v34 }
 0x116   : > { %v1594_v15 = vsel %vm1558_vm14, %v4730_v42, 0.0  ;;  %v5517_v18 = vadd.s32 48, %v7964_v10  ;;  %v1413_v62 = vadd.f32 %v1381_v6, %v1306_v30  ;;  %v1595_v2 = vsel %vm1559_vm15, %v4730_v42, 0.0 }
 0x117   : > { %v5521_v29 = vadd.s32 56, %v7964_v10  ;;  %v5524_v55 = vadd.s32 176, %v7964_v10  ;;  %v1519_v12 = vadd.f32 %v1487_v16, %v1412_v0 }
 0x118   : > { %7965 = vst [vmem:[#allocation23_spill] sm:$0xff] %v5517_v18  ;;  %vm782_vm0 = vcmp.eq.s32.totalorder %v5517_v18, %v4698_v14  ;;  %vm891_vm1 = vcmp.eq.s32.totalorder %v5517_v18, %v7963_v9  ;;  %vm1004_vm2 = vcmp.eq.s32.totalorder %v5517_v18, %v4707_v36  ;;  %v1520_v44 = vadd.f32 %v1488_v23, %v1413_v62 }
 0x119   : > { %7966 = vst [vmem:[#allocation14_spill] sm:$0xff] %v5521_v29  ;;  %7967 = vst [vmem:[#allocation18_spill] sm:$0xff] %v5524_v55  ;;  %vm783_vm3 = vcmp.eq.s32.totalorder %v5521_v29, %v4698_v14  ;;  %v818_v3 = vsel %vm782_vm0, %v7962_v31, 0.0  ;;  %vm892_vm4 = vcmp.eq.s32.totalorder %v5521_v29, %v7963_v9  ;;  %v1626_v6 = vadd.f32 %v1594_v15, %v1519_v12 }
 0x11a   : > { %v819_v30 = vsel %vm783_vm3, %v7962_v31, 0.0  ;;  %v927_v16 = vsel %vm891_vm1, %v4695_v1, 0.0  ;;  %v928_v0 = vsel %vm892_vm4, %v4695_v1, 0.0  ;;  %v1627_v39 = vadd.f32 %v1595_v2, %v1520_v44 }
 0x11b   : > { %v959_v50 = vadd.f32 %v927_v16, %v818_v3  ;;  %v960_v52 = vadd.f32 %v928_v0, %v819_v30  ;;  %vm1005_vm5 = vcmp.eq.s32.totalorder %v5521_v29, %v4707_v36  ;;  %v1040_v23 = vsel %vm1004_vm2, %v4683_v57, 0.0 }
 0x11c   : > { %v1041_v62 = vsel %vm1005_vm5, %v4683_v57, 0.0  ;;  %vm1113_vm6 = vcmp.eq.s32.totalorder %v5517_v18, %v4713_v40  ;;  %vm1114_vm7 = vcmp.eq.s32.totalorder %v5521_v29, %v4713_v40  ;;  %v4232_v15 = vpack.c.bf16 %v1627_v39, %v1626_v6 }
 0x11d   : > { %v1072_v12 = vadd.f32 %v1040_v23, %v959_v50  ;;  %v1073_v31 = vadd.f32 %v1041_v62, %v960_v52  ;;  %v1149_v2 = vsel %vm1113_vm6, %v4686_v58, 0.0  ;;  %v1150_v44 = vsel %vm1114_vm7, %v4686_v58, 0.0 }
 0x11e   : > { %vm1223_vm8 = vcmp.eq.s32.totalorder %v5517_v18, %v4716_v41  ;;  %vm1224_vm9 = vcmp.eq.s32.totalorder %v5521_v29, %v4716_v41  ;;  %vm1330_vm10 = vcmp.eq.s32.totalorder %v5517_v18, %v4722_v46  ;;  %4233 = vmatpush3.bf16.msra.mxu1 %v4232_v15  ;;  %vm1331_vm11 = vcmp.eq.s32.totalorder %v5521_v29, %v4722_v46 }
 0x11f   : > { %v1181_v3 = vadd.f32 %v1149_v2, %v1072_v12  ;;  %v1182_v30 = vadd.f32 %v1150_v44, %v1073_v31  ;;  %v1259_v39 = vsel %vm1223_vm8, %v4704_v21, 0.0  ;;  %v1260_v52 = vsel %vm1224_vm9, %v4704_v21, 0.0 }
 0x120   : > { %v1366_v50 = vsel %vm1330_vm10, %v4710_v37, 0.0  ;;  %vm1437_vm12 = vcmp.eq.s32.totalorder %v5517_v18, %v4727_v32  ;;  %vm1438_vm13 = vcmp.eq.s32.totalorder %v5521_v29, %v4727_v32  ;;  %v1367_v0 = vsel %vm1331_vm11, %v4710_v37, 0.0 }
 0x121   : > { %v1291_v6 = vadd.f32 %v1259_v39, %v1181_v3  ;;  %v1292_v16 = vadd.f32 %v1260_v52, %v1182_v30  ;;  %v1473_v31 = vsel %vm1437_vm12, %v4719_v45, 0.0  ;;  %v1474_v23 = vsel %vm1438_vm13, %v4719_v45, 0.0 }
 0x122   : > { %vm1544_vm14 = vcmp.eq.s32.totalorder %v5517_v18, %v4749_v34  ;;  %vm1545_vm15 = vcmp.eq.s32.totalorder %v5521_v29, %v4749_v34  ;;  %vm1703_vm0 = vcmp.eq.s32.totalorder %v5517_v18, %v4763_v47  ;;  %vm1704_vm1 = vcmp.eq.s32.totalorder %v5521_v29, %v4763_v47 }
 0x123   : > { %v1398_v62 = vadd.f32 %v1366_v50, %v1291_v6  ;;  %v1399_v15 = vadd.f32 %v1367_v0, %v1292_v16  ;;  %v1580_v12 = vsel %vm1544_vm14, %v4730_v42, 0.0  ;;  %v1581_v2 = vsel %vm1545_vm15, %v4730_v42, 0.0 }
 0x124   : > { %v1739_v44 = vsel %vm1703_vm0, %v4752_v20, 0.0  ;;  %vm1812_vm2 = vcmp.eq.s32.totalorder %v5517_v18, %v4766_v48  ;;  %vm1813_vm3 = vcmp.eq.s32.totalorder %v5521_v29, %v4766_v48  ;;  %v1740_v39 = vsel %vm1704_vm1, %v4752_v20, 0.0 }
 0x125   : > { %v1505_v3 = vadd.f32 %v1473_v31, %v1398_v62  ;;  %v1506_v30 = vadd.f32 %v1474_v23, %v1399_v15  ;;  %v1848_v52 = vsel %vm1812_vm2, %v4758_v33, 0.0  ;;  %v1849_v50 = vsel %vm1813_vm3, %v4758_v33, 0.0 }
 0x126   : > { %v1880_v6 = vadd.f32 %v1848_v52, %v1739_v44  ;;  %vm1925_vm4 = vcmp.eq.s32.totalorder %v5517_v18, %v4773_v51  ;;  %vm1926_vm5 = vcmp.eq.s32.totalorder %v5521_v29, %v4773_v51  ;;  %v1881_v47 = vadd.f32 %v1849_v50, %v1740_v39 }
 0x127   : > { %v1612_v16 = vadd.f32 %v1580_v12, %v1505_v3  ;;  %v1613_v0 = vadd.f32 %v1581_v2, %v1506_v30  ;;  %v1961_v48 = vsel %vm1925_vm4, %v4755_v28, 0.0  ;;  %v1962_v31 = vsel %vm1926_vm5, %v4755_v28, 0.0 }
 0x128   : > { %v1993_v23 = vadd.f32 %v1961_v48, %v1880_v6  ;;  %vm2034_vm6 = vcmp.eq.s32.totalorder %v5517_v18, %v4779_v56  ;;  %vm2035_vm7 = vcmp.eq.s32.totalorder %v5521_v29, %v4779_v56  ;;  %v1994_v15 = vadd.f32 %v1962_v31, %v1881_v47 }
 0x129   : > { %v4202_v62 = vpack.c.bf16 %v1613_v0, %v1612_v16  ;;  %v2070_v44 = vsel %vm2034_vm6, %v4769_v49, 0.0  ;;  %v2071_v52 = vsel %vm2035_vm7, %v4769_v49, 0.0  ;;  %vm2144_vm8 = vcmp.eq.s32.totalorder %v5517_v18, %v4794_v13 }
 0x12a   : > { %v2102_v12 = vadd.f32 %v2070_v44, %v1993_v23  ;;  %vm2145_vm9 = vcmp.eq.s32.totalorder %v5521_v29, %v4794_v13  ;;  %vm2251_vm10 = vcmp.eq.s32.totalorder %v5517_v18, %v4797_v8  ;;  %v2103_v48 = vadd.f32 %v2071_v52, %v1994_v15  ;;  %v7968_v15 = vld [vmem:[#allocation41_spill] sm:$0xff] }
 0x12b   : > { %4203 = vmatprep.subr.bf16.mxu0 %v4202_v62  ;;  %v2180_v2 = vsel %vm2144_vm8, %v4776_v54, 0.0  ;;  %v2181_v47 = vsel %vm2145_vm9, %v4776_v54, 0.0  ;;  %vm2252_vm11 = vcmp.eq.s32.totalorder %v5521_v29, %v4797_v8  ;;  %v2287_v30 = vsel %vm2251_vm10, %v4782_v60, 0.0 }
 0x12c   : > { %v2212_v3 = vadd.f32 %v2180_v2, %v2102_v12  ;;  %v2288_v39 = vsel %vm2252_vm11, %v4782_v60, 0.0  ;;  %vm2358_vm12 = vcmp.eq.s32.totalorder %v5517_v18, %v4801_v35  ;;  %v2213_v50 = vadd.f32 %v2181_v47, %v2103_v48  ;;  %v7969_v48 = vld [vmem:[#allocation42_spill] sm:$0xff] }
 0x12d   : > { %vm2359_vm13 = vcmp.eq.s32.totalorder %v5521_v29, %v4801_v35  ;;  %v2394_v6 = vsel %vm2358_vm12, %v4787_v63, 0.0  ;;  %vm2465_vm14 = vcmp.eq.s32.totalorder %v5517_v18, %v4807_v26  ;;  %vm2466_vm15 = vcmp.eq.s32.totalorder %v5521_v29, %v4807_v26 }
 0x12e   : > { %v2319_v16 = vadd.f32 %v2287_v30, %v2212_v3  ;;  %v2395_v0 = vsel %vm2359_vm13, %v4787_v63, 0.0  ;;  %v2501_v31 = vsel %vm2465_vm14, %v7958_v59, 0.0  ;;  %v2320_v23 = vadd.f32 %v2288_v39, %v2213_v50 }
 0x12f   : > { %v2502_v62 = vsel %vm2466_vm15, %v7958_v59, 0.0  ;;  %vm252_vm0 = vcmp.eq.s32.totalorder %v5517_v18, %v7968_v15  ;;  %vm253_vm1 = vcmp.eq.s32.totalorder %v5521_v29, %v7968_v15  ;;  %vm312_vm2 = vcmp.eq.s32.totalorder %v5517_v18, %v7969_v48 }
 0x130   : > { %v2426_v44 = vadd.f32 %v2394_v6, %v2319_v16  ;;  %v272_v52 = vsel %vm252_vm0, %v7959_v11, 0.0  ;;  %v273_v12 = vsel %vm253_vm1, %v7959_v11, 0.0  ;;  %v2427_v2 = vadd.f32 %v2395_v0, %v2320_v23 }
 0x131   : > { %vm313_vm3 = vcmp.eq.s32.totalorder %v5521_v29, %v7969_v48  ;;  %v332_v47 = vsel %vm312_vm2, %v7948_v27, 0.0  ;;  %vm376_vm4 = vcmp.eq.s32.totalorder %v5517_v18, %v7949_v25  ;;  %vm377_vm5 = vcmp.eq.s32.totalorder %v5521_v29, %v7949_v25 }
 0x132   : > { %v2533_v3 = vadd.f32 %v2501_v31, %v2426_v44  ;;  %v333_v30 = vsel %vm313_vm3, %v7948_v27, 0.0  ;;  %v348_v39 = vadd.f32 %v332_v47, %v272_v52  ;;  %v2534_v50 = vadd.f32 %v2502_v62, %v2427_v2 }
 0x133   : > { %v349_v6 = vadd.f32 %v333_v30, %v273_v12  ;;  %v396_v16 = vsel %vm376_vm4, %v7950_v19, 0.0  ;;  %v397_v0 = vsel %vm377_vm5, %v7950_v19, 0.0  ;;  %vm436_vm6 = vcmp.eq.s32.totalorder %v5517_v18, %v7951_v17 }
 0x134   : > { %v412_v23 = vadd.f32 %v396_v16, %v348_v39  ;;  %vm437_vm7 = vcmp.eq.s32.totalorder %v5521_v29, %v7951_v17  ;;  %vm497_vm8 = vcmp.eq.s32.totalorder %v5517_v18, %v5024_v61  ;;  %v4234_v31 = vpack.c.bf16 %v2534_v50, %v2533_v3 }
 0x135   : > { %v413_v44 = vadd.f32 %v397_v0, %v349_v6  ;;  %v456_v52 = vsel %vm436_vm6, %v4981_v24, 0.0  ;;  %v457_v62 = vsel %vm437_vm7, %v4981_v24, 0.0  ;;  %vm498_vm9 = vcmp.eq.s32.totalorder %v5521_v29, %v5024_v61 }
 0x136   : > { %v472_v12 = vadd.f32 %v456_v52, %v412_v23  ;;  %v517_v2 = vsel %vm497_vm8, %v4984_v5, 0.0  ;;  %vm555_vm10 = vcmp.eq.s32.totalorder %v5517_v18, %v5027_v53  ;;  %4235 = vmatprep.subr.bf16.mxu1 %v4234_v31  ;;  %v518_v30 = vsel %vm498_vm9, %v4984_v5, 0.0 }
 0x137   : > { %v473_v47 = vadd.f32 %v457_v62, %v413_v44  ;;  %vm556_vm11 = vcmp.eq.s32.totalorder %v5521_v29, %v5027_v53  ;;  %v575_v3 = vsel %vm555_vm10, %v5008_v43, 0.0  ;;  %vm613_vm12 = vcmp.eq.s32.totalorder %v5517_v18, %v5046_v22 }
 0x138   : > { %v533_v39 = vadd.f32 %v517_v2, %v472_v12  ;;  %v576_v50 = vsel %vm556_vm11, %v5008_v43, 0.0  ;;  %vm614_vm13 = vcmp.eq.s32.totalorder %v5521_v29, %v5046_v22  ;;  %v633_v16 = vsel %vm613_vm12, %v5030_v38, 0.0  ;;  %v7971_v2 = vld [vmem:[#allocation17_spill] sm:$0xff] }
 0x139   : > { %v534_v6 = vadd.f32 %v518_v30, %v473_v47  ;;  %v634_v0 = vsel %vm614_vm13, %v5030_v38, 0.0  ;;  %vm671_vm14 = vcmp.eq.s32.totalorder %v5517_v18, %v5049_v7  ;;  %vm672_vm15 = vcmp.eq.s32.totalorder %v5521_v29, %v5049_v7 }
 0x13a   : > { %v591_v23 = vadd.f32 %v575_v3, %v533_v39  ;;  %v691_v31 = vsel %vm671_vm14, %v5052_v4, 0.0  ;;  %v5670_v44 = vadd.s32 184, %v7964_v10  ;;  %v692_v62 = vsel %vm672_vm15, %v5052_v4, 0.0 }
 0x13b   : > { %v592_v52 = vadd.f32 %v576_v50, %v534_v6  ;;  %vm798_vm0 = vcmp.eq.s32.totalorder %v5524_v55, %v4698_v14  ;;  %vm907_vm1 = vcmp.eq.s32.totalorder %v5524_v55, %v7963_v9  ;;  %vm1020_vm4 = vcmp.eq.s32.totalorder %v5524_v55, %v4707_v36 }
 0x13c   : > { %7970 = vst [vmem:[#allocation9_spill] sm:$0xff] %v5670_v44  ;;  %v649_v12 = vadd.f32 %v633_v16, %v591_v23  ;;  %vm799_vm2 = vcmp.eq.s32.totalorder %v5670_v44, %v4698_v14  ;;  %v834_v47 = vsel %vm798_vm0, %v7971_v2, 0.0  ;;  %vm908_vm3 = vcmp.eq.s32.totalorder %v5670_v44, %v7963_v9 }
 0x13d   : > { %v650_v30 = vadd.f32 %v634_v0, %v592_v52  ;;  %v835_v3 = vsel %vm799_vm2, %v7971_v2, 0.0  ;;  %v943_v39 = vsel %vm907_vm1, %v4695_v1, 0.0  ;;  %v944_v50 = vsel %vm908_vm3, %v4695_v1, 0.0 }
 0x13e   : > { %v707_v6 = vadd.f32 %v691_v31, %v649_v12  ;;  %v975_v29 = vadd.f32 %v943_v39, %v834_v47  ;;  %v976_v18 = vadd.f32 %v944_v50, %v835_v3  ;;  %vm1021_vm5 = vcmp.eq.s32.totalorder %v5670_v44, %v4707_v36 }
 0x13f   : > { %v708_v16 = vadd.f32 %v692_v62, %v650_v30  ;;  %v1056_v23 = vsel %vm1020_vm4, %v4683_v57, 0.0  ;;  %vm1129_vm6 = vcmp.eq.s32.totalorder %v5524_v55, %v4713_v40  ;;  %v1057_v0 = vsel %vm1021_vm5, %v4683_v57, 0.0 }
 0x140   : > { %v1088_v52 = vadd.f32 %v1056_v23, %v975_v29  ;;  %vm1130_vm7 = vcmp.eq.s32.totalorder %v5670_v44, %v4713_v40  ;;  %v1165_v31 = vsel %vm1129_vm6, %v4686_v58, 0.0  ;;  %v1089_v47 = vadd.f32 %v1057_v0, %v976_v18 }
 0x141   : > { %v4204_v12 = vpack.c.bf16 %v708_v16, %v707_v6  ;;  %v1166_v62 = vsel %vm1130_vm7, %v4686_v58, 0.0  ;;  %vm1239_vm8 = vcmp.eq.s32.totalorder %v5524_v55, %v4716_v41  ;;  %vm1240_vm9 = vcmp.eq.s32.totalorder %v5670_v44, %v4716_v41 }
 0x142   : > { %v1197_v30 = vadd.f32 %v1165_v31, %v1088_v52  ;;  %v1275_v3 = vsel %vm1239_vm8, %v4704_v21, 0.0  ;;  %vm1346_vm10 = vcmp.eq.s32.totalorder %v5524_v55, %v4722_v46  ;;  %v1198_v29 = vadd.f32 %v1166_v62, %v1089_v47 }
 0x143   : > { %4205 = vmatpush3.bf16.msra.mxu0 %v4204_v12  ;;  %v1276_v39 = vsel %vm1240_vm9, %v4704_v21, 0.0  ;;  %vm1347_vm11 = vcmp.eq.s32.totalorder %v5670_v44, %v4722_v46  ;;  %v1382_v18 = vsel %vm1346_vm10, %v4710_v37, 0.0  ;;  %vm1453_vm12 = vcmp.eq.s32.totalorder %v5524_v55, %v4727_v32 }
 0x144   : > { %v1307_v50 = vadd.f32 %v1275_v3, %v1197_v30  ;;  %v1383_v6 = vsel %vm1347_vm11, %v4710_v37, 0.0  ;;  %vm1454_vm13 = vcmp.eq.s32.totalorder %v5670_v44, %v4727_v32  ;;  %v1308_v16 = vadd.f32 %v1276_v39, %v1198_v29 }
 0x145   : > { %v1489_v23 = vsel %vm1453_vm12, %v4719_v45, 0.0  ;;  %v1490_v0 = vsel %vm1454_vm13, %v4719_v45, 0.0  ;;  %vm1560_vm14 = vcmp.eq.s32.totalorder %v5524_v55, %v4749_v34  ;;  %vm1561_vm15 = vcmp.eq.s32.totalorder %v5670_v44, %v4749_v34 }
 0x146   : > { %v1414_v52 = vadd.f32 %v1382_v18, %v1307_v50  ;;  %v1596_v31 = vsel %vm1560_vm14, %v4730_v42, 0.0  ;;  %v5721_v12 = vadd.s32 64, %v7964_v10  ;;  %v1415_v47 = vadd.f32 %v1383_v6, %v1308_v16 }
 0x147   : > { %v1597_v62 = vsel %vm1561_vm15, %v4730_v42, 0.0  ;;  %v5725_v30 = vadd.s32 72, %v7964_v10  ;;  %v5728_v3 = vadd.s32 192, %v7964_v10 }
 0x148   : > { %7972 = vst [vmem:[#allocation41_spill] sm:$0xff] %v5721_v12  ;;  %v1521_v29 = vadd.f32 %v1489_v23, %v1414_v52  ;;  %vm784_vm0 = vcmp.eq.s32.totalorder %v5721_v12, %v4698_v14  ;;  %vm893_vm1 = vcmp.eq.s32.totalorder %v5721_v12, %v7963_v9  ;;  %vm1006_vm2 = vcmp.eq.s32.totalorder %v5721_v12, %v4707_v36 }
 0x149   : > { %7973 = vst [vmem:[#allocation42_spill] sm:$0xff] %v5725_v30  ;;  %7974 = vst [vmem:[#allocation47_spill] sm:$0xff] %v5728_v3  ;;  %v1522_v39 = vadd.f32 %v1490_v0, %v1415_v47  ;;  %vm785_vm3 = vcmp.eq.s32.totalorder %v5725_v30, %v4698_v14  ;;  %v820_v18 = vsel %vm784_vm0, %v7971_v2, 0.0  ;;  %vm894_vm4 = vcmp.eq.s32.totalorder %v5725_v30, %v7963_v9 }
 0x14a   : > { %v1628_v50 = vadd.f32 %v1596_v31, %v1521_v29  ;;  %v821_v6 = vsel %vm785_vm3, %v7971_v2, 0.0  ;;  %v929_v16 = vsel %vm893_vm1, %v4695_v1, 0.0  ;;  %v930_v23 = vsel %vm894_vm4, %v4695_v1, 0.0 }
 0x14b   : > { %v1629_v52 = vadd.f32 %v1597_v62, %v1522_v39  ;;  %v961_v44 = vadd.f32 %v929_v16, %v820_v18  ;;  %v962_v55 = vadd.f32 %v930_v23, %v821_v6  ;;  %vm1007_vm5 = vcmp.eq.s32.totalorder %v5725_v30, %v4707_v36 }
 0x14c   : > { %v1042_v0 = vsel %vm1006_vm2, %v4683_v57, 0.0  ;;  %v1043_v47 = vsel %vm1007_vm5, %v4683_v57, 0.0  ;;  %vm1115_vm6 = vcmp.eq.s32.totalorder %v5721_v12, %v4713_v40  ;;  %vm1116_vm7 = vcmp.eq.s32.totalorder %v5725_v30, %v4713_v40 }
 0x14d   : > { %v4236_v31 = vpack.c.bf16 %v1629_v52, %v1628_v50  ;;  %v1074_v29 = vadd.f32 %v1042_v0, %v961_v44  ;;  %v1075_v2 = vadd.f32 %v1043_v47, %v962_v55  ;;  %v1151_v62 = vsel %vm1115_vm6, %v4686_v58, 0.0  ;;  %v7975_v47 = vld [vmem:[#allocation21_spill] sm:$0xff] }
 0x14e   : > { %v1152_v39 = vsel %vm1116_vm7, %v4686_v58, 0.0  ;;  %vm1225_vm8 = vcmp.eq.s32.totalorder %v5721_v12, %v4716_v41  ;;  %vm1226_vm9 = vcmp.eq.s32.totalorder %v5725_v30, %v4716_v41  ;;  %vm1332_vm10 = vcmp.eq.s32.totalorder %v5721_v12, %v4722_v46 }
 0x14f   : > { %4237 = vmatpush3.bf16.msra.mxu1 %v4236_v31  ;;  %v1183_v18 = vadd.f32 %v1151_v62, %v1074_v29  ;;  %v1184_v6 = vadd.f32 %v1152_v39, %v1075_v2  ;;  %v1261_v50 = vsel %vm1225_vm8, %v4704_v21, 0.0  ;;  %v1262_v55 = vsel %vm1226_vm9, %v4704_v21, 0.0 }
 0x150   : > { %vm1333_vm11 = vcmp.eq.s32.totalorder %v5725_v30, %v4722_v46  ;;  %v1368_v44 = vsel %vm1332_vm10, %v4710_v37, 0.0  ;;  %vm1439_vm12 = vcmp.eq.s32.totalorder %v5721_v12, %v4727_v32  ;;  %vm1440_vm13 = vcmp.eq.s32.totalorder %v5725_v30, %v4727_v32 }
 0x151   : > { %v1293_v16 = vadd.f32 %v1261_v50, %v1183_v18  ;;  %v1294_v23 = vadd.f32 %v1262_v55, %v1184_v6  ;;  %v1369_v52 = vsel %vm1333_vm11, %v4710_v37, 0.0  ;;  %v1475_v2 = vsel %vm1439_vm12, %v4719_v45, 0.0  ;;  %v7976_v6 = vld [vmem:[#allocation22_spill] sm:$0xff] }
 0x152   : > { %v1476_v0 = vsel %vm1440_vm13, %v4719_v45, 0.0  ;;  %vm1546_vm14 = vcmp.eq.s32.totalorder %v5721_v12, %v4749_v34  ;;  %vm1547_vm15 = vcmp.eq.s32.totalorder %v5725_v30, %v4749_v34  ;;  %vm1705_vm0 = vcmp.eq.s32.totalorder %v5721_v12, %v7975_v47 }
 0x153   : > { %v1400_v31 = vadd.f32 %v1368_v44, %v1293_v16  ;;  %v1401_v29 = vadd.f32 %v1369_v52, %v1294_v23  ;;  %v1582_v62 = vsel %vm1546_vm14, %v4730_v42, 0.0  ;;  %v1583_v39 = vsel %vm1547_vm15, %v4730_v42, 0.0 }
 0x154   : > { %vm1706_vm1 = vcmp.eq.s32.totalorder %v5725_v30, %v7975_v47  ;;  %v1741_v18 = vsel %vm1705_vm0, %v4752_v20, 0.0  ;;  %vm1814_vm2 = vcmp.eq.s32.totalorder %v5721_v12, %v7976_v6  ;;  %vm1815_vm3 = vcmp.eq.s32.totalorder %v5725_v30, %v7976_v6 }
 0x155   : > { %v1507_v50 = vadd.f32 %v1475_v2, %v1400_v31  ;;  %v1508_v55 = vadd.f32 %v1476_v0, %v1401_v29  ;;  %v1742_v44 = vsel %vm1706_vm1, %v4752_v20, 0.0  ;;  %v1850_v16 = vsel %vm1814_vm2, %v4758_v33, 0.0 }
 0x156   : > { %v1851_v23 = vsel %vm1815_vm3, %v4758_v33, 0.0  ;;  %v1882_v52 = vadd.f32 %v1850_v16, %v1741_v18  ;;  %vm1927_vm4 = vcmp.eq.s32.totalorder %v5721_v12, %v4773_v51  ;;  %vm1928_vm5 = vcmp.eq.s32.totalorder %v5725_v30, %v4773_v51 }
 0x157   : > { %v1614_v47 = vadd.f32 %v1582_v62, %v1507_v50  ;;  %v1615_v42 = vadd.f32 %v1583_v39, %v1508_v55  ;;  %v1883_v34 = vadd.f32 %v1851_v23, %v1742_v44  ;;  %v1963_v6 = vsel %vm1927_vm4, %v4755_v28, 0.0 }
 0x158   : > { %v1964_v2 = vsel %vm1928_vm5, %v4755_v28, 0.0  ;;  %v1995_v0 = vadd.f32 %v1963_v6, %v1882_v52  ;;  %vm2036_vm6 = vcmp.eq.s32.totalorder %v5721_v12, %v4779_v56  ;;  %vm2037_vm7 = vcmp.eq.s32.totalorder %v5725_v30, %v4779_v56 }
 0x159   : > { %v4206_v31 = vpack.c.bf16 %v1615_v42, %v1614_v47  ;;  %v1996_v29 = vadd.f32 %v1964_v2, %v1883_v34  ;;  %v2072_v18 = vsel %vm2036_vm6, %v4769_v49, 0.0  ;;  %v2073_v16 = vsel %vm2037_vm7, %v4769_v49, 0.0 }
 0x15a   : > { %v2104_v62 = vadd.f32 %v2072_v18, %v1995_v0  ;;  %vm2146_vm8 = vcmp.eq.s32.totalorder %v5721_v12, %v4794_v13  ;;  %vm2147_vm9 = vcmp.eq.s32.totalorder %v5725_v30, %v4794_v13  ;;  %vm2253_vm10 = vcmp.eq.s32.totalorder %v5721_v12, %v4797_v8 }
 0x15b   : > { %4207 = vmatprep.subr.bf16.mxu0 %v4206_v31  ;;  %v2105_v39 = vadd.f32 %v2073_v16, %v1996_v29  ;;  %v2182_v6 = vsel %vm2146_vm8, %v4776_v54, 0.0  ;;  %v2183_v42 = vsel %vm2147_vm9, %v4776_v54, 0.0  ;;  %vm2254_vm11 = vcmp.eq.s32.totalorder %v5725_v30, %v4797_v8 }
 0x15c   : > { %v2214_v34 = vadd.f32 %v2182_v6, %v2104_v62  ;;  %v2289_v47 = vsel %vm2253_vm10, %v4782_v60, 0.0  ;;  %v2290_v50 = vsel %vm2254_vm11, %v4782_v60, 0.0  ;;  %vm2360_vm12 = vcmp.eq.s32.totalorder %v5721_v12, %v4801_v35 }
 0x15d   : > { %v2215_v55 = vadd.f32 %v2183_v42, %v2105_v39  ;;  %vm2361_vm13 = vcmp.eq.s32.totalorder %v5725_v30, %v4801_v35  ;;  %v2396_v44 = vsel %vm2360_vm12, %v4787_v63, 0.0  ;;  %vm2467_vm14 = vcmp.eq.s32.totalorder %v5721_v12, %v4807_v26 }
 0x15e   : > { %v2321_v23 = vadd.f32 %v2289_v47, %v2214_v34  ;;  %v2397_v52 = vsel %vm2361_vm13, %v4787_v63, 0.0  ;;  %vm2468_vm15 = vcmp.eq.s32.totalorder %v5725_v30, %v4807_v26  ;;  %v2503_v2 = vsel %vm2467_vm14, %v7958_v59, 0.0 }
 0x15f   : > { %v2322_v0 = vadd.f32 %v2290_v50, %v2215_v55  ;;  %v2504_v31 = vsel %vm2468_vm15, %v7958_v59, 0.0  ;;  %vm254_vm0 = vcmp.eq.s32.totalorder %v5721_v12, %v7968_v15  ;;  %vm255_vm1 = vcmp.eq.s32.totalorder %v5725_v30, %v7968_v15 }
 0x160   : > { %v2428_v29 = vadd.f32 %v2396_v44, %v2321_v23  ;;  %v274_v18 = vsel %vm254_vm0, %v7959_v11, 0.0  ;;  %v275_v16 = vsel %vm255_vm1, %v7959_v11, 0.0  ;;  %vm314_vm2 = vcmp.eq.s32.totalorder %v5721_v12, %v7969_v48 }
 0x161   : > { %v2429_v62 = vadd.f32 %v2397_v52, %v2322_v0  ;;  %vm315_vm3 = vcmp.eq.s32.totalorder %v5725_v30, %v7969_v48  ;;  %v334_v39 = vsel %vm314_vm2, %v7948_v27, 0.0  ;;  %vm378_vm4 = vcmp.eq.s32.totalorder %v5721_v12, %v7949_v25 }
 0x162   : > { %v2535_v6 = vadd.f32 %v2503_v2, %v2428_v29  ;;  %v335_v42 = vsel %vm315_vm3, %v7948_v27, 0.0  ;;  %v350_v34 = vadd.f32 %v334_v39, %v274_v18  ;;  %vm379_vm5 = vcmp.eq.s32.totalorder %v5725_v30, %v7949_v25 }
 0x163   : > { %v2536_v47 = vadd.f32 %v2504_v31, %v2429_v62  ;;  %v351_v50 = vadd.f32 %v335_v42, %v275_v16  ;;  %v398_v55 = vsel %vm378_vm4, %v7950_v19, 0.0  ;;  %v399_v44 = vsel %vm379_vm5, %v7950_v19, 0.0 }
 0x164   : > { %v414_v23 = vadd.f32 %v398_v55, %v350_v34  ;;  %vm438_vm6 = vcmp.eq.s32.totalorder %v5721_v12, %v7951_v17  ;;  %vm439_vm7 = vcmp.eq.s32.totalorder %v5725_v30, %v7951_v17  ;;  %vm499_vm8 = vcmp.eq.s32.totalorder %v5721_v12, %v5024_v61 }
 0x165   : > { %v4238_v52 = vpack.c.bf16 %v2536_v47, %v2535_v6  ;;  %v415_v2 = vadd.f32 %v399_v44, %v351_v50  ;;  %v458_v0 = vsel %vm438_vm6, %v4981_v24, 0.0  ;;  %v459_v31 = vsel %vm439_vm7, %v4981_v24, 0.0 }
 0x166   : > { %v474_v29 = vadd.f32 %v458_v0, %v414_v23  ;;  %vm500_vm9 = vcmp.eq.s32.totalorder %v5725_v30, %v5024_v61  ;;  %v519_v18 = vsel %vm499_vm8, %v4984_v5, 0.0  ;;  %vm557_vm10 = vcmp.eq.s32.totalorder %v5721_v12, %v5027_v53 }
 0x167   : > { %4239 = vmatprep.subr.bf16.mxu1 %v4238_v52  ;;  %v475_v16 = vadd.f32 %v459_v31, %v415_v2  ;;  %v520_v62 = vsel %vm500_vm9, %v4984_v5, 0.0  ;;  %vm558_vm11 = vcmp.eq.s32.totalorder %v5725_v30, %v5027_v53  ;;  %v577_v39 = vsel %vm557_vm10, %v5008_v43, 0.0  ;;  %v7978_v31 = vld [vmem:[#allocation17_spill] sm:$0xff] }
 0x168   : > { %v535_v6 = vadd.f32 %v519_v18, %v474_v29  ;;  %v578_v42 = vsel %vm558_vm11, %v5008_v43, 0.0  ;;  %vm615_vm12 = vcmp.eq.s32.totalorder %v5721_v12, %v5046_v22  ;;  %vm616_vm13 = vcmp.eq.s32.totalorder %v5725_v30, %v5046_v22 }
 0x169   : > { %v536_v34 = vadd.f32 %v520_v62, %v475_v16  ;;  %v635_v47 = vsel %vm615_vm12, %v5030_v38, 0.0  ;;  %v636_v50 = vsel %vm616_vm13, %v5030_v38, 0.0  ;;  %vm673_vm14 = vcmp.eq.s32.totalorder %v5721_v12, %v5049_v7 }
 0x16a   : > { %v593_v55 = vadd.f32 %v577_v39, %v535_v6  ;;  %vm674_vm15 = vcmp.eq.s32.totalorder %v5725_v30, %v5049_v7  ;;  %v693_v44 = vsel %vm673_vm14, %v5052_v4, 0.0  ;;  %v5874_v23 = vadd.s32 200, %v7964_v10 }
 0x16b   : > { %v594_v52 = vadd.f32 %v578_v42, %v536_v34  ;;  %v694_v2 = vsel %vm674_vm15, %v5052_v4, 0.0  ;;  %vm800_vm0 = vcmp.eq.s32.totalorder %v5728_v3, %v4698_v14  ;;  %vm909_vm1 = vcmp.eq.s32.totalorder %v5728_v3, %v7963_v9 }
 0x16c   : > { %7977 = vst [vmem:[#allocation48_spill] sm:$0xff] %v5874_v23  ;;  %v651_v0 = vadd.f32 %v635_v47, %v593_v55  ;;  %vm801_vm2 = vcmp.eq.s32.totalorder %v5874_v23, %v4698_v14  ;;  %v836_v29 = vsel %vm800_vm0, %v7978_v31, 0.0  ;;  %vm910_vm3 = vcmp.eq.s32.totalorder %v5874_v23, %v7963_v9 }
 0x16d   : > { %v652_v18 = vadd.f32 %v636_v50, %v594_v52  ;;  %v837_v16 = vsel %vm801_vm2, %v7978_v31, 0.0  ;;  %v945_v62 = vsel %vm909_vm1, %v4695_v1, 0.0  ;;  %v946_v39 = vsel %vm910_vm3, %v4695_v1, 0.0 }
 0x16e   : > { %v709_v6 = vadd.f32 %v693_v44, %v651_v0  ;;  %v977_v42 = vadd.f32 %v945_v62, %v836_v29  ;;  %v978_v34 = vadd.f32 %v946_v39, %v837_v16  ;;  %vm1022_vm4 = vcmp.eq.s32.totalorder %v5728_v3, %v4707_v36 }
 0x16f   : > { %v710_v47 = vadd.f32 %v694_v2, %v652_v18  ;;  %vm1023_vm5 = vcmp.eq.s32.totalorder %v5874_v23, %v4707_v36  ;;  %v1058_v55 = vsel %vm1022_vm4, %v4683_v57, 0.0  ;;  %vm1131_vm6 = vcmp.eq.s32.totalorder %v5728_v3, %v4713_v40 }
 0x170   : > { %v1059_v50 = vsel %vm1023_vm5, %v4683_v57, 0.0  ;;  %v1090_v52 = vadd.f32 %v1058_v55, %v977_v42  ;;  %vm1132_vm7 = vcmp.eq.s32.totalorder %v5874_v23, %v4713_v40  ;;  %v1167_v44 = vsel %vm1131_vm6, %v4686_v58, 0.0 }
 0x171   : > { %v4208_v0 = vpack.c.bf16 %v710_v47, %v709_v6  ;;  %v1091_v29 = vadd.f32 %v1059_v50, %v978_v34  ;;  %v1168_v2 = vsel %vm1132_vm7, %v4686_v58, 0.0  ;;  %vm1241_vm8 = vcmp.eq.s32.totalorder %v5728_v3, %v4716_v41 }
 0x172   : > { %v1199_v18 = vadd.f32 %v1167_v44, %v1090_v52  ;;  %vm1242_vm9 = vcmp.eq.s32.totalorder %v5874_v23, %v4716_v41  ;;  %v1277_v16 = vsel %vm1241_vm8, %v4704_v21, 0.0  ;;  %vm1348_vm10 = vcmp.eq.s32.totalorder %v5728_v3, %v4722_v46  ;;  %v7979_v52 = vld [vmem:[#allocation20_spill] sm:$0xff] }
 0x173   : > { %4209 = vmatpush3.bf16.msra.mxu0 %v4208_v0  ;;  %v1200_v62 = vadd.f32 %v1168_v2, %v1091_v29  ;;  %v1278_v39 = vsel %vm1242_vm9, %v4704_v21, 0.0  ;;  %vm1349_vm11 = vcmp.eq.s32.totalorder %v5874_v23, %v4722_v46  ;;  %v1384_v6 = vsel %vm1348_vm10, %v4710_v37, 0.0  ;;  %v7980_v0 = vld [vmem:[#allocation19_spill] sm:$0xff] }
 0x174   : > { %v1309_v42 = vadd.f32 %v1277_v16, %v1199_v18  ;;  %v1385_v34 = vsel %vm1349_vm11, %v4710_v37, 0.0  ;;  %vm1455_vm12 = vcmp.eq.s32.totalorder %v5728_v3, %v4727_v32  ;;  %vm1456_vm13 = vcmp.eq.s32.totalorder %v5874_v23, %v4727_v32 }
 0x175   : > { %v1310_v47 = vadd.f32 %v1278_v39, %v1200_v62  ;;  %v1491_v55 = vsel %vm1455_vm12, %v4719_v45, 0.0  ;;  %v1492_v50 = vsel %vm1456_vm13, %v4719_v45, 0.0  ;;  %vm1562_vm14 = vcmp.eq.s32.totalorder %v5728_v3, %v7979_v52 }
 0x176   : > { %v1416_v44 = vadd.f32 %v1384_v6, %v1309_v42  ;;  %vm1563_vm15 = vcmp.eq.s32.totalorder %v5874_v23, %v7979_v52  ;;  %v1598_v29 = vsel %vm1562_vm14, %v7980_v0, 0.0  ;;  %v5925_v2 = vadd.s32 80, %v7964_v10 }
 0x177   : > { %v1417_v18 = vadd.f32 %v1385_v34, %v1310_v47  ;;  %v1599_v16 = vsel %vm1563_vm15, %v7980_v0, 0.0  ;;  %v5929_v62 = vadd.s32 88, %v7964_v10  ;;  %v5932_v39 = vadd.s32 208, %v7964_v10 }
 0x178   : > { %7981 = vst [vmem:[#allocation49_spill] sm:$0xff] %v5925_v2  ;;  %v1523_v30 = vadd.f32 %v1491_v55, %v1416_v44  ;;  %vm786_vm0 = vcmp.eq.s32.totalorder %v5925_v2, %v4698_v14  ;;  %vm895_vm1 = vcmp.eq.s32.totalorder %v5925_v2, %v7963_v9  ;;  %vm1008_vm2 = vcmp.eq.s32.totalorder %v5925_v2, %v4707_v36 }
 0x179   : > { %7982 = vst [vmem:[#allocation50_spill] sm:$0xff] %v5929_v62  ;;  %7983 = vst [vmem:[#allocation51_spill] sm:$0xff] %v5932_v39  ;;  %v1524_v6 = vadd.f32 %v1492_v50, %v1417_v18  ;;  %vm787_vm3 = vcmp.eq.s32.totalorder %v5929_v62, %v4698_v14  ;;  %v822_v42 = vsel %vm786_vm0, %v7978_v31, 0.0  ;;  %vm896_vm4 = vcmp.eq.s32.totalorder %v5929_v62, %v7963_v9 }
 0x17a   : > { %v1630_v34 = vadd.f32 %v1598_v29, %v1523_v30  ;;  %v823_v47 = vsel %vm787_vm3, %v7978_v31, 0.0  ;;  %v931_v55 = vsel %vm895_vm1, %v4695_v1, 0.0  ;;  %v932_v44 = vsel %vm896_vm4, %v4695_v1, 0.0 }
 0x17b   : > { %v1631_v23 = vadd.f32 %v1599_v16, %v1524_v6  ;;  %v963_v3 = vadd.f32 %v931_v55, %v822_v42  ;;  %v964_v12 = vadd.f32 %v932_v44, %v823_v47  ;;  %vm1009_vm5 = vcmp.eq.s32.totalorder %v5929_v62, %v4707_v36 }
 0x17c   : > { %v1044_v50 = vsel %vm1008_vm2, %v4683_v57, 0.0  ;;  %v1045_v18 = vsel %vm1009_vm5, %v4683_v57, 0.0  ;;  %vm1117_vm6 = vcmp.eq.s32.totalorder %v5925_v2, %v4713_v40  ;;  %vm1118_vm7 = vcmp.eq.s32.totalorder %v5929_v62, %v4713_v40 }
 0x17d   : > { %v4240_v30 = vpack.c.bf16 %v1631_v23, %v1630_v34  ;;  %v1076_v29 = vadd.f32 %v1044_v50, %v963_v3  ;;  %v1077_v31 = vadd.f32 %v1045_v18, %v964_v12  ;;  %v1153_v16 = vsel %vm1117_vm6, %v4686_v58, 0.0  ;;  %v7984_v18 = vld [vmem:[#allocation21_spill] sm:$0xff] }
 0x17e   : > { %v1154_v6 = vsel %vm1118_vm7, %v4686_v58, 0.0  ;;  %vm1227_vm8 = vcmp.eq.s32.totalorder %v5925_v2, %v4716_v41  ;;  %vm1228_vm9 = vcmp.eq.s32.totalorder %v5929_v62, %v4716_v41  ;;  %vm1334_vm10 = vcmp.eq.s32.totalorder %v5925_v2, %v4722_v46 }
 0x17f   : > { %4241 = vmatpush3.bf16.msra.mxu1 %v4240_v30  ;;  %v1185_v42 = vadd.f32 %v1153_v16, %v1076_v29  ;;  %v1186_v47 = vadd.f32 %v1154_v6, %v1077_v31  ;;  %v1263_v23 = vsel %vm1227_vm8, %v4704_v21, 0.0  ;;  %v1264_v12 = vsel %vm1228_vm9, %v4704_v21, 0.0 }
 0x180   : > { %vm1335_vm11 = vcmp.eq.s32.totalorder %v5929_v62, %v4722_v46  ;;  %v1370_v3 = vsel %vm1334_vm10, %v4710_v37, 0.0  ;;  %vm1441_vm12 = vcmp.eq.s32.totalorder %v5925_v2, %v4727_v32  ;;  %vm1442_vm13 = vcmp.eq.s32.totalorder %v5929_v62, %v4727_v32 }
 0x181   : > { %v1295_v34 = vadd.f32 %v1263_v23, %v1185_v42  ;;  %v1296_v55 = vadd.f32 %v1264_v12, %v1186_v47  ;;  %v1371_v44 = vsel %vm1335_vm11, %v4710_v37, 0.0  ;;  %v1477_v31 = vsel %vm1441_vm12, %v4719_v45, 0.0  ;;  %v7985_v47 = vld [vmem:[#allocation22_spill] sm:$0xff] }
 0x182   : > { %v1478_v50 = vsel %vm1442_vm13, %v4719_v45, 0.0  ;;  %vm1548_vm14 = vcmp.eq.s32.totalorder %v5925_v2, %v7979_v52  ;;  %vm1549_vm15 = vcmp.eq.s32.totalorder %v5929_v62, %v7979_v52  ;;  %vm1707_vm0 = vcmp.eq.s32.totalorder %v5925_v2, %v7984_v18 }
 0x183   : > { %v1402_v30 = vadd.f32 %v1370_v3, %v1295_v34  ;;  %v1403_v29 = vadd.f32 %v1371_v44, %v1296_v55  ;;  %v1584_v16 = vsel %vm1548_vm14, %v7980_v0, 0.0  ;;  %v1585_v6 = vsel %vm1549_vm15, %v7980_v0, 0.0 }
 0x184   : > { %vm1708_vm1 = vcmp.eq.s32.totalorder %v5929_v62, %v7984_v18  ;;  %v1743_v42 = vsel %vm1707_vm0, %v4752_v20, 0.0  ;;  %vm1816_vm2 = vcmp.eq.s32.totalorder %v5925_v2, %v7985_v47  ;;  %vm1817_vm3 = vcmp.eq.s32.totalorder %v5929_v62, %v7985_v47 }
 0x185   : > { %v1509_v23 = vadd.f32 %v1477_v31, %v1402_v30  ;;  %v1510_v12 = vadd.f32 %v1478_v50, %v1403_v29  ;;  %v1744_v3 = vsel %vm1708_vm1, %v4752_v20, 0.0  ;;  %v1852_v34 = vsel %vm1816_vm2, %v4758_v33, 0.0 }
 0x186   : > { %v1853_v55 = vsel %vm1817_vm3, %v4758_v33, 0.0  ;;  %v1884_v44 = vadd.f32 %v1852_v34, %v1743_v42  ;;  %vm1929_vm4 = vcmp.eq.s32.totalorder %v5925_v2, %v4773_v51  ;;  %vm1930_vm5 = vcmp.eq.s32.totalorder %v5929_v62, %v4773_v51 }
 0x187   : > { %v1616_v18 = vadd.f32 %v1584_v16, %v1509_v23  ;;  %v1617_v0 = vadd.f32 %v1585_v6, %v1510_v12  ;;  %v1885_v52 = vadd.f32 %v1853_v55, %v1744_v3  ;;  %v1965_v47 = vsel %vm1929_vm4, %v4755_v28, 0.0 }
 0x188   : > { %v1966_v31 = vsel %vm1930_vm5, %v4755_v28, 0.0  ;;  %v1997_v50 = vadd.f32 %v1965_v47, %v1884_v44  ;;  %vm2038_vm6 = vcmp.eq.s32.totalorder %v5925_v2, %v4779_v56  ;;  %vm2039_vm7 = vcmp.eq.s32.totalorder %v5929_v62, %v4779_v56 }
 0x189   : > { %v4210_v30 = vpack.c.bf16 %v1617_v0, %v1616_v18  ;;  %v1998_v29 = vadd.f32 %v1966_v31, %v1885_v52  ;;  %v2074_v42 = vsel %vm2038_vm6, %v4769_v49, 0.0  ;;  %v2075_v34 = vsel %vm2039_vm7, %v4769_v49, 0.0 }
 0x18a   : > { %v2106_v16 = vadd.f32 %v2074_v42, %v1997_v50  ;;  %vm2148_vm8 = vcmp.eq.s32.totalorder %v5925_v2, %v4794_v13  ;;  %vm2149_vm9 = vcmp.eq.s32.totalorder %v5929_v62, %v4794_v13  ;;  %vm2255_vm10 = vcmp.eq.s32.totalorder %v5925_v2, %v4797_v8  ;;  %v3515_v42 = vld [vmem:[%s4632_s7 + $0x18] sm:$0xff] }
 0x18b   : > { %4211 = vmatprep.subr.bf16.mxu0 %v4210_v30  ;;  %v2107_v6 = vadd.f32 %v2075_v34, %v1998_v29  ;;  %v2184_v47 = vsel %vm2148_vm8, %v4776_v54, 0.0  ;;  %v2185_v52 = vsel %vm2149_vm9, %v4776_v54, 0.0  ;;  %vm2256_vm11 = vcmp.eq.s32.totalorder %v5929_v62, %v4797_v8  ;;  %v3513_v29 = vld [vmem:[%s4632_s7 + $0x8] sm:$0xff]  ;;  %3765 = vmatprep.mubr.f32.mxu1 %v3515_v42 }
 0x18c   : > { %v2216_v0 = vadd.f32 %v2184_v47, %v2106_v16  ;;  %v2291_v18 = vsel %vm2255_vm10, %v4782_v60, 0.0  ;;  %v2292_v23 = vsel %vm2256_vm11, %v4782_v60, 0.0  ;;  %vm2362_vm12 = vcmp.eq.s32.totalorder %v5925_v2, %v4801_v35  ;;  %3695 = vmatprep.mubr.f32.mxu0 %v3513_v29 }
 0x18d   : > { %v2217_v12 = vadd.f32 %v2185_v52, %v2107_v6  ;;  %vm2363_vm13 = vcmp.eq.s32.totalorder %v5929_v62, %v4801_v35  ;;  %v2398_v3 = vsel %vm2362_vm12, %v4787_v63, 0.0  ;;  %vm2469_vm14 = vcmp.eq.s32.totalorder %v5925_v2, %v4807_v26 }
 0x18e   : > { %v2323_v55 = vadd.f32 %v2291_v18, %v2216_v0  ;;  %v2399_v44 = vsel %vm2363_vm13, %v4787_v63, 0.0  ;;  %vm2470_vm15 = vcmp.eq.s32.totalorder %v5929_v62, %v4807_v26  ;;  %v2505_v31 = vsel %vm2469_vm14, %v7958_v59, 0.0 }
 0x18f   : > { %v2324_v50 = vadd.f32 %v2292_v23, %v2217_v12  ;;  %v2506_v30 = vsel %vm2470_vm15, %v7958_v59, 0.0  ;;  %vm256_vm0 = vcmp.eq.s32.totalorder %v5925_v2, %v7968_v15  ;;  %vm257_vm1 = vcmp.eq.s32.totalorder %v5929_v62, %v7968_v15 }
 0x190   : > { %v2430_v34 = vadd.f32 %v2398_v3, %v2323_v55  ;;  %v276_v16 = vsel %vm256_vm0, %v7959_v11, 0.0  ;;  %v277_v6 = vsel %vm257_vm1, %v7959_v11, 0.0  ;;  %vm316_vm2 = vcmp.eq.s32.totalorder %v5925_v2, %v7969_v48 }
 0x191   : > { %v2431_v47 = vadd.f32 %v2399_v44, %v2324_v50  ;;  %vm317_vm3 = vcmp.eq.s32.totalorder %v5929_v62, %v7969_v48  ;;  %v336_v52 = vsel %vm316_vm2, %v7948_v27, 0.0  ;;  %vm380_vm4 = vcmp.eq.s32.totalorder %v5925_v2, %v7949_v25 }
 0x192   : > { %v2537_v0 = vadd.f32 %v2505_v31, %v2430_v34  ;;  %v337_v18 = vsel %vm317_vm3, %v7948_v27, 0.0  ;;  %v352_v23 = vadd.f32 %v336_v52, %v276_v16  ;;  %vm381_vm5 = vcmp.eq.s32.totalorder %v5929_v62, %v7949_v25 }
 0x193   : > { %v2538_v12 = vadd.f32 %v2506_v30, %v2431_v47  ;;  %v353_v3 = vadd.f32 %v337_v18, %v277_v6  ;;  %v400_v55 = vsel %vm380_vm4, %v7950_v19, 0.0  ;;  %v401_v44 = vsel %vm381_vm5, %v7950_v19, 0.0 }
 0x194   : > { %v416_v50 = vadd.f32 %v400_v55, %v352_v23  ;;  %vm440_vm6 = vcmp.eq.s32.totalorder %v5925_v2, %v7951_v17  ;;  %vm441_vm7 = vcmp.eq.s32.totalorder %v5929_v62, %v7951_v17  ;;  %vm501_vm8 = vcmp.eq.s32.totalorder %v5925_v2, %v5024_v61 }
 0x195   : > { %v4242_v31 = vpack.c.bf16 %v2538_v12, %v2537_v0  ;;  %v417_v29 = vadd.f32 %v401_v44, %v353_v3  ;;  %v460_v42 = vsel %vm440_vm6, %v4981_v24, 0.0  ;;  %v461_v30 = vsel %vm441_vm7, %v4981_v24, 0.0 }
 0x196   : > { %v476_v34 = vadd.f32 %v460_v42, %v416_v50  ;;  %vm502_vm9 = vcmp.eq.s32.totalorder %v5929_v62, %v5024_v61  ;;  %v521_v16 = vsel %vm501_vm8, %v4984_v5, 0.0  ;;  %vm559_vm10 = vcmp.eq.s32.totalorder %v5925_v2, %v5027_v53 }
 0x197   : > { %4243 = vmatprep.subr.bf16.mxu1 %v4242_v31  ;;  %v477_v6 = vadd.f32 %v461_v30, %v417_v29  ;;  %v522_v47 = vsel %vm502_vm9, %v4984_v5, 0.0  ;;  %vm560_vm11 = vcmp.eq.s32.totalorder %v5929_v62, %v5027_v53  ;;  %v579_v52 = vsel %vm559_vm10, %v5008_v43, 0.0  ;;  %v7987_v30 = vld [vmem:[#allocation17_spill] sm:$0xff] }
 0x198   : > { %v537_v0 = vadd.f32 %v521_v16, %v476_v34  ;;  %v580_v18 = vsel %vm560_vm11, %v5008_v43, 0.0  ;;  %vm617_vm12 = vcmp.eq.s32.totalorder %v5925_v2, %v5046_v22  ;;  %vm618_vm13 = vcmp.eq.s32.totalorder %v5929_v62, %v5046_v22 }
 0x199   : > { %v538_v23 = vadd.f32 %v522_v47, %v477_v6  ;;  %v637_v12 = vsel %vm617_vm12, %v5030_v38, 0.0  ;;  %v638_v3 = vsel %vm618_vm13, %v5030_v38, 0.0  ;;  %vm675_vm14 = vcmp.eq.s32.totalorder %v5925_v2, %v5049_v7 }
 0x19a   : > { %v595_v55 = vadd.f32 %v579_v52, %v537_v0  ;;  %vm676_vm15 = vcmp.eq.s32.totalorder %v5929_v62, %v5049_v7  ;;  %v695_v44 = vsel %vm675_vm14, %v5052_v4, 0.0  ;;  %v6080_v50 = vadd.s32 216, %v7964_v10 }
 0x19b   : > { %v596_v31 = vadd.f32 %v580_v18, %v538_v23  ;;  %v696_v29 = vsel %vm676_vm15, %v5052_v4, 0.0  ;;  %vm802_vm0 = vcmp.eq.s32.totalorder %v5932_v39, %v4698_v14  ;;  %vm911_vm1 = vcmp.eq.s32.totalorder %v5932_v39, %v7963_v9 }
 0x19c   : > { %7986 = vst [vmem:[#allocation52_spill] sm:$0xff] %v6080_v50  ;;  %v653_v42 = vadd.f32 %v637_v12, %v595_v55  ;;  %vm803_vm2 = vcmp.eq.s32.totalorder %v6080_v50, %v4698_v14  ;;  %v838_v34 = vsel %vm802_vm0, %v7987_v30, 0.0  ;;  %vm912_vm3 = vcmp.eq.s32.totalorder %v6080_v50, %v7963_v9 }
 0x19d   : > { %v654_v16 = vadd.f32 %v638_v3, %v596_v31  ;;  %v839_v6 = vsel %vm803_vm2, %v7987_v30, 0.0  ;;  %v947_v47 = vsel %vm911_vm1, %v4695_v1, 0.0  ;;  %v948_v52 = vsel %vm912_vm3, %v4695_v1, 0.0 }
 0x19e   : > { %v711_v0 = vadd.f32 %v695_v44, %v653_v42  ;;  %v979_v18 = vadd.f32 %v947_v47, %v838_v34  ;;  %v980_v23 = vadd.f32 %v948_v52, %v839_v6  ;;  %vm1024_vm4 = vcmp.eq.s32.totalorder %v5932_v39, %v4707_v36 }
 0x19f   : > { %v712_v12 = vadd.f32 %v696_v29, %v654_v16  ;;  %vm1025_vm5 = vcmp.eq.s32.totalorder %v6080_v50, %v4707_v36  ;;  %v1060_v55 = vsel %vm1024_vm4, %v4683_v57, 0.0  ;;  %vm1133_vm6 = vcmp.eq.s32.totalorder %v5932_v39, %v4713_v40 }
 0x1a0   : > { %v1061_v3 = vsel %vm1025_vm5, %v4683_v57, 0.0  ;;  %v1092_v31 = vadd.f32 %v1060_v55, %v979_v18  ;;  %vm1134_vm7 = vcmp.eq.s32.totalorder %v6080_v50, %v4713_v40  ;;  %v1169_v44 = vsel %vm1133_vm6, %v4686_v58, 0.0 }
 0x1a1   : > { %v4212_v42 = vpack.c.bf16 %v712_v12, %v711_v0  ;;  %v1093_v34 = vadd.f32 %v1061_v3, %v980_v23  ;;  %v1170_v29 = vsel %vm1134_vm7, %v4686_v58, 0.0  ;;  %vm1243_vm8 = vcmp.eq.s32.totalorder %v5932_v39, %v4716_v41 }
 0x1a2   : > { %v1201_v16 = vadd.f32 %v1169_v44, %v1092_v31  ;;  %vm1244_vm9 = vcmp.eq.s32.totalorder %v6080_v50, %v4716_v41  ;;  %v1279_v6 = vsel %vm1243_vm8, %v4704_v21, 0.0  ;;  %vm1350_vm10 = vcmp.eq.s32.totalorder %v5932_v39, %v4722_v46  ;;  %v7988_v31 = vld [vmem:[#allocation20_spill] sm:$0xff] }
 0x1a3   : > { %4213 = vmatpush3.bf16.msra.mxu0 %v4212_v42  ;;  %v1202_v47 = vadd.f32 %v1170_v29, %v1093_v34  ;;  %v1280_v52 = vsel %vm1244_vm9, %v4704_v21, 0.0  ;;  %vm1351_vm11 = vcmp.eq.s32.totalorder %v6080_v50, %v4722_v46  ;;  %v1386_v0 = vsel %vm1350_vm10, %v4710_v37, 0.0  ;;  %v7989_v42 = vld [vmem:[#allocation19_spill] sm:$0xff] }
 0x1a4   : > { %v1311_v18 = vadd.f32 %v1279_v6, %v1201_v16  ;;  %v1387_v23 = vsel %vm1351_vm11, %v4710_v37, 0.0  ;;  %vm1457_vm12 = vcmp.eq.s32.totalorder %v5932_v39, %v4727_v32  ;;  %vm1458_vm13 = vcmp.eq.s32.totalorder %v6080_v50, %v4727_v32 }
 0x1a5   : > { %v1312_v12 = vadd.f32 %v1280_v52, %v1202_v47  ;;  %v1493_v55 = vsel %vm1457_vm12, %v4719_v45, 0.0  ;;  %v1494_v3 = vsel %vm1458_vm13, %v4719_v45, 0.0  ;;  %vm1564_vm14 = vcmp.eq.s32.totalorder %v5932_v39, %v7988_v31 }
 0x1a6   : > { %v1418_v44 = vadd.f32 %v1386_v0, %v1311_v18  ;;  %vm1565_vm15 = vcmp.eq.s32.totalorder %v6080_v50, %v7988_v31  ;;  %v1600_v34 = vsel %vm1564_vm14, %v7989_v42, 0.0  ;;  %v6131_v29 = vadd.s32 96, %v7964_v10 }
 0x1a7   : > { %v1419_v16 = vadd.f32 %v1387_v23, %v1312_v12  ;;  %v1601_v6 = vsel %vm1565_vm15, %v7989_v42, 0.0  ;;  %v6135_v47 = vadd.s32 104, %v7964_v10  ;;  %v6138_v52 = vadd.s32 224, %v7964_v10 }
 0x1a8   : > { %7990 = vst [vmem:[#allocation53_spill] sm:$0xff] %v6131_v29  ;;  %v1525_v62 = vadd.f32 %v1493_v55, %v1418_v44  ;;  %vm788_vm0 = vcmp.eq.s32.totalorder %v6131_v29, %v4698_v14  ;;  %vm897_vm1 = vcmp.eq.s32.totalorder %v6131_v29, %v7963_v9  ;;  %vm1010_vm2 = vcmp.eq.s32.totalorder %v6131_v29, %v4707_v36 }
 0x1a9   : > { %7991 = vst [vmem:[#allocation54_spill] sm:$0xff] %v6135_v47  ;;  %7992 = vst [vmem:[#allocation55_spill] sm:$0xff] %v6138_v52  ;;  %v1526_v0 = vadd.f32 %v1494_v3, %v1419_v16  ;;  %vm789_vm3 = vcmp.eq.s32.totalorder %v6135_v47, %v4698_v14  ;;  %v824_v18 = vsel %vm788_vm0, %v7987_v30, 0.0  ;;  %vm898_vm4 = vcmp.eq.s32.totalorder %v6135_v47, %v7963_v9 }
 0x1aa   : > { %v1632_v23 = vadd.f32 %v1600_v34, %v1525_v62  ;;  %v825_v12 = vsel %vm789_vm3, %v7987_v30, 0.0  ;;  %v933_v55 = vsel %vm897_vm1, %v4695_v1, 0.0  ;;  %v934_v44 = vsel %vm898_vm4, %v4695_v1, 0.0 }
 0x1ab   : > { %v1633_v50 = vadd.f32 %v1601_v6, %v1526_v0  ;;  %v965_v39 = vadd.f32 %v933_v55, %v824_v18  ;;  %v966_v2 = vadd.f32 %v934_v44, %v825_v12  ;;  %vm1011_vm5 = vcmp.eq.s32.totalorder %v6135_v47, %v4707_v36 }
 0x1ac   : > { %v1046_v3 = vsel %vm1010_vm2, %v4683_v57, 0.0  ;;  %v1047_v16 = vsel %vm1011_vm5, %v4683_v57, 0.0  ;;  %vm1119_vm6 = vcmp.eq.s32.totalorder %v6131_v29, %v4713_v40  ;;  %vm1120_vm7 = vcmp.eq.s32.totalorder %v6135_v47, %v4713_v40 }
 0x1ad   : > { %v4244_v62 = vpack.c.bf16 %v1633_v50, %v1632_v23  ;;  %v1078_v34 = vadd.f32 %v1046_v3, %v965_v39  ;;  %v1079_v30 = vadd.f32 %v1047_v16, %v966_v2  ;;  %v1155_v6 = vsel %vm1119_vm6, %v4686_v58, 0.0  ;;  %v7993_v16 = vld [vmem:[#allocation21_spill] sm:$0xff] }
 0x1ae   : > { %v1156_v0 = vsel %vm1120_vm7, %v4686_v58, 0.0  ;;  %vm1229_vm8 = vcmp.eq.s32.totalorder %v6131_v29, %v4716_v41  ;;  %vm1230_vm9 = vcmp.eq.s32.totalorder %v6135_v47, %v4716_v41  ;;  %vm1336_vm10 = vcmp.eq.s32.totalorder %v6131_v29, %v4722_v46 }
 0x1af   : > { %4245 = vmatpush3.bf16.msra.mxu1 %v4244_v62  ;;  %v1187_v18 = vadd.f32 %v1155_v6, %v1078_v34  ;;  %v1188_v12 = vadd.f32 %v1156_v0, %v1079_v30  ;;  %v1265_v50 = vsel %vm1229_vm8, %v4704_v21, 0.0  ;;  %v1266_v2 = vsel %vm1230_vm9, %v4704_v21, 0.0 }
 0x1b0   : > { %vm1337_vm11 = vcmp.eq.s32.totalorder %v6135_v47, %v4722_v46  ;;  %v1372_v39 = vsel %vm1336_vm10, %v4710_v37, 0.0  ;;  %vm1443_vm12 = vcmp.eq.s32.totalorder %v6131_v29, %v4727_v32  ;;  %vm1444_vm13 = vcmp.eq.s32.totalorder %v6135_v47, %v4727_v32 }
 0x1b1   : > { %v1297_v23 = vadd.f32 %v1265_v50, %v1187_v18  ;;  %v1298_v55 = vadd.f32 %v1266_v2, %v1188_v12  ;;  %v1373_v44 = vsel %vm1337_vm11, %v4710_v37, 0.0  ;;  %v1479_v30 = vsel %vm1443_vm12, %v4719_v45, 0.0  ;;  %v7994_v12 = vld [vmem:[#allocation22_spill] sm:$0xff] }
 0x1b2   : > { %v1480_v3 = vsel %vm1444_vm13, %v4719_v45, 0.0  ;;  %vm1550_vm14 = vcmp.eq.s32.totalorder %v6131_v29, %v7988_v31  ;;  %vm1551_vm15 = vcmp.eq.s32.totalorder %v6135_v47, %v7988_v31  ;;  %vm1709_vm0 = vcmp.eq.s32.totalorder %v6131_v29, %v7993_v16 }
 0x1b3   : > { %v1404_v62 = vadd.f32 %v1372_v39, %v1297_v23  ;;  %v1405_v34 = vadd.f32 %v1373_v44, %v1298_v55  ;;  %v1586_v6 = vsel %vm1550_vm14, %v7989_v42, 0.0  ;;  %v1587_v0 = vsel %vm1551_vm15, %v7989_v42, 0.0 }
 0x1b4   : > { %vm1710_vm1 = vcmp.eq.s32.totalorder %v6135_v47, %v7993_v16  ;;  %v1745_v18 = vsel %vm1709_vm0, %v4752_v20, 0.0  ;;  %vm1818_vm2 = vcmp.eq.s32.totalorder %v6131_v29, %v7994_v12  ;;  %vm1819_vm3 = vcmp.eq.s32.totalorder %v6135_v47, %v7994_v12 }
 0x1b5   : > { %v1511_v50 = vadd.f32 %v1479_v30, %v1404_v62  ;;  %v1512_v2 = vadd.f32 %v1480_v3, %v1405_v34  ;;  %v1746_v39 = vsel %vm1710_vm1, %v4752_v20, 0.0  ;;  %v1854_v23 = vsel %vm1818_vm2, %v4758_v33, 0.0 }
 0x1b6   : > { %v1855_v55 = vsel %vm1819_vm3, %v4758_v33, 0.0  ;;  %v1886_v44 = vadd.f32 %v1854_v23, %v1745_v18  ;;  %vm1931_vm4 = vcmp.eq.s32.totalorder %v6131_v29, %v4773_v51  ;;  %vm1932_vm5 = vcmp.eq.s32.totalorder %v6135_v47, %v4773_v51 }
 0x1b7   : > { %v1618_v16 = vadd.f32 %v1586_v6, %v1511_v50  ;;  %v1619_v42 = vadd.f32 %v1587_v0, %v1512_v2  ;;  %v1887_v31 = vadd.f32 %v1855_v55, %v1746_v39  ;;  %v1967_v12 = vsel %vm1931_vm4, %v4755_v28, 0.0 }
 0x1b8   : > { %v1968_v30 = vsel %vm1932_vm5, %v4755_v28, 0.0  ;;  %v1999_v3 = vadd.f32 %v1967_v12, %v1886_v44  ;;  %vm2040_vm6 = vcmp.eq.s32.totalorder %v6131_v29, %v4779_v56  ;;  %vm2041_vm7 = vcmp.eq.s32.totalorder %v6135_v47, %v4779_v56 }
 0x1b9   : > { %v4214_v62 = vpack.c.bf16 %v1619_v42, %v1618_v16  ;;  %v2000_v34 = vadd.f32 %v1968_v30, %v1887_v31  ;;  %v2076_v18 = vsel %vm2040_vm6, %v4769_v49, 0.0  ;;  %v2077_v23 = vsel %vm2041_vm7, %v4769_v49, 0.0 }
 0x1ba   : > { %v2108_v6 = vadd.f32 %v2076_v18, %v1999_v3  ;;  %vm2150_vm8 = vcmp.eq.s32.totalorder %v6131_v29, %v4794_v13  ;;  %vm2151_vm9 = vcmp.eq.s32.totalorder %v6135_v47, %v4794_v13  ;;  %vm2257_vm10 = vcmp.eq.s32.totalorder %v6131_v29, %v4797_v8 }
 0x1bb   : > { %4215 = vmatprep.subr.bf16.mxu0 %v4214_v62  ;;  %v2109_v0 = vadd.f32 %v2077_v23, %v2000_v34  ;;  %v2186_v12 = vsel %vm2150_vm8, %v4776_v54, 0.0  ;;  %v2187_v31 = vsel %vm2151_vm9, %v4776_v54, 0.0  ;;  %vm2258_vm11 = vcmp.eq.s32.totalorder %v6135_v47, %v4797_v8 }
 0x1bc   : > { %v2218_v42 = vadd.f32 %v2186_v12, %v2108_v6  ;;  %v2293_v16 = vsel %vm2257_vm10, %v4782_v60, 0.0  ;;  %v2294_v50 = vsel %vm2258_vm11, %v4782_v60, 0.0  ;;  %vm2364_vm12 = vcmp.eq.s32.totalorder %v6131_v29, %v4801_v35 }
 0x1bd   : > { %v2219_v2 = vadd.f32 %v2187_v31, %v2109_v0  ;;  %vm2365_vm13 = vcmp.eq.s32.totalorder %v6135_v47, %v4801_v35  ;;  %v2400_v39 = vsel %vm2364_vm12, %v4787_v63, 0.0  ;;  %vm2471_vm14 = vcmp.eq.s32.totalorder %v6131_v29, %v4807_v26 }
 0x1be   : > { %v2325_v55 = vadd.f32 %v2293_v16, %v2218_v42  ;;  %v2401_v44 = vsel %vm2365_vm13, %v4787_v63, 0.0  ;;  %vm2472_vm15 = vcmp.eq.s32.totalorder %v6135_v47, %v4807_v26  ;;  %v2507_v30 = vsel %vm2471_vm14, %v7958_v59, 0.0 }
 0x1bf   : > { %v2326_v3 = vadd.f32 %v2294_v50, %v2219_v2  ;;  %v2508_v62 = vsel %vm2472_vm15, %v7958_v59, 0.0  ;;  %vm258_vm0 = vcmp.eq.s32.totalorder %v6131_v29, %v7968_v15  ;;  %vm259_vm1 = vcmp.eq.s32.totalorder %v6135_v47, %v7968_v15 }
 0x1c0   : > { %v2432_v34 = vadd.f32 %v2400_v39, %v2325_v55  ;;  %v278_v18 = vsel %vm258_vm0, %v7959_v11, 0.0  ;;  %v279_v23 = vsel %vm259_vm1, %v7959_v11, 0.0  ;;  %vm318_vm2 = vcmp.eq.s32.totalorder %v6131_v29, %v7969_v48 }
 0x1c1   : > { %v2433_v6 = vadd.f32 %v2401_v44, %v2326_v3  ;;  %vm319_vm3 = vcmp.eq.s32.totalorder %v6135_v47, %v7969_v48  ;;  %v338_v0 = vsel %vm318_vm2, %v7948_v27, 0.0  ;;  %vm382_vm4 = vcmp.eq.s32.totalorder %v6131_v29, %v7949_v25 }
 0x1c2   : > { %v2539_v12 = vadd.f32 %v2507_v30, %v2432_v34  ;;  %v339_v31 = vsel %vm319_vm3, %v7948_v27, 0.0  ;;  %v354_v42 = vadd.f32 %v338_v0, %v278_v18  ;;  %vm383_vm5 = vcmp.eq.s32.totalorder %v6135_v47, %v7949_v25 }
 0x1c3   : > { %v2540_v16 = vadd.f32 %v2508_v62, %v2433_v6  ;;  %v355_v50 = vadd.f32 %v339_v31, %v279_v23  ;;  %v402_v2 = vsel %vm382_vm4, %v7950_v19, 0.0  ;;  %v403_v39 = vsel %vm383_vm5, %v7950_v19, 0.0 }
 0x1c4   : > { %v418_v55 = vadd.f32 %v402_v2, %v354_v42  ;;  %vm442_vm6 = vcmp.eq.s32.totalorder %v6131_v29, %v7951_v17  ;;  %vm443_vm7 = vcmp.eq.s32.totalorder %v6135_v47, %v7951_v17  ;;  %vm503_vm8 = vcmp.eq.s32.totalorder %v6131_v29, %v5024_v61 }
 0x1c5   : > { %v4246_v44 = vpack.c.bf16 %v2540_v16, %v2539_v12  ;;  %v419_v30 = vadd.f32 %v403_v39, %v355_v50  ;;  %v462_v3 = vsel %vm442_vm6, %v4981_v24, 0.0  ;;  %v463_v62 = vsel %vm443_vm7, %v4981_v24, 0.0 }
 0x1c6   : > { %v478_v34 = vadd.f32 %v462_v3, %v418_v55  ;;  %vm504_vm9 = vcmp.eq.s32.totalorder %v6135_v47, %v5024_v61  ;;  %v523_v18 = vsel %vm503_vm8, %v4984_v5, 0.0  ;;  %vm561_vm10 = vcmp.eq.s32.totalorder %v6131_v29, %v5027_v53 }
 0x1c7   : > { %4247 = vmatprep.subr.bf16.mxu1 %v4246_v44  ;;  %v479_v23 = vadd.f32 %v463_v62, %v419_v30  ;;  %v524_v6 = vsel %vm504_vm9, %v4984_v5, 0.0  ;;  %vm562_vm11 = vcmp.eq.s32.totalorder %v6135_v47, %v5027_v53  ;;  %v581_v0 = vsel %vm561_vm10, %v5008_v43, 0.0  ;;  %v7996_v62 = vld [vmem:[#allocation17_spill] sm:$0xff] }
 0x1c8   : > { %v539_v12 = vadd.f32 %v523_v18, %v478_v34  ;;  %v582_v31 = vsel %vm562_vm11, %v5008_v43, 0.0  ;;  %vm619_vm12 = vcmp.eq.s32.totalorder %v6131_v29, %v5046_v22  ;;  %vm620_vm13 = vcmp.eq.s32.totalorder %v6135_v47, %v5046_v22 }
 0x1c9   : > { %v540_v42 = vadd.f32 %v524_v6, %v479_v23  ;;  %v639_v16 = vsel %vm619_vm12, %v5030_v38, 0.0  ;;  %v640_v50 = vsel %vm620_vm13, %v5030_v38, 0.0  ;;  %vm677_vm14 = vcmp.eq.s32.totalorder %v6131_v29, %v5049_v7 }
 0x1ca   : > { %v597_v2 = vadd.f32 %v581_v0, %v539_v12  ;;  %vm678_vm15 = vcmp.eq.s32.totalorder %v6135_v47, %v5049_v7  ;;  %v697_v39 = vsel %vm677_vm14, %v5052_v4, 0.0  ;;  %v6284_v55 = vadd.s32 232, %v7964_v10 }
 0x1cb   : > { %v598_v44 = vadd.f32 %v582_v31, %v540_v42  ;;  %v698_v30 = vsel %vm678_vm15, %v5052_v4, 0.0  ;;  %vm804_vm0 = vcmp.eq.s32.totalorder %v6138_v52, %v4698_v14  ;;  %vm913_vm1 = vcmp.eq.s32.totalorder %v6138_v52, %v7963_v9 }
 0x1cc   : > { %7995 = vst [vmem:[#allocation56_spill] sm:$0xff] %v6284_v55  ;;  %v655_v3 = vadd.f32 %v639_v16, %v597_v2  ;;  %vm805_vm2 = vcmp.eq.s32.totalorder %v6284_v55, %v4698_v14  ;;  %v840_v34 = vsel %vm804_vm0, %v7996_v62, 0.0  ;;  %vm914_vm3 = vcmp.eq.s32.totalorder %v6284_v55, %v7963_v9 }
 0x1cd   : > { %v656_v18 = vadd.f32 %v640_v50, %v598_v44  ;;  %v841_v23 = vsel %vm805_vm2, %v7996_v62, 0.0  ;;  %v949_v6 = vsel %vm913_vm1, %v4695_v1, 0.0  ;;  %v950_v0 = vsel %vm914_vm3, %v4695_v1, 0.0 }
 0x1ce   : > { %v713_v12 = vadd.f32 %v697_v39, %v655_v3  ;;  %v981_v31 = vadd.f32 %v949_v6, %v840_v34  ;;  %v982_v42 = vadd.f32 %v950_v0, %v841_v23  ;;  %vm1026_vm4 = vcmp.eq.s32.totalorder %v6138_v52, %v4707_v36 }
 0x1cf   : > { %v714_v16 = vadd.f32 %v698_v30, %v656_v18  ;;  %vm1027_vm5 = vcmp.eq.s32.totalorder %v6284_v55, %v4707_v36  ;;  %v1062_v2 = vsel %vm1026_vm4, %v4683_v57, 0.0  ;;  %vm1135_vm6 = vcmp.eq.s32.totalorder %v6138_v52, %v4713_v40 }
 0x1d0   : > { %v1063_v50 = vsel %vm1027_vm5, %v4683_v57, 0.0  ;;  %v1094_v44 = vadd.f32 %v1062_v2, %v981_v31  ;;  %vm1136_vm7 = vcmp.eq.s32.totalorder %v6284_v55, %v4713_v40  ;;  %v1171_v39 = vsel %vm1135_vm6, %v4686_v58, 0.0 }
 0x1d1   : > { %v4216_v3 = vpack.c.bf16 %v714_v16, %v713_v12  ;;  %v1095_v34 = vadd.f32 %v1063_v50, %v982_v42  ;;  %v1172_v30 = vsel %vm1136_vm7, %v4686_v58, 0.0  ;;  %vm1245_vm8 = vcmp.eq.s32.totalorder %v6138_v52, %v4716_v41 }
 0x1d2   : > { %v1203_v18 = vadd.f32 %v1171_v39, %v1094_v44  ;;  %vm1246_vm9 = vcmp.eq.s32.totalorder %v6284_v55, %v4716_v41  ;;  %v1281_v23 = vsel %vm1245_vm8, %v4704_v21, 0.0  ;;  %vm1352_vm10 = vcmp.eq.s32.totalorder %v6138_v52, %v4722_v46  ;;  %v7997_v44 = vld [vmem:[#allocation20_spill] sm:$0xff] }
 0x1d3   : > { %4217 = vmatpush3.bf16.msra.mxu0 %v4216_v3  ;;  %v1204_v6 = vadd.f32 %v1172_v30, %v1095_v34  ;;  %v1282_v0 = vsel %vm1246_vm9, %v4704_v21, 0.0  ;;  %vm1353_vm11 = vcmp.eq.s32.totalorder %v6284_v55, %v4722_v46  ;;  %v1388_v12 = vsel %vm1352_vm10, %v4710_v37, 0.0  ;;  %v7998_v3 = vld [vmem:[#allocation19_spill] sm:$0xff] }
 0x1d4   : > { %v1313_v31 = vadd.f32 %v1281_v23, %v1203_v18  ;;  %v1389_v42 = vsel %vm1353_vm11, %v4710_v37, 0.0  ;;  %vm1459_vm12 = vcmp.eq.s32.totalorder %v6138_v52, %v4727_v32  ;;  %vm1460_vm13 = vcmp.eq.s32.totalorder %v6284_v55, %v4727_v32 }
 0x1d5   : > { %v1314_v16 = vadd.f32 %v1282_v0, %v1204_v6  ;;  %v1495_v2 = vsel %vm1459_vm12, %v4719_v45, 0.0  ;;  %v1496_v50 = vsel %vm1460_vm13, %v4719_v45, 0.0  ;;  %vm1566_vm14 = vcmp.eq.s32.totalorder %v6138_v52, %v7997_v44 }
 0x1d6   : > { %v1420_v39 = vadd.f32 %v1388_v12, %v1313_v31  ;;  %vm1567_vm15 = vcmp.eq.s32.totalorder %v6284_v55, %v7997_v44  ;;  %v1602_v34 = vsel %vm1566_vm14, %v7998_v3, 0.0  ;;  %v6335_v30 = vadd.s32 112, %v7964_v10 }
 0x1d7   : > { %v1421_v18 = vadd.f32 %v1389_v42, %v1314_v16  ;;  %v1603_v23 = vsel %vm1567_vm15, %v7998_v3, 0.0  ;;  %v6339_v6 = vadd.s32 120, %v7964_v10  ;;  %v6342_v0 = vadd.s32 240, %v7964_v10 }
 0x1d8   : > { %v1527_v47 = vadd.f32 %v1495_v2, %v1420_v39  ;;  %vm790_vm0 = vcmp.eq.s32.totalorder %v6335_v30, %v4698_v14  ;;  %vm899_vm1 = vcmp.eq.s32.totalorder %v6335_v30, %v7963_v9  ;;  %vm1012_vm2 = vcmp.eq.s32.totalorder %v6335_v30, %v4707_v36 }
 0x1d9   : > { %v1528_v12 = vadd.f32 %v1496_v50, %v1421_v18  ;;  %vm791_vm3 = vcmp.eq.s32.totalorder %v6339_v6, %v4698_v14  ;;  %v826_v31 = vsel %vm790_vm0, %v7996_v62, 0.0  ;;  %vm900_vm4 = vcmp.eq.s32.totalorder %v6339_v6, %v7963_v9 }
 0x1da   : > { %v1634_v42 = vadd.f32 %v1602_v34, %v1527_v47  ;;  %v827_v16 = vsel %vm791_vm3, %v7996_v62, 0.0  ;;  %v935_v2 = vsel %vm899_vm1, %v4695_v1, 0.0  ;;  %v936_v39 = vsel %vm900_vm4, %v4695_v1, 0.0 }
 0x1db   : > { %v1635_v55 = vadd.f32 %v1603_v23, %v1528_v12  ;;  %v967_v52 = vadd.f32 %v935_v2, %v826_v31  ;;  %v968_v29 = vadd.f32 %v936_v39, %v827_v16  ;;  %vm1013_vm5 = vcmp.eq.s32.totalorder %v6339_v6, %v4707_v36 }
 0x1dc   : > { %v1048_v50 = vsel %vm1012_vm2, %v4683_v57, 0.0  ;;  %v1049_v18 = vsel %vm1013_vm5, %v4683_v57, 0.0  ;;  %vm1121_vm6 = vcmp.eq.s32.totalorder %v6335_v30, %v4713_v40  ;;  %vm1122_vm7 = vcmp.eq.s32.totalorder %v6339_v6, %v4713_v40 }
 0x1dd   : > { %v4248_v47 = vpack.c.bf16 %v1635_v55, %v1634_v42  ;;  %v1080_v34 = vadd.f32 %v1048_v50, %v967_v52  ;;  %v1081_v62 = vadd.f32 %v1049_v18, %v968_v29  ;;  %v1157_v23 = vsel %vm1121_vm6, %v4686_v58, 0.0  ;;  %v7999_v18 = vld [vmem:[#allocation21_spill] sm:$0xff] }
 0x1de   : > { %v1158_v12 = vsel %vm1122_vm7, %v4686_v58, 0.0  ;;  %vm1231_vm8 = vcmp.eq.s32.totalorder %v6335_v30, %v4716_v41  ;;  %vm1232_vm9 = vcmp.eq.s32.totalorder %v6339_v6, %v4716_v41  ;;  %vm1338_vm10 = vcmp.eq.s32.totalorder %v6335_v30, %v4722_v46 }
 0x1df   : > { %4249 = vmatpush3.bf16.msra.mxu1 %v4248_v47  ;;  %v1189_v31 = vadd.f32 %v1157_v23, %v1080_v34  ;;  %v1190_v16 = vadd.f32 %v1158_v12, %v1081_v62  ;;  %v1267_v55 = vsel %vm1231_vm8, %v4704_v21, 0.0  ;;  %v1268_v29 = vsel %vm1232_vm9, %v4704_v21, 0.0 }
 0x1e0   : > { %vm1339_vm11 = vcmp.eq.s32.totalorder %v6339_v6, %v4722_v46  ;;  %v1374_v52 = vsel %vm1338_vm10, %v4710_v37, 0.0  ;;  %vm1445_vm12 = vcmp.eq.s32.totalorder %v6335_v30, %v4727_v32  ;;  %vm1446_vm13 = vcmp.eq.s32.totalorder %v6339_v6, %v4727_v32 }
 0x1e1   : > { %v1299_v42 = vadd.f32 %v1267_v55, %v1189_v31  ;;  %v1300_v2 = vadd.f32 %v1268_v29, %v1190_v16  ;;  %v1375_v39 = vsel %vm1339_vm11, %v4710_v37, 0.0  ;;  %v1481_v62 = vsel %vm1445_vm12, %v4719_v45, 0.0  ;;  %v8000_v16 = vld [vmem:[#allocation22_spill] sm:$0xff] }
 0x1e2   : > { %v1482_v50 = vsel %vm1446_vm13, %v4719_v45, 0.0  ;;  %vm1552_vm14 = vcmp.eq.s32.totalorder %v6335_v30, %v7997_v44  ;;  %vm1553_vm15 = vcmp.eq.s32.totalorder %v6339_v6, %v7997_v44  ;;  %vm1711_vm0 = vcmp.eq.s32.totalorder %v6335_v30, %v7999_v18 }
 0x1e3   : > { %v1406_v47 = vadd.f32 %v1374_v52, %v1299_v42  ;;  %v1407_v34 = vadd.f32 %v1375_v39, %v1300_v2  ;;  %v1588_v23 = vsel %vm1552_vm14, %v7998_v3, 0.0  ;;  %v1589_v12 = vsel %vm1553_vm15, %v7998_v3, 0.0 }
 0x1e4   : > { %vm1712_vm1 = vcmp.eq.s32.totalorder %v6339_v6, %v7999_v18  ;;  %v1747_v31 = vsel %vm1711_vm0, %v4752_v20, 0.0  ;;  %vm1820_vm2 = vcmp.eq.s32.totalorder %v6335_v30, %v8000_v16  ;;  %vm1821_vm3 = vcmp.eq.s32.totalorder %v6339_v6, %v8000_v16 }
 0x1e5   : > { %v1513_v55 = vadd.f32 %v1481_v62, %v1406_v47  ;;  %v1514_v29 = vadd.f32 %v1482_v50, %v1407_v34  ;;  %v1748_v52 = vsel %vm1712_vm1, %v4752_v20, 0.0  ;;  %v1856_v42 = vsel %vm1820_vm2, %v4758_v33, 0.0 }
 0x1e6   : > { %v1857_v2 = vsel %vm1821_vm3, %v4758_v33, 0.0  ;;  %v1888_v39 = vadd.f32 %v1856_v42, %v1747_v31  ;;  %vm1933_vm4 = vcmp.eq.s32.totalorder %v6335_v30, %v4773_v51  ;;  %vm1934_vm5 = vcmp.eq.s32.totalorder %v6339_v6, %v4773_v51 }
 0x1e7   : > { %v1620_v18 = vadd.f32 %v1588_v23, %v1513_v55  ;;  %v1621_v3 = vadd.f32 %v1589_v12, %v1514_v29  ;;  %v1889_v44 = vadd.f32 %v1857_v2, %v1748_v52  ;;  %v1969_v16 = vsel %vm1933_vm4, %v4755_v28, 0.0 }
 0x1e8   : > { %v1970_v62 = vsel %vm1934_vm5, %v4755_v28, 0.0  ;;  %v2001_v50 = vadd.f32 %v1969_v16, %v1888_v39  ;;  %vm2042_vm6 = vcmp.eq.s32.totalorder %v6335_v30, %v4779_v56  ;;  %vm2043_vm7 = vcmp.eq.s32.totalorder %v6339_v6, %v4779_v56 }
 0x1e9   : > { %v4218_v47 = vpack.c.bf16 %v1621_v3, %v1620_v18  ;;  %v2002_v34 = vadd.f32 %v1970_v62, %v1889_v44  ;;  %v2078_v31 = vsel %vm2042_vm6, %v4769_v49, 0.0  ;;  %v2079_v42 = vsel %vm2043_vm7, %v4769_v49, 0.0 }
 0x1ea   : > { %v2110_v23 = vadd.f32 %v2078_v31, %v2001_v50  ;;  %vm2152_vm8 = vcmp.eq.s32.totalorder %v6335_v30, %v4794_v13  ;;  %vm2153_vm9 = vcmp.eq.s32.totalorder %v6339_v6, %v4794_v13  ;;  %vm2259_vm10 = vcmp.eq.s32.totalorder %v6335_v30, %v4797_v8 }
 0x1eb   : > { %4219 = vmatprep.subr.bf16.mxu0 %v4218_v47  ;;  %v2111_v12 = vadd.f32 %v2079_v42, %v2002_v34  ;;  %v2188_v16 = vsel %vm2152_vm8, %v4776_v54, 0.0  ;;  %v2189_v44 = vsel %vm2153_vm9, %v4776_v54, 0.0  ;;  %vm2260_vm11 = vcmp.eq.s32.totalorder %v6339_v6, %v4797_v8 }
 0x1ec   : > { %v2220_v3 = vadd.f32 %v2188_v16, %v2110_v23  ;;  %v2295_v18 = vsel %vm2259_vm10, %v4782_v60, 0.0  ;;  %v2296_v55 = vsel %vm2260_vm11, %v4782_v60, 0.0  ;;  %vm2366_vm12 = vcmp.eq.s32.totalorder %v6335_v30, %v4801_v35 }
 0x1ed   : > { %v2221_v29 = vadd.f32 %v2189_v44, %v2111_v12  ;;  %vm2367_vm13 = vcmp.eq.s32.totalorder %v6339_v6, %v4801_v35  ;;  %v2402_v52 = vsel %vm2366_vm12, %v4787_v63, 0.0  ;;  %vm2473_vm14 = vcmp.eq.s32.totalorder %v6335_v30, %v4807_v26 }
 0x1ee   : > { %v2327_v2 = vadd.f32 %v2295_v18, %v2220_v3  ;;  %v2403_v39 = vsel %vm2367_vm13, %v4787_v63, 0.0  ;;  %vm2474_vm15 = vcmp.eq.s32.totalorder %v6339_v6, %v4807_v26  ;;  %v2509_v62 = vsel %vm2473_vm14, %v7958_v59, 0.0 }
 0x1ef   : > { %v2328_v50 = vadd.f32 %v2296_v55, %v2221_v29  ;;  %v2510_v47 = vsel %vm2474_vm15, %v7958_v59, 0.0  ;;  %vm260_vm0 = vcmp.eq.s32.totalorder %v6335_v30, %v7968_v15  ;;  %vm261_vm1 = vcmp.eq.s32.totalorder %v6339_v6, %v7968_v15 }
 0x1f0   : > { %v2434_v34 = vadd.f32 %v2402_v52, %v2327_v2  ;;  %v280_v31 = vsel %vm260_vm0, %v7959_v11, 0.0  ;;  %v281_v42 = vsel %vm261_vm1, %v7959_v11, 0.0  ;;  %vm320_vm2 = vcmp.eq.s32.totalorder %v6335_v30, %v7969_v48 }
 0x1f1   : > { %v2435_v23 = vadd.f32 %v2403_v39, %v2328_v50  ;;  %vm321_vm3 = vcmp.eq.s32.totalorder %v6339_v6, %v7969_v48  ;;  %v340_v12 = vsel %vm320_vm2, %v7948_v27, 0.0  ;;  %vm384_vm4 = vcmp.eq.s32.totalorder %v6335_v30, %v7949_v25 }
 0x1f2   : > { %v2541_v16 = vadd.f32 %v2509_v62, %v2434_v34  ;;  %v341_v15 = vsel %vm321_vm3, %v7948_v27, 0.0  ;;  %v356_v44 = vadd.f32 %v340_v12, %v280_v31  ;;  %vm385_vm5 = vcmp.eq.s32.totalorder %v6339_v6, %v7949_v25 }
 0x1f3   : > { %v2542_v11 = vadd.f32 %v2510_v47, %v2435_v23  ;;  %v357_v3 = vadd.f32 %v341_v15, %v281_v42  ;;  %v404_v18 = vsel %vm384_vm4, %v7950_v19, 0.0  ;;  %v405_v55 = vsel %vm385_vm5, %v7950_v19, 0.0  ;;  %v8001_v42 = vld [vmem:[#allocation17_spill] sm:$0xff] }
 0x1f4   : > { %v420_v29 = vadd.f32 %v404_v18, %v356_v44  ;;  %vm444_vm6 = vcmp.eq.s32.totalorder %v6335_v30, %v7951_v17  ;;  %vm445_vm7 = vcmp.eq.s32.totalorder %v6339_v6, %v7951_v17  ;;  %vm505_vm8 = vcmp.eq.s32.totalorder %v6335_v30, %v5024_v61 }
 0x1f5   : > { %v4250_v27 = vpack.c.bf16 %v2542_v11, %v2541_v16  ;;  %v421_v48 = vadd.f32 %v405_v55, %v357_v3  ;;  %v464_v25 = vsel %vm444_vm6, %v4981_v24, 0.0  ;;  %v465_v52 = vsel %vm445_vm7, %v4981_v24, 0.0 }
 0x1f6   : > { %v480_v2 = vadd.f32 %v464_v25, %v420_v29  ;;  %vm506_vm9 = vcmp.eq.s32.totalorder %v6339_v6, %v5024_v61  ;;  %v525_v19 = vsel %vm505_vm8, %v4984_v5, 0.0  ;;  %vm563_vm10 = vcmp.eq.s32.totalorder %v6335_v30, %v5027_v53  ;;  %v3512_v25 = vld [vmem:[%s4632_s7] sm:$0xff] }
 0x1f7   : > { %4251 = vmatprep.subr.bf16.mxu1 %v4250_v27  ;;  %v481_v17 = vadd.f32 %v465_v52, %v421_v48  ;;  %v526_v39 = vsel %vm506_vm9, %v4984_v5, 0.0  ;;  %vm564_vm11 = vcmp.eq.s32.totalorder %v6339_v6, %v5027_v53  ;;  %v583_v62 = vsel %vm563_vm10, %v5008_v43, 0.0 }
 0x1f8   : > { %v541_v50 = vadd.f32 %v525_v19, %v480_v2  ;;  %v584_v24 = vsel %vm564_vm11, %v5008_v43, 0.0  ;;  %vm621_vm12 = vcmp.eq.s32.totalorder %v6335_v30, %v5046_v22  ;;  %vm622_vm13 = vcmp.eq.s32.totalorder %v6339_v6, %v5046_v22 }
 0x1f9   : > { %v542_v61 = vadd.f32 %v526_v39, %v481_v17  ;;  %v641_v47 = vsel %vm621_vm12, %v5030_v38, 0.0  ;;  %v642_v34 = vsel %vm622_vm13, %v5030_v38, 0.0  ;;  %vm679_vm14 = vcmp.eq.s32.totalorder %v6335_v30, %v5049_v7  ;;  %v8002_v17 = vld [vmem:[#allocation20_spill] sm:$0xff]  ;;  %v8003_v39 = vld [vmem:[#allocation19_spill] sm:$0xff] }
 0x1fa   : > { %v599_v5 = vadd.f32 %v583_v62, %v541_v50  ;;  %vm680_vm15 = vcmp.eq.s32.totalorder %v6339_v6, %v5049_v7  ;;  %v699_v43 = vsel %vm679_vm14, %v5052_v4, 0.0  ;;  %v6488_v53 = vadd.s32 248, %v7964_v10  ;;  %v8004_v62 = vld [vmem:[#allocation28_spill] sm:$0xff] }
 0x1fb   : > { %v600_v31 = vadd.f32 %v584_v24, %v542_v61  ;;  %v700_v22 = vsel %vm680_vm15, %v5052_v4, 0.0  ;;  %vm806_vm0 = vcmp.eq.s32.totalorder %v6342_v0, %v4698_v14  ;;  %vm915_vm1 = vcmp.eq.s32.totalorder %v6342_v0, %v7963_v9  ;;  %v8005_v24 = vld [vmem:[#allocation10_spill] sm:$0xff] }
 0x1fc   : > { %v657_v38 = vadd.f32 %v641_v47, %v599_v5  ;;  %vm807_vm2 = vcmp.eq.s32.totalorder %v6488_v53, %v4698_v14  ;;  %v842_v7 = vsel %vm806_vm0, %v8001_v42, 0.0  ;;  %vm916_vm3 = vcmp.eq.s32.totalorder %v6488_v53, %v7963_v9  ;;  %v8007_v5 = vld [vmem:[#allocation29_spill] sm:$0xff] }
 0x1fd   : > { %v658_v23 = vadd.f32 %v642_v34, %v600_v31  ;;  %v843_v12 = vsel %vm807_vm2, %v8001_v42, 0.0  ;;  %v951_v4 = vsel %vm915_vm1, %v4695_v1, 0.0  ;;  %v952_v16 = vsel %vm916_vm3, %v4695_v1, 0.0  ;;  %v8008_v31 = vld [vmem:[#allocation25_spill] sm:$0xff]  ;;  %v8009_v42 = vld [vmem:[#allocation30_spill] sm:$0xff] }
 0x1fe   : > { %v715_v15 = vadd.f32 %v699_v43, %v657_v38  ;;  %v983_v44 = vadd.f32 %v951_v4, %v842_v7  ;;  %v984_v11 = vadd.f32 %v952_v16, %v843_v12  ;;  %vm1028_vm4 = vcmp.eq.s32.totalorder %v6342_v0, %v4707_v36  ;;  %v8010_v16 = vld [vmem:[#allocation26_spill] sm:$0xff] }
 0x1ff   : > { %v716_v3 = vadd.f32 %v700_v22, %v658_v23  ;;  %vm1029_vm5 = vcmp.eq.s32.totalorder %v6488_v53, %v4707_v36  ;;  %v1064_v14 = vsel %vm1028_vm4, %v4683_v57, 0.0  ;;  %vm1137_vm6 = vcmp.eq.s32.totalorder %v6342_v0, %v4713_v40 }
 0x200   : > { %v1065_v9 = vsel %vm1029_vm5, %v4683_v57, 0.0  ;;  %v1096_v18 = vadd.f32 %v1064_v14, %v983_v44  ;;  %vm1138_vm7 = vcmp.eq.s32.totalorder %v6488_v53, %v4713_v40  ;;  %v1173_v1 = vsel %vm1137_vm6, %v4686_v58, 0.0 }
 0x201   : > { %v4220_v55 = vpack.c.bf16 %v716_v3, %v715_v15  ;;  %v1097_v29 = vadd.f32 %v1065_v9, %v984_v11  ;;  %v1174_v27 = vsel %vm1138_vm7, %v4686_v58, 0.0  ;;  %vm1247_vm8 = vcmp.eq.s32.totalorder %v6342_v0, %v4716_v41  ;;  %v8011_v11 = vld [vmem:[#allocation31_spill] sm:$0xff] }
 0x202   : > { %v1205_v36 = vadd.f32 %v1173_v1, %v1096_v18  ;;  %vm1248_vm9 = vcmp.eq.s32.totalorder %v6488_v53, %v4716_v41  ;;  %v1283_v57 = vsel %vm1247_vm8, %v4704_v21, 0.0  ;;  %vm1354_vm10 = vcmp.eq.s32.totalorder %v6342_v0, %v4722_v46  ;;  %v8012_v9 = vld [vmem:[#allocation27_spill] sm:$0xff] }
 0x203   : > { %4221 = vmatpush3.bf16.msra.mxu0 %v4220_v55  ;;  %v1206_v40 = vadd.f32 %v1174_v27, %v1097_v29  ;;  %v1284_v48 = vsel %vm1248_vm9, %v4704_v21, 0.0  ;;  %vm1355_vm11 = vcmp.eq.s32.totalorder %v6488_v53, %v4722_v46  ;;  %v1390_v58 = vsel %vm1354_vm10, %v4710_v37, 0.0  ;;  %v8013_v29 = vld [vmem:[#allocation34_spill] sm:$0xff] }
 0x204   : > { %v1315_v52 = vadd.f32 %v1283_v57, %v1205_v36  ;;  %v1391_v2 = vsel %vm1355_vm11, %v4710_v37, 0.0  ;;  %vm1461_vm12 = vcmp.eq.s32.totalorder %v6342_v0, %v4727_v32  ;;  %vm1462_vm13 = vcmp.eq.s32.totalorder %v6488_v53, %v4727_v32  ;;  %v8014_v57 = vld [vmem:[#allocation32_spill] sm:$0xff] }
 0x205   : > { %v1316_v41 = vadd.f32 %v1284_v48, %v1206_v40  ;;  %v1497_v19 = vsel %vm1461_vm12, %v4719_v45, 0.0  ;;  %v1498_v21 = vsel %vm1462_vm13, %v4719_v45, 0.0  ;;  %vm1568_vm14 = vcmp.eq.s32.totalorder %v6342_v0, %v8002_v17  ;;  %v8006_v45 = vld [vmem:[#allocation24_spill] sm:$0xff] }
 0x206   : > { %v1422_v46 = vadd.f32 %v1390_v58, %v1315_v52  ;;  %vm1569_vm15 = vcmp.eq.s32.totalorder %v6488_v53, %v8002_v17  ;;  %v1604_v37 = vsel %vm1568_vm14, %v8003_v39, 0.0  ;;  %3696 = vmatmul.mubr.f32.vlgmr.msra.gmra.mrb[0].mxu0 %v3512_v25  ;;  %vm2618_vm0 = vcmp.eq.s32.totalorder %v7964_v10, %v8004_v62  ;;  %v3514_v58 = vld [vmem:[%s4632_s7 + $0x10] sm:$0xff]  ;;  %v8015_v25 = vld [vmem:[#allocation36_spill] sm:$0xff] }
 0x207   : > { %v1423_v50 = vadd.f32 %v1391_v2, %v1316_v41  ;;  %v1605_v32 = vsel %vm1569_vm15, %v8003_v39, 0.0  ;;  %vm2619_vm1 = vcmp.eq.s32.totalorder %v8005_v24, %v8004_v62  ;;  %v2654_v61 = vsel %vm2618_vm0, %v8006_v45, 0.0  ;;  %v8016_v52 = vld [vmem:[#allocation38_spill] sm:$0xff] }
 0x208   : > { %v1529_v47 = vadd.f32 %v1497_v19, %v1422_v46  ;;  %v2655_v34 = vsel %vm2619_vm1, %v8006_v45, 0.0  ;;  %vm2727_vm2 = vcmp.eq.s32.totalorder %v7964_v10, %v8007_v5  ;;  %vm2728_vm3 = vcmp.eq.s32.totalorder %v8005_v24, %v8007_v5  ;;  %v8017_v19 = vld [vmem:[#allocation33_spill] sm:$0xff]  ;;  %v8018_v46 = vld [vmem:[#allocation35_spill] sm:$0xff] }
 0x209   : > { %v1530_v43 = vadd.f32 %v1498_v21, %v1423_v50  ;;  %v2763_v22 = vsel %vm2727_vm2, %v8008_v31, 0.0  ;;  %v2764_v38 = vsel %vm2728_vm3, %v8008_v31, 0.0  ;;  %vm2840_vm4 = vcmp.eq.s32.totalorder %v7964_v10, %v8009_v42  ;;  %v8019_v50 = vld [vmem:[#allocation39_spill] sm:$0xff] }
 0x20a   : > { %v1636_v7 = vadd.f32 %v1604_v37, %v1529_v47  ;;  %v2795_v23 = vadd.f32 %v2763_v22, %v2654_v61  ;;  %v2796_v12 = vadd.f32 %v2764_v38, %v2655_v34  ;;  %vm2841_vm5 = vcmp.eq.s32.totalorder %v8005_v24, %v8009_v42  ;;  %v8020_v47 = vld [vmem:[#allocation37_spill] sm:$0xff]  ;;  %v8022_v38 = vld [vmem:[#allocation11_spill] sm:$0xff] }
 0x20b   : > { %v1637_v4 = vadd.f32 %v1605_v32, %v1530_v43  ;;  %v2876_v15 = vsel %vm2840_vm4, %v8010_v16, 0.0  ;;  %v2877_v44 = vsel %vm2841_vm5, %v8010_v16, 0.0  ;;  %vm2949_vm6 = vcmp.eq.s32.totalorder %v7964_v10, %v8011_v11  ;;  %v8021_v22 = vld [vmem:[#allocation21_spill] sm:$0xff] }
 0x20c   : > { %v2908_v3 = vadd.f32 %v2876_v15, %v2795_v23  ;;  %v2909_v14 = vadd.f32 %v2877_v44, %v2796_v12  ;;  %vm2950_vm7 = vcmp.eq.s32.totalorder %v8005_v24, %v8011_v11  ;;  %v2985_v18 = vsel %vm2949_vm6, %v8012_v9, 0.0  ;;  %v8024_v23 = vld [vmem:[#allocation22_spill] sm:$0xff] }
 0x20d   : > { %v4252_v1 = vpack.c.bf16 %v1637_v4, %v1636_v7  ;;  %v2986_v55 = vsel %vm2950_vm7, %v8012_v9, 0.0  ;;  %vm3059_vm8 = vcmp.eq.s32.totalorder %v7964_v10, %v8013_v29  ;;  %vm3060_vm9 = vcmp.eq.s32.totalorder %v8005_v24, %v8013_v29  ;;  %v8023_v7 = vld [vmem:[#allocation12_spill] sm:$0xff] }
 0x20e   : > { %v3017_v27 = vadd.f32 %v2985_v18, %v2908_v3  ;;  %v3018_v36 = vadd.f32 %v2986_v55, %v2909_v14  ;;  %v3095_v40 = vsel %vm3059_vm8, %v8014_v57, 0.0  ;;  %v3096_v48 = vsel %vm3060_vm9, %v8014_v57, 0.0 }
 0x20f   : > { %4253 = vmatpush3.bf16.msra.mxu1 %v4252_v1  ;;  %vm3166_vm10 = vcmp.eq.s32.totalorder %v7964_v10, %v8015_v25  ;;  %vm3167_vm11 = vcmp.eq.s32.totalorder %v8005_v24, %v8015_v25  ;;  %vm3273_vm12 = vcmp.eq.s32.totalorder %v7964_v10, %v8016_v52  ;;  %vm3274_vm13 = vcmp.eq.s32.totalorder %v8005_v24, %v8016_v52 }
 0x210   : > { %v3127_v2 = vadd.f32 %v3095_v40, %v3017_v27  ;;  %v3128_v41 = vadd.f32 %v3096_v48, %v3018_v36  ;;  %v3202_v21 = vsel %vm3166_vm10, %v8017_v19, 0.0  ;;  %v3203_v17 = vsel %vm3167_vm11, %v8017_v19, 0.0 }
 0x211   : > { %v3309_v39 = vsel %vm3273_vm12, %v8018_v46, 0.0  ;;  %v3310_v37 = vsel %vm3274_vm13, %v8018_v46, 0.0  ;;  %vm3380_vm14 = vcmp.eq.s32.totalorder %v7964_v10, %v8019_v50  ;;  %vm3381_vm15 = vcmp.eq.s32.totalorder %v8005_v24, %v8019_v50 }
 0x212   : > { %3766 = vmatmul.mubr.f32.vlgmr.msra.gmra.mrb[0].mxu1 %v3514_v58  ;;  %v3234_v32 = vadd.f32 %v3202_v21, %v3127_v2  ;;  %v3235_v61 = vadd.f32 %v3203_v17, %v3128_v41  ;;  %v3416_v34 = vsel %vm3380_vm14, %v8020_v47, 0.0  ;;  %v3417_v43 = vsel %vm3381_vm15, %v8020_v47, 0.0 }
 0x213   : > { %vm1713_vm0 = vcmp.eq.s32.totalorder %v8022_v38, %v8021_v22  ;;  %vm1714_vm1 = vcmp.eq.s32.totalorder %v8023_v7, %v8021_v22  ;;  %vm1822_vm2 = vcmp.eq.s32.totalorder %v8022_v38, %v8024_v23  ;;  %vm1823_vm3 = vcmp.eq.s32.totalorder %v8023_v7, %v8024_v23 }
 0x214   : > { %v3341_v10 = vadd.f32 %v3309_v39, %v3234_v32  ;;  %v3342_v24 = vadd.f32 %v3310_v37, %v3235_v61  ;;  %v1749_v12 = vsel %vm1713_vm0, %v4752_v20, 0.0  ;;  %v1750_v4 = vsel %vm1714_vm1, %v4752_v20, 0.0 }
 0x215   : > { %v1858_v15 = vsel %vm1822_vm2, %v4758_v33, 0.0  ;;  %v1859_v44 = vsel %vm1823_vm3, %v4758_v33, 0.0  ;;  %vm1935_vm4 = vcmp.eq.s32.totalorder %v8022_v38, %v4773_v51  ;;  %vm1936_vm5 = vcmp.eq.s32.totalorder %v8023_v7, %v4773_v51 }
 0x216   : > { %v3448_v3 = vadd.f32 %v3416_v34, %v3341_v10  ;;  %v3449_v14 = vadd.f32 %v3417_v43, %v3342_v24  ;;  %v1890_v18 = vadd.f32 %v1858_v15, %v1749_v12  ;;  %v1891_v1 = vadd.f32 %v1859_v44, %v1750_v4  ;;  %v8025_v24 = vld [vmem:[#allocation13_spill] sm:$0xff] }
 0x217   : > { %v1971_v55 = vsel %vm1935_vm4, %v4755_v28, 0.0  ;;  %v1972_v27 = vsel %vm1936_vm5, %v4755_v28, 0.0  ;;  %vm2044_vm6 = vcmp.eq.s32.totalorder %v8022_v38, %v4779_v56  ;;  %vm2045_vm7 = vcmp.eq.s32.totalorder %v8023_v7, %v4779_v56 }
 0x218   : > { %v4254_v36 = vpack.c.bf16 %v3449_v14, %v3448_v3  ;;  %v2003_v40 = vadd.f32 %v1971_v55, %v1890_v18  ;;  %v2004_v48 = vadd.f32 %v1972_v27, %v1891_v1  ;;  %v2080_v58 = vsel %vm2044_vm6, %v4769_v49, 0.0  ;;  %v8026_v3 = vld [vmem:[#allocation15_spill] sm:$0xff] }
 0x219   : > { %v2081_v2 = vsel %vm2045_vm7, %v4769_v49, 0.0  ;;  %vm2154_vm8 = vcmp.eq.s32.totalorder %v8022_v38, %v4794_v13  ;;  %vm2155_vm9 = vcmp.eq.s32.totalorder %v8023_v7, %v4794_v13  ;;  %vm2261_vm10 = vcmp.eq.s32.totalorder %v8022_v38, %v4797_v8 }
 0x21a   : > { %4255 = vmatprep.subr.bf16.mxu0 %v4254_v36  ;;  %v2112_v41 = vadd.f32 %v2080_v58, %v2003_v40  ;;  %v2113_v21 = vadd.f32 %v2081_v2, %v2004_v48  ;;  %v2190_v17 = vsel %vm2154_vm8, %v4776_v54, 0.0  ;;  %v2191_v39 = vsel %vm2155_vm9, %v4776_v54, 0.0 }
 0x21b   : > { %vm2262_vm11 = vcmp.eq.s32.totalorder %v8023_v7, %v4797_v8  ;;  %v2297_v37 = vsel %vm2261_vm10, %v4782_v60, 0.0  ;;  %vm2368_vm12 = vcmp.eq.s32.totalorder %v8022_v38, %v4801_v35  ;;  %vm2369_vm13 = vcmp.eq.s32.totalorder %v8023_v7, %v4801_v35 }
 0x21c   : > { %v2222_v32 = vadd.f32 %v2190_v17, %v2112_v41  ;;  %v2223_v61 = vadd.f32 %v2191_v39, %v2113_v21  ;;  %v2298_v34 = vsel %vm2262_vm11, %v4782_v60, 0.0  ;;  %v2404_v43 = vsel %vm2368_vm12, %v4787_v63, 0.0 }
 0x21d   : > { %v2405_v10 = vsel %vm2369_vm13, %v4787_v63, 0.0  ;;  %vm2475_vm14 = vcmp.eq.s32.totalorder %v8022_v38, %v4807_v26  ;;  %vm2476_vm15 = vcmp.eq.s32.totalorder %v8023_v7, %v4807_v26  ;;  %vm2620_vm0 = vcmp.eq.s32.totalorder %v8025_v24, %v8004_v62 }
 0x21e   : > { %v2329_v12 = vadd.f32 %v2297_v37, %v2222_v32  ;;  %v2330_v4 = vadd.f32 %v2298_v34, %v2223_v61  ;;  %v2511_v15 = vsel %vm2475_vm14, %v7958_v59, 0.0  ;;  %v2512_v44 = vsel %vm2476_vm15, %v7958_v59, 0.0 }
 0x21f   : > { %vm2621_vm1 = vcmp.eq.s32.totalorder %v8026_v3, %v8004_v62  ;;  %v2656_v14 = vsel %vm2620_vm0, %v8006_v45, 0.0  ;;  %vm2729_vm2 = vcmp.eq.s32.totalorder %v8025_v24, %v8007_v5  ;;  %vm2730_vm3 = vcmp.eq.s32.totalorder %v8026_v3, %v8007_v5 }
 0x220   : > { %v2436_v18 = vadd.f32 %v2404_v43, %v2329_v12  ;;  %v2437_v1 = vadd.f32 %v2405_v10, %v2330_v4  ;;  %v2657_v55 = vsel %vm2621_vm1, %v8006_v45, 0.0  ;;  %v2765_v27 = vsel %vm2729_vm2, %v8008_v31, 0.0 }
 0x221   : > { %v2766_v36 = vsel %vm2730_vm3, %v8008_v31, 0.0  ;;  %v2797_v40 = vadd.f32 %v2765_v27, %v2656_v14  ;;  %vm2842_vm4 = vcmp.eq.s32.totalorder %v8025_v24, %v8009_v42  ;;  %vm2843_vm5 = vcmp.eq.s32.totalorder %v8026_v3, %v8009_v42 }
 0x222   : > { %v2543_v48 = vadd.f32 %v2511_v15, %v2436_v18  ;;  %v2544_v58 = vadd.f32 %v2512_v44, %v2437_v1  ;;  %v2798_v2 = vadd.f32 %v2766_v36, %v2657_v55  ;;  %v2878_v41 = vsel %vm2842_vm4, %v8010_v16, 0.0 }
 0x223   : > { %v2879_v21 = vsel %vm2843_vm5, %v8010_v16, 0.0  ;;  %v2910_v17 = vadd.f32 %v2878_v41, %v2797_v40  ;;  %vm2951_vm6 = vcmp.eq.s32.totalorder %v8025_v24, %v8011_v11  ;;  %vm2952_vm7 = vcmp.eq.s32.totalorder %v8026_v3, %v8011_v11 }
 0x224   : > { %v4256_v39 = vpack.c.bf16 %v2544_v58, %v2543_v48  ;;  %v2911_v37 = vadd.f32 %v2879_v21, %v2798_v2  ;;  %v2987_v32 = vsel %vm2951_vm6, %v8012_v9, 0.0  ;;  %v2988_v61 = vsel %vm2952_vm7, %v8012_v9, 0.0  ;;  %v8027_v48 = vld [vmem:[#allocation40_spill] sm:$0xff] }
 0x225   : > { %v3019_v34 = vadd.f32 %v2987_v32, %v2910_v17  ;;  %vm3061_vm8 = vcmp.eq.s32.totalorder %v8025_v24, %v8013_v29  ;;  %vm3062_vm9 = vcmp.eq.s32.totalorder %v8026_v3, %v8013_v29  ;;  %vm3168_vm10 = vcmp.eq.s32.totalorder %v8025_v24, %v8015_v25 }
 0x226   : > { %4257 = vmatpush3.bf16.msra.mxu0 %v4256_v39  ;;  %v3020_v43 = vadd.f32 %v2988_v61, %v2911_v37  ;;  %v3097_v10 = vsel %vm3061_vm8, %v8014_v57, 0.0  ;;  %v3098_v12 = vsel %vm3062_vm9, %v8014_v57, 0.0  ;;  %vm3169_vm11 = vcmp.eq.s32.totalorder %v8026_v3, %v8015_v25 }
 0x227   : > { %v3129_v4 = vadd.f32 %v3097_v10, %v3019_v34  ;;  %v3204_v15 = vsel %vm3168_vm10, %v8017_v19, 0.0  ;;  %v3205_v44 = vsel %vm3169_vm11, %v8017_v19, 0.0  ;;  %vm3275_vm12 = vcmp.eq.s32.totalorder %v8025_v24, %v8016_v52 }
 0x228   : > { %v3130_v14 = vadd.f32 %v3098_v12, %v3020_v43  ;;  %vm3276_vm13 = vcmp.eq.s32.totalorder %v8026_v3, %v8016_v52  ;;  %v3311_v18 = vsel %vm3275_vm12, %v8018_v46, 0.0  ;;  %vm3382_vm14 = vcmp.eq.s32.totalorder %v8025_v24, %v8019_v50  ;;  %v8028_v24 = vld [vmem:[#allocation43_spill] sm:$0xff] }
 0x229   : > { %v3236_v1 = vadd.f32 %v3204_v15, %v3129_v4  ;;  %v3312_v55 = vsel %vm3276_vm13, %v8018_v46, 0.0  ;;  %vm3383_vm15 = vcmp.eq.s32.totalorder %v8026_v3, %v8019_v50  ;;  %v3418_v27 = vsel %vm3382_vm14, %v8020_v47, 0.0 }
 0x22a   : > { %v3237_v36 = vadd.f32 %v3205_v44, %v3130_v14  ;;  %v3419_v40 = vsel %vm3383_vm15, %v8020_v47, 0.0  ;;  %vm1715_vm0 = vcmp.eq.s32.totalorder %v8027_v48, %v8021_v22  ;;  %v4501_v2 = vmov 0.0|0.0  }
 0x22b   : > { %v3343_v58 = vadd.f32 %v3311_v18, %v3236_v1  ;;  %4286 = vmatprep.subr.bf16.mxu1 %v4501_v2  ;;  %vm1716_vm1 = vcmp.eq.s32.totalorder %v8028_v24, %v8021_v22  ;;  %v1751_v41 = vsel %vm1715_vm0, %v4752_v20, 0.0  ;;  %vm1824_vm2 = vcmp.eq.s32.totalorder %v8027_v48, %v8024_v23 }
 0x22c   : > { %v3344_v3 = vadd.f32 %v3312_v55, %v3237_v36  ;;  %v1752_v21 = vsel %vm1716_vm1, %v4752_v20, 0.0  ;;  %vm1825_vm3 = vcmp.eq.s32.totalorder %v8028_v24, %v8024_v23  ;;  %v1860_v17 = vsel %vm1824_vm2, %v4758_v33, 0.0 }
 0x22d   : > { %v3450_v39 = vadd.f32 %v3418_v27, %v3343_v58  ;;  %v1861_v37 = vsel %vm1825_vm3, %v4758_v33, 0.0  ;;  %v1892_v32 = vadd.f32 %v1860_v17, %v1751_v41  ;;  %vm1937_vm4 = vcmp.eq.s32.totalorder %v8027_v48, %v4773_v51 }
 0x22e   : > { %v3451_v61 = vadd.f32 %v3419_v40, %v3344_v3  ;;  %v1893_v34 = vadd.f32 %v1861_v37, %v1752_v21  ;;  %vm1938_vm5 = vcmp.eq.s32.totalorder %v8028_v24, %v4773_v51  ;;  %v1973_v43 = vsel %vm1937_vm4, %v4755_v28, 0.0 }
 0x22f   : > { %v1974_v10 = vsel %vm1938_vm5, %v4755_v28, 0.0  ;;  %v2005_v12 = vadd.f32 %v1973_v43, %v1892_v32  ;;  %vm2046_vm6 = vcmp.eq.s32.totalorder %v8027_v48, %v4779_v56  ;;  %vm2047_vm7 = vcmp.eq.s32.totalorder %v8028_v24, %v4779_v56 }
 0x230   : > { %v4258_v4 = vpack.c.bf16 %v3451_v61, %v3450_v39  ;;  %v2006_v15 = vadd.f32 %v1974_v10, %v1893_v34  ;;  %v2082_v44 = vsel %vm2046_vm6, %v4769_v49, 0.0  ;;  %v2083_v14 = vsel %vm2047_vm7, %v4769_v49, 0.0 }
 0x231   : > { %v2114_v18 = vadd.f32 %v2082_v44, %v2005_v12  ;;  %vm2156_vm8 = vcmp.eq.s32.totalorder %v8027_v48, %v4794_v13  ;;  %vm2157_vm9 = vcmp.eq.s32.totalorder %v8028_v24, %v4794_v13  ;;  %vm2263_vm10 = vcmp.eq.s32.totalorder %v8027_v48, %v4797_v8 }
 0x232   : > { %4259 = vmatprep.subr.bf16.mxu0 %v4258_v4  ;;  %v2115_v1 = vadd.f32 %v2083_v14, %v2006_v15  ;;  %v2192_v55 = vsel %vm2156_vm8, %v4776_v54, 0.0  ;;  %v2193_v27 = vsel %vm2157_vm9, %v4776_v54, 0.0  ;;  %vm2264_vm11 = vcmp.eq.s32.totalorder %v8028_v24, %v4797_v8 }
 0x233   : > { %v2224_v36 = vadd.f32 %v2192_v55, %v2114_v18  ;;  %v2299_v40 = vsel %vm2263_vm10, %v4782_v60, 0.0  ;;  %v2300_v58 = vsel %vm2264_vm11, %v4782_v60, 0.0  ;;  %vm2370_vm12 = vcmp.eq.s32.totalorder %v8027_v48, %v4801_v35 }
 0x234   : > { %v2225_v41 = vadd.f32 %v2193_v27, %v2115_v1  ;;  %vm2371_vm13 = vcmp.eq.s32.totalorder %v8028_v24, %v4801_v35  ;;  %v2406_v3 = vsel %vm2370_vm12, %v4787_v63, 0.0  ;;  %vm2477_vm14 = vcmp.eq.s32.totalorder %v8027_v48, %v4807_v26 }
 0x235   : > { %v2331_v21 = vadd.f32 %v2299_v40, %v2224_v36  ;;  %v2407_v17 = vsel %vm2371_vm13, %v4787_v63, 0.0  ;;  %vm2478_vm15 = vcmp.eq.s32.totalorder %v8028_v24, %v4807_v26  ;;  %v2513_v39 = vsel %vm2477_vm14, %v7958_v59, 0.0 }
 0x236   : > { %v2332_v37 = vadd.f32 %v2300_v58, %v2225_v41  ;;  %v2514_v32 = vsel %vm2478_vm15, %v7958_v59, 0.0  ;;  %vm2634_vm0 = vcmp.eq.s32.totalorder %v8022_v38, %v8004_v62  ;;  %vm2635_vm1 = vcmp.eq.s32.totalorder %v8023_v7, %v8004_v62 }
 0x237   : > { %v2438_v61 = vadd.f32 %v2406_v3, %v2331_v21  ;;  %v2670_v34 = vsel %vm2634_vm0, %v8006_v45, 0.0  ;;  %v2671_v43 = vsel %vm2635_vm1, %v8006_v45, 0.0  ;;  %vm2743_vm2 = vcmp.eq.s32.totalorder %v8022_v38, %v8007_v5 }
 0x238   : > { %v2439_v10 = vadd.f32 %v2407_v17, %v2332_v37  ;;  %vm2744_vm3 = vcmp.eq.s32.totalorder %v8023_v7, %v8007_v5  ;;  %v2779_v12 = vsel %vm2743_vm2, %v8008_v31, 0.0  ;;  %vm2856_vm4 = vcmp.eq.s32.totalorder %v8022_v38, %v8009_v42 }
 0x239   : > { %v2545_v4 = vadd.f32 %v2513_v39, %v2438_v61  ;;  %v2780_v15 = vsel %vm2744_vm3, %v8008_v31, 0.0  ;;  %v2811_v44 = vadd.f32 %v2779_v12, %v2670_v34  ;;  %vm2857_vm5 = vcmp.eq.s32.totalorder %v8023_v7, %v8009_v42 }
 0x23a   : > { %v2546_v14 = vadd.f32 %v2514_v32, %v2439_v10  ;;  %v2812_v18 = vadd.f32 %v2780_v15, %v2671_v43  ;;  %v2892_v1 = vsel %vm2856_vm4, %v8010_v16, 0.0  ;;  %v2893_v55 = vsel %vm2857_vm5, %v8010_v16, 0.0  ;;  %v8029_v15 = vld [vmem:[#allocation16_spill] sm:$0xff] }
 0x23b   : > { %v2924_v27 = vadd.f32 %v2892_v1, %v2811_v44  ;;  %vm2965_vm6 = vcmp.eq.s32.totalorder %v8022_v38, %v8011_v11  ;;  %vm2966_vm7 = vcmp.eq.s32.totalorder %v8023_v7, %v8011_v11  ;;  %vm3075_vm8 = vcmp.eq.s32.totalorder %v8022_v38, %v8013_v29 }
 0x23c   : > { %v4260_v36 = vpack.c.bf16 %v2546_v14, %v2545_v4  ;;  %v2925_v40 = vadd.f32 %v2893_v55, %v2812_v18  ;;  %v3001_v58 = vsel %vm2965_vm6, %v8012_v9, 0.0  ;;  %v3002_v41 = vsel %vm2966_vm7, %v8012_v9, 0.0  ;;  %v8030_v18 = vld [vmem:[#allocation44_spill] sm:$0xff] }
 0x23d   : > { %v3033_v3 = vadd.f32 %v3001_v58, %v2924_v27  ;;  %vm3076_vm9 = vcmp.eq.s32.totalorder %v8023_v7, %v8013_v29  ;;  %v3111_v21 = vsel %vm3075_vm8, %v8014_v57, 0.0  ;;  %vm3182_vm10 = vcmp.eq.s32.totalorder %v8022_v38, %v8015_v25 }
 0x23e   : > { %4261 = vmatpush3.bf16.msra.mxu0 %v4260_v36  ;;  %v3034_v17 = vadd.f32 %v3002_v41, %v2925_v40  ;;  %v3112_v39 = vsel %vm3076_vm9, %v8014_v57, 0.0  ;;  %vm3183_vm11 = vcmp.eq.s32.totalorder %v8023_v7, %v8015_v25  ;;  %v3218_v37 = vsel %vm3182_vm10, %v8017_v19, 0.0 }
 0x23f   : > { %v3143_v32 = vadd.f32 %v3111_v21, %v3033_v3  ;;  %v3219_v61 = vsel %vm3183_vm11, %v8017_v19, 0.0  ;;  %vm3289_vm12 = vcmp.eq.s32.totalorder %v8022_v38, %v8016_v52  ;;  %vm3290_vm13 = vcmp.eq.s32.totalorder %v8023_v7, %v8016_v52 }
 0x240   : > { %v3144_v34 = vadd.f32 %v3112_v39, %v3034_v17  ;;  %v3325_v43 = vsel %vm3289_vm12, %v8018_v46, 0.0  ;;  %v3326_v10 = vsel %vm3290_vm13, %v8018_v46, 0.0  ;;  %vm3396_vm14 = vcmp.eq.s32.totalorder %v8022_v38, %v8019_v50 }
 0x241   : > { %v3250_v12 = vadd.f32 %v3218_v37, %v3143_v32  ;;  %vm3397_vm15 = vcmp.eq.s32.totalorder %v8023_v7, %v8019_v50  ;;  %v3432_v4 = vsel %vm3396_vm14, %v8020_v47, 0.0  ;;  %vm2622_vm0 = vcmp.eq.s32.totalorder %v8029_v15, %v8004_v62 }
 0x242   : > { %v3251_v44 = vadd.f32 %v3219_v61, %v3144_v34  ;;  %v3433_v14 = vsel %vm3397_vm15, %v8020_v47, 0.0  ;;  %vm2623_vm1 = vcmp.eq.s32.totalorder %v8030_v18, %v8004_v62  ;;  %v2658_v1 = vsel %vm2622_vm0, %v8006_v45, 0.0 }
 0x243   : > { %v3357_v55 = vadd.f32 %v3325_v43, %v3250_v12  ;;  %v2659_v38 = vsel %vm2623_vm1, %v8006_v45, 0.0  ;;  %vm2731_vm2 = vcmp.eq.s32.totalorder %v8029_v15, %v8007_v5  ;;  %vm2732_vm3 = vcmp.eq.s32.totalorder %v8030_v18, %v8007_v5 }
 0x244   : > { %v3358_v7 = vadd.f32 %v3326_v10, %v3251_v44  ;;  %v2767_v27 = vsel %vm2731_vm2, %v8008_v31, 0.0  ;;  %v2768_v36 = vsel %vm2732_vm3, %v8008_v31, 0.0  ;;  %vm2844_vm4 = vcmp.eq.s32.totalorder %v8029_v15, %v8009_v42 }
 0x245   : > { %v3464_v40 = vadd.f32 %v3432_v4, %v3357_v55  ;;  %v2799_v58 = vadd.f32 %v2767_v27, %v2658_v1  ;;  %v2800_v41 = vadd.f32 %v2768_v36, %v2659_v38  ;;  %vm2845_vm5 = vcmp.eq.s32.totalorder %v8030_v18, %v8009_v42 }
 0x246   : > { %v3465_v3 = vadd.f32 %v3433_v14, %v3358_v7  ;;  %v2880_v21 = vsel %vm2844_vm4, %v8010_v16, 0.0  ;;  %v2881_v17 = vsel %vm2845_vm5, %v8010_v16, 0.0  ;;  %vm2953_vm6 = vcmp.eq.s32.totalorder %v8029_v15, %v8011_v11 }
 0x247   : > { %v2912_v39 = vadd.f32 %v2880_v21, %v2799_v58  ;;  %v2913_v37 = vadd.f32 %v2881_v17, %v2800_v41  ;;  %vm2954_vm7 = vcmp.eq.s32.totalorder %v8030_v18, %v8011_v11  ;;  %v2989_v32 = vsel %vm2953_vm6, %v8012_v9, 0.0  ;;  %v8031_v41 = vld [vmem:[#allocation45_spill] sm:$0xff] }
 0x248   : > { %v4287_v61 = vpack.c.bf16 %v3465_v3, %v3464_v40  ;;  %v2990_v34 = vsel %vm2954_vm7, %v8012_v9, 0.0  ;;  %vm3063_vm8 = vcmp.eq.s32.totalorder %v8029_v15, %v8013_v29  ;;  %vm3064_vm9 = vcmp.eq.s32.totalorder %v8030_v18, %v8013_v29  ;;  %v8032_v3 = vld [vmem:[#allocation46_spill] sm:$0xff] }
 0x249   : > { %v3021_v43 = vadd.f32 %v2989_v32, %v2912_v39  ;;  %v3022_v10 = vadd.f32 %v2990_v34, %v2913_v37  ;;  %v3099_v12 = vsel %vm3063_vm8, %v8014_v57, 0.0  ;;  %v3100_v4 = vsel %vm3064_vm9, %v8014_v57, 0.0 }
 0x24a   : > { %4288 = vmatpush3.bf16.msra.mxu1 %v4287_v61  ;;  %vm3170_vm10 = vcmp.eq.s32.totalorder %v8029_v15, %v8015_v25  ;;  %vm3171_vm11 = vcmp.eq.s32.totalorder %v8030_v18, %v8015_v25  ;;  %vm3277_vm12 = vcmp.eq.s32.totalorder %v8029_v15, %v8016_v52  ;;  %vm3278_vm13 = vcmp.eq.s32.totalorder %v8030_v18, %v8016_v52 }
 0x24b   : > { %v3131_v44 = vadd.f32 %v3099_v12, %v3021_v43  ;;  %v3132_v14 = vadd.f32 %v3100_v4, %v3022_v10  ;;  %v3206_v1 = vsel %vm3170_vm10, %v8017_v19, 0.0  ;;  %v3207_v55 = vsel %vm3171_vm11, %v8017_v19, 0.0  ;;  %4289 = vmatprep.subr.bf16.mxu1 %v4501_v2 }
 0x24c   : > { %v3313_v38 = vsel %vm3277_vm12, %v8018_v46, 0.0  ;;  %v3314_v7 = vsel %vm3278_vm13, %v8018_v46, 0.0  ;;  %vm3384_vm14 = vcmp.eq.s32.totalorder %v8029_v15, %v8019_v50  ;;  %vm3385_vm15 = vcmp.eq.s32.totalorder %v8030_v18, %v8019_v50 }
 0x24d   : > { %v3238_v27 = vadd.f32 %v3206_v1, %v3131_v44  ;;  %v3239_v36 = vadd.f32 %v3207_v55, %v3132_v14  ;;  %v3420_v40 = vsel %vm3384_vm14, %v8020_v47, 0.0  ;;  %v3421_v58 = vsel %vm3385_vm15, %v8020_v47, 0.0 }
 0x24e   : > { %vm1717_vm0 = vcmp.eq.s32.totalorder %v8031_v41, %v8021_v22  ;;  %vm1718_vm1 = vcmp.eq.s32.totalorder %v8032_v3, %v8021_v22  ;;  %vm1826_vm2 = vcmp.eq.s32.totalorder %v8031_v41, %v8024_v23  ;;  %vm1827_vm3 = vcmp.eq.s32.totalorder %v8032_v3, %v8024_v23 }
 0x24f   : > { %v3345_v15 = vadd.f32 %v3313_v38, %v3238_v27  ;;  %v3346_v18 = vadd.f32 %v3314_v7, %v3239_v36  ;;  %v1753_v21 = vsel %vm1717_vm0, %v4752_v20, 0.0  ;;  %v1754_v17 = vsel %vm1718_vm1, %v4752_v20, 0.0 }
 0x250   : > { %v1862_v39 = vsel %vm1826_vm2, %v4758_v33, 0.0  ;;  %v1863_v37 = vsel %vm1827_vm3, %v4758_v33, 0.0  ;;  %vm1939_vm4 = vcmp.eq.s32.totalorder %v8031_v41, %v4773_v51  ;;  %vm1940_vm5 = vcmp.eq.s32.totalorder %v8032_v3, %v4773_v51 }
 0x251   : > { %v3452_v32 = vadd.f32 %v3420_v40, %v3345_v15  ;;  %v3453_v61 = vadd.f32 %v3421_v58, %v3346_v18  ;;  %v1894_v34 = vadd.f32 %v1862_v39, %v1753_v21  ;;  %v1895_v43 = vadd.f32 %v1863_v37, %v1754_v17 }
 0x252   : > { %v1975_v10 = vsel %vm1939_vm4, %v4755_v28, 0.0  ;;  %v1976_v12 = vsel %vm1940_vm5, %v4755_v28, 0.0  ;;  %vm2048_vm6 = vcmp.eq.s32.totalorder %v8031_v41, %v4779_v56  ;;  %vm2049_vm7 = vcmp.eq.s32.totalorder %v8032_v3, %v4779_v56 }
 0x253   : > { %v4262_v4 = vpack.c.bf16 %v3453_v61, %v3452_v32  ;;  %v2007_v44 = vadd.f32 %v1975_v10, %v1894_v34  ;;  %v2008_v14 = vadd.f32 %v1976_v12, %v1895_v43  ;;  %v2084_v1 = vsel %vm2048_vm6, %v4769_v49, 0.0 }
 0x254   : > { %v2085_v55 = vsel %vm2049_vm7, %v4769_v49, 0.0  ;;  %vm2158_vm8 = vcmp.eq.s32.totalorder %v8031_v41, %v4794_v13  ;;  %vm2159_vm9 = vcmp.eq.s32.totalorder %v8032_v3, %v4794_v13  ;;  %vm2265_vm10 = vcmp.eq.s32.totalorder %v8031_v41, %v4797_v8 }
 0x255   : > { %4263 = vmatprep.subr.bf16.mxu0 %v4262_v4  ;;  %v2116_v38 = vadd.f32 %v2084_v1, %v2007_v44  ;;  %v2117_v7 = vadd.f32 %v2085_v55, %v2008_v14  ;;  %v2194_v27 = vsel %vm2158_vm8, %v4776_v54, 0.0  ;;  %v2195_v36 = vsel %vm2159_vm9, %v4776_v54, 0.0 }
 0x256   : > { %vm2266_vm11 = vcmp.eq.s32.totalorder %v8032_v3, %v4797_v8  ;;  %v2301_v40 = vsel %vm2265_vm10, %v4782_v60, 0.0  ;;  %vm2372_vm12 = vcmp.eq.s32.totalorder %v8031_v41, %v4801_v35  ;;  %vm2373_vm13 = vcmp.eq.s32.totalorder %v8032_v3, %v4801_v35 }
 0x257   : > { %v2226_v58 = vadd.f32 %v2194_v27, %v2116_v38  ;;  %v2227_v15 = vadd.f32 %v2195_v36, %v2117_v7  ;;  %v2302_v18 = vsel %vm2266_vm11, %v4782_v60, 0.0  ;;  %v2408_v21 = vsel %vm2372_vm12, %v4787_v63, 0.0 }
 0x258   : > { %v2409_v17 = vsel %vm2373_vm13, %v4787_v63, 0.0  ;;  %vm2479_vm14 = vcmp.eq.s32.totalorder %v8031_v41, %v4807_v26  ;;  %vm2480_vm15 = vcmp.eq.s32.totalorder %v8032_v3, %v4807_v26  ;;  %vm2636_vm0 = vcmp.eq.s32.totalorder %v8027_v48, %v8004_v62 }
 0x259   : > { %v2333_v39 = vadd.f32 %v2301_v40, %v2226_v58  ;;  %v2334_v37 = vadd.f32 %v2302_v18, %v2227_v15  ;;  %v2515_v32 = vsel %vm2479_vm14, %v7958_v59, 0.0  ;;  %v2516_v61 = vsel %vm2480_vm15, %v7958_v59, 0.0 }
 0x25a   : > { %vm2637_vm1 = vcmp.eq.s32.totalorder %v8028_v24, %v8004_v62  ;;  %v2672_v34 = vsel %vm2636_vm0, %v8006_v45, 0.0  ;;  %vm2745_vm2 = vcmp.eq.s32.totalorder %v8027_v48, %v8007_v5  ;;  %vm2746_vm3 = vcmp.eq.s32.totalorder %v8028_v24, %v8007_v5 }
 0x25b   : > { %v2440_v43 = vadd.f32 %v2408_v21, %v2333_v39  ;;  %v2441_v10 = vadd.f32 %v2409_v17, %v2334_v37  ;;  %v2673_v12 = vsel %vm2637_vm1, %v8006_v45, 0.0  ;;  %v2781_v4 = vsel %vm2745_vm2, %v8008_v31, 0.0 }
 0x25c   : > { %v2782_v44 = vsel %vm2746_vm3, %v8008_v31, 0.0  ;;  %v2813_v14 = vadd.f32 %v2781_v4, %v2672_v34  ;;  %vm2858_vm4 = vcmp.eq.s32.totalorder %v8027_v48, %v8009_v42  ;;  %vm2859_vm5 = vcmp.eq.s32.totalorder %v8028_v24, %v8009_v42 }
 0x25d   : > { %v2547_v1 = vadd.f32 %v2515_v32, %v2440_v43  ;;  %v2548_v55 = vadd.f32 %v2516_v61, %v2441_v10  ;;  %v2814_v38 = vadd.f32 %v2782_v44, %v2673_v12  ;;  %v2894_v7 = vsel %vm2858_vm4, %v8010_v16, 0.0 }
 0x25e   : > { %v2895_v27 = vsel %vm2859_vm5, %v8010_v16, 0.0  ;;  %v2926_v36 = vadd.f32 %v2894_v7, %v2813_v14  ;;  %vm2967_vm6 = vcmp.eq.s32.totalorder %v8027_v48, %v8011_v11  ;;  %vm2968_vm7 = vcmp.eq.s32.totalorder %v8028_v24, %v8011_v11 }
 0x25f   : > { %v4264_v40 = vpack.c.bf16 %v2548_v55, %v2547_v1  ;;  %v2927_v58 = vadd.f32 %v2895_v27, %v2814_v38  ;;  %v3003_v15 = vsel %vm2967_vm6, %v8012_v9, 0.0  ;;  %v3004_v18 = vsel %vm2968_vm7, %v8012_v9, 0.0  ;;  %v8033_v55 = vld [vmem:[#allocation23_spill] sm:$0xff]  ;;  %v8034_v38 = vld [vmem:[#allocation14_spill] sm:$0xff] }
 0x260   : > { %v3035_v21 = vadd.f32 %v3003_v15, %v2926_v36  ;;  %vm3077_vm8 = vcmp.eq.s32.totalorder %v8027_v48, %v8013_v29  ;;  %vm3078_vm9 = vcmp.eq.s32.totalorder %v8028_v24, %v8013_v29  ;;  %vm3184_vm10 = vcmp.eq.s32.totalorder %v8027_v48, %v8015_v25 }
 0x261   : > { %4265 = vmatpush3.bf16.msra.mxu0 %v4264_v40  ;;  %v3036_v17 = vadd.f32 %v3004_v18, %v2927_v58  ;;  %v3113_v39 = vsel %vm3077_vm8, %v8014_v57, 0.0  ;;  %v3114_v37 = vsel %vm3078_vm9, %v8014_v57, 0.0  ;;  %vm3185_vm11 = vcmp.eq.s32.totalorder %v8028_v24, %v8015_v25 }
 0x262   : > { %v3145_v32 = vadd.f32 %v3113_v39, %v3035_v21  ;;  %v3220_v61 = vsel %vm3184_vm10, %v8017_v19, 0.0  ;;  %v3221_v34 = vsel %vm3185_vm11, %v8017_v19, 0.0  ;;  %vm3291_vm12 = vcmp.eq.s32.totalorder %v8027_v48, %v8016_v52 }
 0x263   : > { %v3146_v43 = vadd.f32 %v3114_v37, %v3036_v17  ;;  %vm3292_vm13 = vcmp.eq.s32.totalorder %v8028_v24, %v8016_v52  ;;  %v3327_v10 = vsel %vm3291_vm12, %v8018_v46, 0.0  ;;  %vm3398_vm14 = vcmp.eq.s32.totalorder %v8027_v48, %v8019_v50 }
 0x264   : > { %v3252_v12 = vadd.f32 %v3220_v61, %v3145_v32  ;;  %v3328_v4 = vsel %vm3292_vm13, %v8018_v46, 0.0  ;;  %vm3399_vm15 = vcmp.eq.s32.totalorder %v8028_v24, %v8019_v50  ;;  %v3434_v44 = vsel %vm3398_vm14, %v8020_v47, 0.0 }
 0x265   : > { %v3253_v14 = vadd.f32 %v3221_v34, %v3146_v43  ;;  %v3435_v1 = vsel %vm3399_vm15, %v8020_v47, 0.0  ;;  %vm2624_vm0 = vcmp.eq.s32.totalorder %v8033_v55, %v8004_v62  ;;  %vm2625_vm1 = vcmp.eq.s32.totalorder %v8034_v38, %v8004_v62 }
 0x266   : > { %v3359_v7 = vadd.f32 %v3327_v10, %v3252_v12  ;;  %v2660_v48 = vsel %vm2624_vm0, %v8006_v45, 0.0  ;;  %v2661_v27 = vsel %vm2625_vm1, %v8006_v45, 0.0  ;;  %vm2733_vm2 = vcmp.eq.s32.totalorder %v8033_v55, %v8007_v5 }
 0x267   : > { %v3360_v24 = vadd.f32 %v3328_v4, %v3253_v14  ;;  %vm2734_vm3 = vcmp.eq.s32.totalorder %v8034_v38, %v8007_v5  ;;  %v2769_v36 = vsel %vm2733_vm2, %v8008_v31, 0.0  ;;  %vm2846_vm4 = vcmp.eq.s32.totalorder %v8033_v55, %v8009_v42 }
 0x268   : > { %v3466_v40 = vadd.f32 %v3434_v44, %v3359_v7  ;;  %v2770_v58 = vsel %vm2734_vm3, %v8008_v31, 0.0  ;;  %v2801_v15 = vadd.f32 %v2769_v36, %v2660_v48  ;;  %vm2847_vm5 = vcmp.eq.s32.totalorder %v8034_v38, %v8009_v42 }
 0x269   : > { %v3467_v18 = vadd.f32 %v3435_v1, %v3360_v24  ;;  %v2802_v21 = vadd.f32 %v2770_v58, %v2661_v27  ;;  %v2882_v17 = vsel %vm2846_vm4, %v8010_v16, 0.0  ;;  %v2883_v39 = vsel %vm2847_vm5, %v8010_v16, 0.0  ;;  %v8035_v58 = vld [vmem:[#allocation18_spill] sm:$0xff] }
 0x26a   : > { %v2914_v37 = vadd.f32 %v2882_v17, %v2801_v15  ;;  %vm2955_vm6 = vcmp.eq.s32.totalorder %v8033_v55, %v8011_v11  ;;  %vm2956_vm7 = vcmp.eq.s32.totalorder %v8034_v38, %v8011_v11  ;;  %vm3065_vm8 = vcmp.eq.s32.totalorder %v8033_v55, %v8013_v29 }
 0x26b   : > { %v4290_v32 = vpack.c.bf16 %v3467_v18, %v3466_v40  ;;  %v2915_v61 = vadd.f32 %v2883_v39, %v2802_v21  ;;  %v2991_v34 = vsel %vm2955_vm6, %v8012_v9, 0.0  ;;  %v2992_v43 = vsel %vm2956_vm7, %v8012_v9, 0.0  ;;  %v8036_v21 = vld [vmem:[#allocation9_spill] sm:$0xff] }
 0x26c   : > { %v3023_v10 = vadd.f32 %v2991_v34, %v2914_v37  ;;  %vm3066_vm9 = vcmp.eq.s32.totalorder %v8034_v38, %v8013_v29  ;;  %v3101_v12 = vsel %vm3065_vm8, %v8014_v57, 0.0  ;;  %vm3172_vm10 = vcmp.eq.s32.totalorder %v8033_v55, %v8015_v25 }
 0x26d   : > { %4291 = vmatpush3.bf16.msra.mxu1 %v4290_v32  ;;  %v3024_v4 = vadd.f32 %v2992_v43, %v2915_v61  ;;  %v3102_v44 = vsel %vm3066_vm9, %v8014_v57, 0.0  ;;  %vm3173_vm11 = vcmp.eq.s32.totalorder %v8034_v38, %v8015_v25  ;;  %v3208_v14 = vsel %vm3172_vm10, %v8017_v19, 0.0 }
 0x26e   : > { %v3133_v1 = vadd.f32 %v3101_v12, %v3023_v10  ;;  %v3209_v7 = vsel %vm3173_vm11, %v8017_v19, 0.0  ;;  %vm3279_vm12 = vcmp.eq.s32.totalorder %v8033_v55, %v8016_v52  ;;  %vm3280_vm13 = vcmp.eq.s32.totalorder %v8034_v38, %v8016_v52  ;;  %4292 = vmatprep.subr.bf16.mxu1 %v4501_v2 }
 0x26f   : > { %v3134_v48 = vadd.f32 %v3102_v44, %v3024_v4  ;;  %v3315_v27 = vsel %vm3279_vm12, %v8018_v46, 0.0  ;;  %v3316_v24 = vsel %vm3280_vm13, %v8018_v46, 0.0  ;;  %vm3386_vm14 = vcmp.eq.s32.totalorder %v8033_v55, %v8019_v50 }
 0x270   : > { %v3240_v36 = vadd.f32 %v3208_v14, %v3133_v1  ;;  %vm3387_vm15 = vcmp.eq.s32.totalorder %v8034_v38, %v8019_v50  ;;  %v3422_v40 = vsel %vm3386_vm14, %v8020_v47, 0.0  ;;  %vm1719_vm0 = vcmp.eq.s32.totalorder %v8035_v58, %v8021_v22 }
 0x271   : > { %v3241_v15 = vadd.f32 %v3209_v7, %v3134_v48  ;;  %v3423_v18 = vsel %vm3387_vm15, %v8020_v47, 0.0  ;;  %vm1720_vm1 = vcmp.eq.s32.totalorder %v8036_v21, %v8021_v22  ;;  %v1755_v17 = vsel %vm1719_vm0, %v4752_v20, 0.0 }
 0x272   : > { %v3347_v39 = vadd.f32 %v3315_v27, %v3240_v36  ;;  %v1756_v55 = vsel %vm1720_vm1, %v4752_v20, 0.0  ;;  %vm1828_vm2 = vcmp.eq.s32.totalorder %v8035_v58, %v8024_v23  ;;  %vm1829_vm3 = vcmp.eq.s32.totalorder %v8036_v21, %v8024_v23 }
 0x273   : > { %v3348_v38 = vadd.f32 %v3316_v24, %v3241_v15  ;;  %v1864_v37 = vsel %vm1828_vm2, %v4758_v33, 0.0  ;;  %v1865_v32 = vsel %vm1829_vm3, %v4758_v33, 0.0  ;;  %vm1941_vm4 = vcmp.eq.s32.totalorder %v8035_v58, %v4773_v51 }
 0x274   : > { %v3454_v61 = vadd.f32 %v3422_v40, %v3347_v39  ;;  %v1896_v34 = vadd.f32 %v1864_v37, %v1755_v17  ;;  %v1897_v43 = vadd.f32 %v1865_v32, %v1756_v55  ;;  %vm1942_vm5 = vcmp.eq.s32.totalorder %v8036_v21, %v4773_v51 }
 0x275   : > { %v3455_v10 = vadd.f32 %v3423_v18, %v3348_v38  ;;  %v1977_v12 = vsel %vm1941_vm4, %v4755_v28, 0.0  ;;  %v1978_v4 = vsel %vm1942_vm5, %v4755_v28, 0.0  ;;  %vm2050_vm6 = vcmp.eq.s32.totalorder %v8035_v58, %v4779_v56 }
 0x276   : > { %v2009_v44 = vadd.f32 %v1977_v12, %v1896_v34  ;;  %v2010_v14 = vadd.f32 %v1978_v4, %v1897_v43  ;;  %vm2051_vm7 = vcmp.eq.s32.totalorder %v8036_v21, %v4779_v56  ;;  %v2086_v1 = vsel %vm2050_vm6, %v4769_v49, 0.0 }
 0x277   : > { %v4266_v7 = vpack.c.bf16 %v3455_v10, %v3454_v61  ;;  %v2087_v48 = vsel %vm2051_vm7, %v4769_v49, 0.0  ;;  %vm2160_vm8 = vcmp.eq.s32.totalorder %v8035_v58, %v4794_v13  ;;  %vm2161_vm9 = vcmp.eq.s32.totalorder %v8036_v21, %v4794_v13 }
 0x278   : > { %v2118_v27 = vadd.f32 %v2086_v1, %v2009_v44  ;;  %v2119_v24 = vadd.f32 %v2087_v48, %v2010_v14  ;;  %v2196_v36 = vsel %vm2160_vm8, %v4776_v54, 0.0  ;;  %v2197_v40 = vsel %vm2161_vm9, %v4776_v54, 0.0 }
 0x279   : > { %4267 = vmatprep.subr.bf16.mxu0 %v4266_v7  ;;  %vm2267_vm10 = vcmp.eq.s32.totalorder %v8035_v58, %v4797_v8  ;;  %vm2268_vm11 = vcmp.eq.s32.totalorder %v8036_v21, %v4797_v8  ;;  %vm2374_vm12 = vcmp.eq.s32.totalorder %v8035_v58, %v4801_v35  ;;  %vm2375_vm13 = vcmp.eq.s32.totalorder %v8036_v21, %v4801_v35 }
 0x27a   : > { %v2228_v15 = vadd.f32 %v2196_v36, %v2118_v27  ;;  %v2229_v18 = vadd.f32 %v2197_v40, %v2119_v24  ;;  %v2303_v17 = vsel %vm2267_vm10, %v4782_v60, 0.0  ;;  %v2304_v39 = vsel %vm2268_vm11, %v4782_v60, 0.0 }
 0x27b   : > { %v2410_v55 = vsel %vm2374_vm12, %v4787_v63, 0.0  ;;  %v2411_v38 = vsel %vm2375_vm13, %v4787_v63, 0.0  ;;  %vm2481_vm14 = vcmp.eq.s32.totalorder %v8035_v58, %v4807_v26  ;;  %vm2482_vm15 = vcmp.eq.s32.totalorder %v8036_v21, %v4807_v26 }
 0x27c   : > { %v2335_v37 = vadd.f32 %v2303_v17, %v2228_v15  ;;  %v2336_v32 = vadd.f32 %v2304_v39, %v2229_v18  ;;  %v2517_v61 = vsel %vm2481_vm14, %v7958_v59, 0.0  ;;  %v2518_v34 = vsel %vm2482_vm15, %v7958_v59, 0.0 }
 0x27d   : > { %vm2638_vm0 = vcmp.eq.s32.totalorder %v8031_v41, %v8004_v62  ;;  %vm2639_vm1 = vcmp.eq.s32.totalorder %v8032_v3, %v8004_v62  ;;  %vm2747_vm2 = vcmp.eq.s32.totalorder %v8031_v41, %v8007_v5  ;;  %vm2748_vm3 = vcmp.eq.s32.totalorder %v8032_v3, %v8007_v5 }
 0x27e   : > { %v2442_v43 = vadd.f32 %v2410_v55, %v2335_v37  ;;  %v2443_v10 = vadd.f32 %v2411_v38, %v2336_v32  ;;  %v2674_v12 = vsel %vm2638_vm0, %v8006_v45, 0.0  ;;  %v2675_v4 = vsel %vm2639_vm1, %v8006_v45, 0.0 }
 0x27f   : > { %v2783_v44 = vsel %vm2747_vm2, %v8008_v31, 0.0  ;;  %v2784_v14 = vsel %vm2748_vm3, %v8008_v31, 0.0  ;;  %vm2860_vm4 = vcmp.eq.s32.totalorder %v8031_v41, %v8009_v42  ;;  %vm2861_vm5 = vcmp.eq.s32.totalorder %v8032_v3, %v8009_v42 }
 0x280   : > { %v2549_v1 = vadd.f32 %v2517_v61, %v2442_v43  ;;  %v2550_v7 = vadd.f32 %v2518_v34, %v2443_v10  ;;  %v2815_v48 = vadd.f32 %v2783_v44, %v2674_v12  ;;  %v2816_v27 = vadd.f32 %v2784_v14, %v2675_v4  ;;  %v8037_v44 = vld [vmem:[#allocation41_spill] sm:$0xff] }
 0x281   : > { %v2896_v24 = vsel %vm2860_vm4, %v8010_v16, 0.0  ;;  %v2897_v36 = vsel %vm2861_vm5, %v8010_v16, 0.0  ;;  %vm2969_vm6 = vcmp.eq.s32.totalorder %v8031_v41, %v8011_v11  ;;  %vm2970_vm7 = vcmp.eq.s32.totalorder %v8032_v3, %v8011_v11 }
 0x282   : > { %v4268_v40 = vpack.c.bf16 %v2550_v7, %v2549_v1  ;;  %v2928_v15 = vadd.f32 %v2896_v24, %v2815_v48  ;;  %v2929_v18 = vadd.f32 %v2897_v36, %v2816_v27  ;;  %v3005_v17 = vsel %vm2969_vm6, %v8012_v9, 0.0  ;;  %v8038_v27 = vld [vmem:[#allocation42_spill] sm:$0xff] }
 0x283   : > { %v3006_v39 = vsel %vm2970_vm7, %v8012_v9, 0.0  ;;  %vm3079_vm8 = vcmp.eq.s32.totalorder %v8031_v41, %v8013_v29  ;;  %vm3080_vm9 = vcmp.eq.s32.totalorder %v8032_v3, %v8013_v29  ;;  %vm3186_vm10 = vcmp.eq.s32.totalorder %v8031_v41, %v8015_v25 }
 0x284   : > { %4269 = vmatpush3.bf16.msra.mxu0 %v4268_v40  ;;  %v3037_v55 = vadd.f32 %v3005_v17, %v2928_v15  ;;  %v3038_v38 = vadd.f32 %v3006_v39, %v2929_v18  ;;  %v3115_v37 = vsel %vm3079_vm8, %v8014_v57, 0.0  ;;  %v3116_v32 = vsel %vm3080_vm9, %v8014_v57, 0.0 }
 0x285   : > { %vm3187_vm11 = vcmp.eq.s32.totalorder %v8032_v3, %v8015_v25  ;;  %v3222_v61 = vsel %vm3186_vm10, %v8017_v19, 0.0  ;;  %vm3293_vm12 = vcmp.eq.s32.totalorder %v8031_v41, %v8016_v52  ;;  %vm3294_vm13 = vcmp.eq.s32.totalorder %v8032_v3, %v8016_v52 }
 0x286   : > { %v3147_v34 = vadd.f32 %v3115_v37, %v3037_v55  ;;  %v3148_v43 = vadd.f32 %v3116_v32, %v3038_v38  ;;  %v3223_v10 = vsel %vm3187_vm11, %v8017_v19, 0.0  ;;  %v3329_v12 = vsel %vm3293_vm12, %v8018_v46, 0.0 }
 0x287   : > { %v3330_v4 = vsel %vm3294_vm13, %v8018_v46, 0.0  ;;  %vm3400_vm14 = vcmp.eq.s32.totalorder %v8031_v41, %v8019_v50  ;;  %vm3401_vm15 = vcmp.eq.s32.totalorder %v8032_v3, %v8019_v50  ;;  %vm2626_vm0 = vcmp.eq.s32.totalorder %v8037_v44, %v8004_v62 }
 0x288   : > { %v3254_v14 = vadd.f32 %v3222_v61, %v3147_v34  ;;  %v3255_v1 = vadd.f32 %v3223_v10, %v3148_v43  ;;  %v3436_v7 = vsel %vm3400_vm14, %v8020_v47, 0.0  ;;  %v3437_v48 = vsel %vm3401_vm15, %v8020_v47, 0.0 }
 0x289   : > { %vm2627_vm1 = vcmp.eq.s32.totalorder %v8038_v27, %v8004_v62  ;;  %v2662_v24 = vsel %vm2626_vm0, %v8006_v45, 0.0  ;;  %vm2735_vm2 = vcmp.eq.s32.totalorder %v8037_v44, %v8007_v5  ;;  %vm2736_vm3 = vcmp.eq.s32.totalorder %v8038_v27, %v8007_v5 }
 0x28a   : > { %v3361_v41 = vadd.f32 %v3329_v12, %v3254_v14  ;;  %v3362_v3 = vadd.f32 %v3330_v4, %v3255_v1  ;;  %v2663_v36 = vsel %vm2627_vm1, %v8006_v45, 0.0  ;;  %v2771_v40 = vsel %vm2735_vm2, %v8008_v31, 0.0 }
 0x28b   : > { %v2772_v15 = vsel %vm2736_vm3, %v8008_v31, 0.0  ;;  %v2803_v18 = vadd.f32 %v2771_v40, %v2662_v24  ;;  %vm2848_vm4 = vcmp.eq.s32.totalorder %v8037_v44, %v8009_v42  ;;  %vm2849_vm5 = vcmp.eq.s32.totalorder %v8038_v27, %v8009_v42 }
 0x28c   : > { %v3468_v17 = vadd.f32 %v3436_v7, %v3361_v41  ;;  %v3469_v39 = vadd.f32 %v3437_v48, %v3362_v3  ;;  %v2804_v55 = vadd.f32 %v2772_v15, %v2663_v36  ;;  %v2884_v38 = vsel %vm2848_vm4, %v8010_v16, 0.0 }
 0x28d   : > { %v2885_v37 = vsel %vm2849_vm5, %v8010_v16, 0.0  ;;  %v2916_v32 = vadd.f32 %v2884_v38, %v2803_v18  ;;  %vm2957_vm6 = vcmp.eq.s32.totalorder %v8037_v44, %v8011_v11  ;;  %vm2958_vm7 = vcmp.eq.s32.totalorder %v8038_v27, %v8011_v11 }
 0x28e   : > { %v4293_v61 = vpack.c.bf16 %v3469_v39, %v3468_v17  ;;  %v2917_v34 = vadd.f32 %v2885_v37, %v2804_v55  ;;  %v2993_v43 = vsel %vm2957_vm6, %v8012_v9, 0.0  ;;  %v2994_v10 = vsel %vm2958_vm7, %v8012_v9, 0.0  ;;  %v8039_v39 = vld [vmem:[#allocation47_spill] sm:$0xff]  ;;  %v8040_v55 = vld [vmem:[#allocation48_spill] sm:$0xff] }
 0x28f   : > { %v3025_v12 = vadd.f32 %v2993_v43, %v2916_v32  ;;  %vm3067_vm8 = vcmp.eq.s32.totalorder %v8037_v44, %v8013_v29  ;;  %vm3068_vm9 = vcmp.eq.s32.totalorder %v8038_v27, %v8013_v29  ;;  %vm3174_vm10 = vcmp.eq.s32.totalorder %v8037_v44, %v8015_v25 }
 0x290   : > { %4294 = vmatpush3.bf16.msra.mxu1 %v4293_v61  ;;  %v3026_v4 = vadd.f32 %v2994_v10, %v2917_v34  ;;  %v3103_v14 = vsel %vm3067_vm8, %v8014_v57, 0.0  ;;  %v3104_v1 = vsel %vm3068_vm9, %v8014_v57, 0.0  ;;  %vm3175_vm11 = vcmp.eq.s32.totalorder %v8038_v27, %v8015_v25 }
 0x291   : > { %v3135_v7 = vadd.f32 %v3103_v14, %v3025_v12  ;;  %v3210_v48 = vsel %vm3174_vm10, %v8017_v19, 0.0  ;;  %v3211_v24 = vsel %vm3175_vm11, %v8017_v19, 0.0  ;;  %vm3281_vm12 = vcmp.eq.s32.totalorder %v8037_v44, %v8016_v52  ;;  %4295 = vmatprep.subr.bf16.mxu1 %v4501_v2 }
 0x292   : > { %v3136_v41 = vadd.f32 %v3104_v1, %v3026_v4  ;;  %vm3282_vm13 = vcmp.eq.s32.totalorder %v8038_v27, %v8016_v52  ;;  %v3317_v3 = vsel %vm3281_vm12, %v8018_v46, 0.0  ;;  %vm3388_vm14 = vcmp.eq.s32.totalorder %v8037_v44, %v8019_v50 }
 0x293   : > { %v3242_v36 = vadd.f32 %v3210_v48, %v3135_v7  ;;  %v3318_v40 = vsel %vm3282_vm13, %v8018_v46, 0.0  ;;  %vm3389_vm15 = vcmp.eq.s32.totalorder %v8038_v27, %v8019_v50  ;;  %v3424_v15 = vsel %vm3388_vm14, %v8020_v47, 0.0 }
 0x294   : > { %v3243_v18 = vadd.f32 %v3211_v24, %v3136_v41  ;;  %v3425_v17 = vsel %vm3389_vm15, %v8020_v47, 0.0  ;;  %vm1721_vm0 = vcmp.eq.s32.totalorder %v8039_v39, %v8021_v22  ;;  %vm1722_vm1 = vcmp.eq.s32.totalorder %v8040_v55, %v8021_v22 }
 0x295   : > { %v3349_v38 = vadd.f32 %v3317_v3, %v3242_v36  ;;  %v1757_v44 = vsel %vm1721_vm0, %v4752_v20, 0.0  ;;  %v1758_v37 = vsel %vm1722_vm1, %v4752_v20, 0.0  ;;  %vm1830_vm2 = vcmp.eq.s32.totalorder %v8039_v39, %v8024_v23 }
 0x296   : > { %v3350_v27 = vadd.f32 %v3318_v40, %v3243_v18  ;;  %vm1831_vm3 = vcmp.eq.s32.totalorder %v8040_v55, %v8024_v23  ;;  %v1866_v32 = vsel %vm1830_vm2, %v4758_v33, 0.0  ;;  %vm1943_vm4 = vcmp.eq.s32.totalorder %v8039_v39, %v4773_v51 }
 0x297   : > { %v3456_v61 = vadd.f32 %v3424_v15, %v3349_v38  ;;  %v1867_v34 = vsel %vm1831_vm3, %v4758_v33, 0.0  ;;  %v1898_v43 = vadd.f32 %v1866_v32, %v1757_v44  ;;  %vm1944_vm5 = vcmp.eq.s32.totalorder %v8040_v55, %v4773_v51  ;;  %v3517_v44 = vld [vmem:[%s4632_s7 + $0x28] sm:$0xff] }
 0x298   : > { %v3457_v10 = vadd.f32 %v3425_v17, %v3350_v27  ;;  %v1899_v12 = vadd.f32 %v1867_v34, %v1758_v37  ;;  %v1979_v4 = vsel %vm1943_vm4, %v4755_v28, 0.0  ;;  %v1980_v14 = vsel %vm1944_vm5, %v4755_v28, 0.0  ;;  %3835 = vmatprep.mubr.f32.mxu0 %v3517_v44 }
 0x299   : > { %v2011_v1 = vadd.f32 %v1979_v4, %v1898_v43  ;;  %vm2052_vm6 = vcmp.eq.s32.totalorder %v8039_v39, %v4779_v56  ;;  %vm2053_vm7 = vcmp.eq.s32.totalorder %v8040_v55, %v4779_v56  ;;  %vm2162_vm8 = vcmp.eq.s32.totalorder %v8039_v39, %v4794_v13 }
 0x29a   : > { %v4270_v7 = vpack.c.bf16 %v3457_v10, %v3456_v61  ;;  %v2012_v48 = vadd.f32 %v1980_v14, %v1899_v12  ;;  %v2088_v24 = vsel %vm2052_vm6, %v4769_v49, 0.0  ;;  %v2089_v41 = vsel %vm2053_vm7, %v4769_v49, 0.0 }
 0x29b   : > { %v2120_v3 = vadd.f32 %v2088_v24, %v2011_v1  ;;  %vm2163_vm9 = vcmp.eq.s32.totalorder %v8040_v55, %v4794_v13  ;;  %v2198_v36 = vsel %vm2162_vm8, %v4776_v54, 0.0  ;;  %vm2269_vm10 = vcmp.eq.s32.totalorder %v8039_v39, %v4797_v8 }
 0x29c   : > { %4271 = vmatprep.subr.bf16.mxu0 %v4270_v7  ;;  %v2121_v40 = vadd.f32 %v2089_v41, %v2012_v48  ;;  %v2199_v15 = vsel %vm2163_vm9, %v4776_v54, 0.0  ;;  %vm2270_vm11 = vcmp.eq.s32.totalorder %v8040_v55, %v4797_v8  ;;  %v2305_v18 = vsel %vm2269_vm10, %v4782_v60, 0.0 }
 0x29d   : > { %v2230_v17 = vadd.f32 %v2198_v36, %v2120_v3  ;;  %v2306_v38 = vsel %vm2270_vm11, %v4782_v60, 0.0  ;;  %vm2376_vm12 = vcmp.eq.s32.totalorder %v8039_v39, %v4801_v35  ;;  %vm2377_vm13 = vcmp.eq.s32.totalorder %v8040_v55, %v4801_v35 }
 0x29e   : > { %v2231_v37 = vadd.f32 %v2199_v15, %v2121_v40  ;;  %v2412_v27 = vsel %vm2376_vm12, %v4787_v63, 0.0  ;;  %v2413_v32 = vsel %vm2377_vm13, %v4787_v63, 0.0  ;;  %vm2483_vm14 = vcmp.eq.s32.totalorder %v8039_v39, %v4807_v26 }
 0x29f   : > { %v2337_v61 = vadd.f32 %v2305_v18, %v2230_v17  ;;  %vm2484_vm15 = vcmp.eq.s32.totalorder %v8040_v55, %v4807_v26  ;;  %v2519_v34 = vsel %vm2483_vm14, %v7958_v59, 0.0  ;;  %vm2640_vm0 = vcmp.eq.s32.totalorder %v8035_v58, %v8004_v62 }
 0x2a0   : > { %v2338_v43 = vadd.f32 %v2306_v38, %v2231_v37  ;;  %v2520_v10 = vsel %vm2484_vm15, %v7958_v59, 0.0  ;;  %vm2641_vm1 = vcmp.eq.s32.totalorder %v8036_v21, %v8004_v62  ;;  %v2676_v12 = vsel %vm2640_vm0, %v8006_v45, 0.0 }
 0x2a1   : > { %v2444_v4 = vadd.f32 %v2412_v27, %v2337_v61  ;;  %v2677_v14 = vsel %vm2641_vm1, %v8006_v45, 0.0  ;;  %vm2749_vm2 = vcmp.eq.s32.totalorder %v8035_v58, %v8007_v5  ;;  %vm2750_vm3 = vcmp.eq.s32.totalorder %v8036_v21, %v8007_v5 }
 0x2a2   : > { %v2445_v1 = vadd.f32 %v2413_v32, %v2338_v43  ;;  %v2785_v7 = vsel %vm2749_vm2, %v8008_v31, 0.0  ;;  %v2786_v48 = vsel %vm2750_vm3, %v8008_v31, 0.0  ;;  %vm2862_vm4 = vcmp.eq.s32.totalorder %v8035_v58, %v8009_v42 }
 0x2a3   : > { %v2551_v24 = vadd.f32 %v2519_v34, %v2444_v4  ;;  %v2817_v41 = vadd.f32 %v2785_v7, %v2676_v12  ;;  %v2818_v3 = vadd.f32 %v2786_v48, %v2677_v14  ;;  %vm2863_vm5 = vcmp.eq.s32.totalorder %v8036_v21, %v8009_v42 }
 0x2a4   : > { %v2552_v36 = vadd.f32 %v2520_v10, %v2445_v1  ;;  %v2898_v40 = vsel %vm2862_vm4, %v8010_v16, 0.0  ;;  %v2899_v15 = vsel %vm2863_vm5, %v8010_v16, 0.0  ;;  %vm2971_vm6 = vcmp.eq.s32.totalorder %v8035_v58, %v8011_v11 }
 0x2a5   : > { %v2930_v18 = vadd.f32 %v2898_v40, %v2817_v41  ;;  %v2931_v17 = vadd.f32 %v2899_v15, %v2818_v3  ;;  %vm2972_vm7 = vcmp.eq.s32.totalorder %v8036_v21, %v8011_v11  ;;  %v3007_v38 = vsel %vm2971_vm6, %v8012_v9, 0.0  ;;  %v8041_v3 = vld [vmem:[#allocation49_spill] sm:$0xff] }
 0x2a6   : > { %v4272_v44 = vpack.c.bf16 %v2552_v36, %v2551_v24  ;;  %v3008_v37 = vsel %vm2972_vm7, %v8012_v9, 0.0  ;;  %vm3081_vm8 = vcmp.eq.s32.totalorder %v8035_v58, %v8013_v29  ;;  %vm3082_vm9 = vcmp.eq.s32.totalorder %v8036_v21, %v8013_v29  ;;  %v8042_v36 = vld [vmem:[#allocation50_spill] sm:$0xff] }
 0x2a7   : > { %v3039_v27 = vadd.f32 %v3007_v38, %v2930_v18  ;;  %v3040_v32 = vadd.f32 %v3008_v37, %v2931_v17  ;;  %v3117_v61 = vsel %vm3081_vm8, %v8014_v57, 0.0  ;;  %v3118_v34 = vsel %vm3082_vm9, %v8014_v57, 0.0 }
 0x2a8   : > { %4273 = vmatpush3.bf16.msra.mxu0 %v4272_v44  ;;  %vm3188_vm10 = vcmp.eq.s32.totalorder %v8035_v58, %v8015_v25  ;;  %vm3189_vm11 = vcmp.eq.s32.totalorder %v8036_v21, %v8015_v25  ;;  %vm3295_vm12 = vcmp.eq.s32.totalorder %v8035_v58, %v8016_v52  ;;  %vm3296_vm13 = vcmp.eq.s32.totalorder %v8036_v21, %v8016_v52 }
 0x2a9   : > { %v3149_v43 = vadd.f32 %v3117_v61, %v3039_v27  ;;  %v3150_v10 = vadd.f32 %v3118_v34, %v3040_v32  ;;  %v3224_v12 = vsel %vm3188_vm10, %v8017_v19, 0.0  ;;  %v3225_v4 = vsel %vm3189_vm11, %v8017_v19, 0.0 }
 0x2aa   : > { %v3331_v14 = vsel %vm3295_vm12, %v8018_v46, 0.0  ;;  %v3332_v1 = vsel %vm3296_vm13, %v8018_v46, 0.0  ;;  %vm3402_vm14 = vcmp.eq.s32.totalorder %v8035_v58, %v8019_v50  ;;  %vm3403_vm15 = vcmp.eq.s32.totalorder %v8036_v21, %v8019_v50 }
 0x2ab   : > { %v3256_v7 = vadd.f32 %v3224_v12, %v3149_v43  ;;  %v3257_v48 = vadd.f32 %v3225_v4, %v3150_v10  ;;  %v3438_v24 = vsel %vm3402_vm14, %v8020_v47, 0.0  ;;  %v3439_v41 = vsel %vm3403_vm15, %v8020_v47, 0.0 }
 0x2ac   : > { %vm2628_vm0 = vcmp.eq.s32.totalorder %v8041_v3, %v8004_v62  ;;  %vm2629_vm1 = vcmp.eq.s32.totalorder %v8042_v36, %v8004_v62  ;;  %vm2737_vm2 = vcmp.eq.s32.totalorder %v8041_v3, %v8007_v5  ;;  %vm2738_vm3 = vcmp.eq.s32.totalorder %v8042_v36, %v8007_v5 }
 0x2ad   : > { %v3363_v58 = vadd.f32 %v3331_v14, %v3256_v7  ;;  %v3364_v21 = vadd.f32 %v3332_v1, %v3257_v48  ;;  %v2664_v40 = vsel %vm2628_vm0, %v8006_v45, 0.0  ;;  %v2665_v15 = vsel %vm2629_vm1, %v8006_v45, 0.0 }
 0x2ae   : > { %v2773_v18 = vsel %vm2737_vm2, %v8008_v31, 0.0  ;;  %v2774_v17 = vsel %vm2738_vm3, %v8008_v31, 0.0  ;;  %vm2850_vm4 = vcmp.eq.s32.totalorder %v8041_v3, %v8009_v42  ;;  %vm2851_vm5 = vcmp.eq.s32.totalorder %v8042_v36, %v8009_v42 }
 0x2af   : > { %v3470_v38 = vadd.f32 %v3438_v24, %v3363_v58  ;;  %v3471_v44 = vadd.f32 %v3439_v41, %v3364_v21  ;;  %v2805_v37 = vadd.f32 %v2773_v18, %v2664_v40  ;;  %v2806_v27 = vadd.f32 %v2774_v17, %v2665_v15  ;;  %v8043_v18 = vld [vmem:[#allocation51_spill] sm:$0xff] }
 0x2b0   : > { %v2886_v32 = vsel %vm2850_vm4, %v8010_v16, 0.0  ;;  %v2887_v61 = vsel %vm2851_vm5, %v8010_v16, 0.0  ;;  %vm2959_vm6 = vcmp.eq.s32.totalorder %v8041_v3, %v8011_v11  ;;  %vm2960_vm7 = vcmp.eq.s32.totalorder %v8042_v36, %v8011_v11 }
 0x2b1   : > { %v4296_v34 = vpack.c.bf16 %v3471_v44, %v3470_v38  ;;  %v2918_v43 = vadd.f32 %v2886_v32, %v2805_v37  ;;  %v2919_v10 = vadd.f32 %v2887_v61, %v2806_v27  ;;  %v2995_v12 = vsel %vm2959_vm6, %v8012_v9, 0.0  ;;  %v8044_v27 = vld [vmem:[#allocation52_spill] sm:$0xff] }
 0x2b2   : > { %v2996_v4 = vsel %vm2960_vm7, %v8012_v9, 0.0  ;;  %vm3069_vm8 = vcmp.eq.s32.totalorder %v8041_v3, %v8013_v29  ;;  %vm3070_vm9 = vcmp.eq.s32.totalorder %v8042_v36, %v8013_v29  ;;  %vm3176_vm10 = vcmp.eq.s32.totalorder %v8041_v3, %v8015_v25 }
 0x2b3   : > { %4297 = vmatpush3.bf16.msra.mxu1 %v4296_v34  ;;  %v3027_v14 = vadd.f32 %v2995_v12, %v2918_v43  ;;  %v3028_v1 = vadd.f32 %v2996_v4, %v2919_v10  ;;  %v3105_v7 = vsel %vm3069_vm8, %v8014_v57, 0.0  ;;  %v3106_v48 = vsel %vm3070_vm9, %v8014_v57, 0.0 }
 0x2b4   : > { %vm3177_vm11 = vcmp.eq.s32.totalorder %v8042_v36, %v8015_v25  ;;  %v3212_v24 = vsel %vm3176_vm10, %v8017_v19, 0.0  ;;  %vm3283_vm12 = vcmp.eq.s32.totalorder %v8041_v3, %v8016_v52  ;;  %vm3284_vm13 = vcmp.eq.s32.totalorder %v8042_v36, %v8016_v52  ;;  %4298 = vmatprep.subr.bf16.mxu1 %v4501_v2 }
 0x2b5   : > { %v3137_v41 = vadd.f32 %v3105_v7, %v3027_v14  ;;  %v3138_v58 = vadd.f32 %v3106_v48, %v3028_v1  ;;  %v3213_v21 = vsel %vm3177_vm11, %v8017_v19, 0.0  ;;  %v3319_v40 = vsel %vm3283_vm12, %v8018_v46, 0.0 }
 0x2b6   : > { %v3320_v15 = vsel %vm3284_vm13, %v8018_v46, 0.0  ;;  %vm3390_vm14 = vcmp.eq.s32.totalorder %v8041_v3, %v8019_v50  ;;  %vm3391_vm15 = vcmp.eq.s32.totalorder %v8042_v36, %v8019_v50  ;;  %vm1723_vm0 = vcmp.eq.s32.totalorder %v8043_v18, %v8021_v22 }
 0x2b7   : > { %v3244_v17 = vadd.f32 %v3212_v24, %v3137_v41  ;;  %v3245_v38 = vadd.f32 %v3213_v21, %v3138_v58  ;;  %v3426_v44 = vsel %vm3390_vm14, %v8020_v47, 0.0  ;;  %v3427_v37 = vsel %vm3391_vm15, %v8020_v47, 0.0 }
 0x2b8   : > { %vm1724_vm1 = vcmp.eq.s32.totalorder %v8044_v27, %v8021_v22  ;;  %v1759_v32 = vsel %vm1723_vm0, %v4752_v20, 0.0  ;;  %vm1832_vm2 = vcmp.eq.s32.totalorder %v8043_v18, %v8024_v23  ;;  %vm1833_vm3 = vcmp.eq.s32.totalorder %v8044_v27, %v8024_v23 }
 0x2b9   : > { %v3351_v3 = vadd.f32 %v3319_v40, %v3244_v17  ;;  %v3352_v36 = vadd.f32 %v3320_v15, %v3245_v38  ;;  %v1760_v61 = vsel %vm1724_vm1, %v4752_v20, 0.0  ;;  %v1868_v34 = vsel %vm1832_vm2, %v4758_v33, 0.0 }
 0x2ba   : > { %v1869_v43 = vsel %vm1833_vm3, %v4758_v33, 0.0  ;;  %v1900_v10 = vadd.f32 %v1868_v34, %v1759_v32  ;;  %vm1945_vm4 = vcmp.eq.s32.totalorder %v8043_v18, %v4773_v51  ;;  %vm1946_vm5 = vcmp.eq.s32.totalorder %v8044_v27, %v4773_v51 }
 0x2bb   : > { %v3458_v12 = vadd.f32 %v3426_v44, %v3351_v3  ;;  %v3459_v4 = vadd.f32 %v3427_v37, %v3352_v36  ;;  %v1901_v14 = vadd.f32 %v1869_v43, %v1760_v61  ;;  %v1981_v1 = vsel %vm1945_vm4, %v4755_v28, 0.0 }
 0x2bc   : > { %v1982_v7 = vsel %vm1946_vm5, %v4755_v28, 0.0  ;;  %v2013_v48 = vadd.f32 %v1981_v1, %v1900_v10  ;;  %vm2054_vm6 = vcmp.eq.s32.totalorder %v8043_v18, %v4779_v56  ;;  %vm2055_vm7 = vcmp.eq.s32.totalorder %v8044_v27, %v4779_v56 }
 0x2bd   : > { %v4274_v24 = vpack.c.bf16 %v3459_v4, %v3458_v12  ;;  %v2014_v41 = vadd.f32 %v1982_v7, %v1901_v14  ;;  %v2090_v58 = vsel %vm2054_vm6, %v4769_v49, 0.0  ;;  %v2091_v21 = vsel %vm2055_vm7, %v4769_v49, 0.0 }
 0x2be   : > { %v2122_v40 = vadd.f32 %v2090_v58, %v2013_v48  ;;  %vm2164_vm8 = vcmp.eq.s32.totalorder %v8043_v18, %v4794_v13  ;;  %vm2165_vm9 = vcmp.eq.s32.totalorder %v8044_v27, %v4794_v13  ;;  %vm2271_vm10 = vcmp.eq.s32.totalorder %v8043_v18, %v4797_v8 }
 0x2bf   : > { %4275 = vmatprep.subr.bf16.mxu0 %v4274_v24  ;;  %v2123_v15 = vadd.f32 %v2091_v21, %v2014_v41  ;;  %v2200_v17 = vsel %vm2164_vm8, %v4776_v54, 0.0  ;;  %v2201_v38 = vsel %vm2165_vm9, %v4776_v54, 0.0  ;;  %vm2272_vm11 = vcmp.eq.s32.totalorder %v8044_v27, %v4797_v8 }
 0x2c0   : > { %v2232_v44 = vadd.f32 %v2200_v17, %v2122_v40  ;;  %v2307_v37 = vsel %vm2271_vm10, %v4782_v60, 0.0  ;;  %v2308_v32 = vsel %vm2272_vm11, %v4782_v60, 0.0  ;;  %vm2378_vm12 = vcmp.eq.s32.totalorder %v8043_v18, %v4801_v35 }
 0x2c1   : > { %v2233_v3 = vadd.f32 %v2201_v38, %v2123_v15  ;;  %vm2379_vm13 = vcmp.eq.s32.totalorder %v8044_v27, %v4801_v35  ;;  %v2414_v36 = vsel %vm2378_vm12, %v4787_v63, 0.0  ;;  %vm2485_vm14 = vcmp.eq.s32.totalorder %v8043_v18, %v4807_v26 }
 0x2c2   : > { %v2339_v61 = vadd.f32 %v2307_v37, %v2232_v44  ;;  %v2415_v34 = vsel %vm2379_vm13, %v4787_v63, 0.0  ;;  %vm2486_vm15 = vcmp.eq.s32.totalorder %v8044_v27, %v4807_v26  ;;  %v2521_v43 = vsel %vm2485_vm14, %v7958_v59, 0.0 }
 0x2c3   : > { %v2340_v10 = vadd.f32 %v2308_v32, %v2233_v3  ;;  %v2522_v12 = vsel %vm2486_vm15, %v7958_v59, 0.0  ;;  %vm2642_vm0 = vcmp.eq.s32.totalorder %v8039_v39, %v8004_v62  ;;  %vm2643_vm1 = vcmp.eq.s32.totalorder %v8040_v55, %v8004_v62 }
 0x2c4   : > { %v2446_v4 = vadd.f32 %v2414_v36, %v2339_v61  ;;  %v2678_v14 = vsel %vm2642_vm0, %v8006_v45, 0.0  ;;  %v2679_v1 = vsel %vm2643_vm1, %v8006_v45, 0.0  ;;  %vm2751_vm2 = vcmp.eq.s32.totalorder %v8039_v39, %v8007_v5 }
 0x2c5   : > { %v2447_v7 = vadd.f32 %v2415_v34, %v2340_v10  ;;  %vm2752_vm3 = vcmp.eq.s32.totalorder %v8040_v55, %v8007_v5  ;;  %v2787_v48 = vsel %vm2751_vm2, %v8008_v31, 0.0  ;;  %vm2864_vm4 = vcmp.eq.s32.totalorder %v8039_v39, %v8009_v42 }
 0x2c6   : > { %v2553_v24 = vadd.f32 %v2521_v43, %v2446_v4  ;;  %v2788_v41 = vsel %vm2752_vm3, %v8008_v31, 0.0  ;;  %v2819_v58 = vadd.f32 %v2787_v48, %v2678_v14  ;;  %vm2865_vm5 = vcmp.eq.s32.totalorder %v8040_v55, %v8009_v42 }
 0x2c7   : > { %v2554_v21 = vadd.f32 %v2522_v12, %v2447_v7  ;;  %v2820_v40 = vadd.f32 %v2788_v41, %v2679_v1  ;;  %v2900_v15 = vsel %vm2864_vm4, %v8010_v16, 0.0  ;;  %v2901_v17 = vsel %vm2865_vm5, %v8010_v16, 0.0  ;;  %v8045_v41 = vld [vmem:[#allocation53_spill] sm:$0xff] }
 0x2c8   : > { %v2932_v38 = vadd.f32 %v2900_v15, %v2819_v58  ;;  %vm2973_vm6 = vcmp.eq.s32.totalorder %v8039_v39, %v8011_v11  ;;  %vm2974_vm7 = vcmp.eq.s32.totalorder %v8040_v55, %v8011_v11  ;;  %vm3083_vm8 = vcmp.eq.s32.totalorder %v8039_v39, %v8013_v29 }
 0x2c9   : > { %v4276_v44 = vpack.c.bf16 %v2554_v21, %v2553_v24  ;;  %v2933_v37 = vadd.f32 %v2901_v17, %v2820_v40  ;;  %v3009_v32 = vsel %vm2973_vm6, %v8012_v9, 0.0  ;;  %v3010_v3 = vsel %vm2974_vm7, %v8012_v9, 0.0  ;;  %v8046_v40 = vld [vmem:[#allocation54_spill] sm:$0xff] }
 0x2ca   : > { %v3041_v36 = vadd.f32 %v3009_v32, %v2932_v38  ;;  %vm3084_vm9 = vcmp.eq.s32.totalorder %v8040_v55, %v8013_v29  ;;  %v3119_v61 = vsel %vm3083_vm8, %v8014_v57, 0.0  ;;  %vm3190_vm10 = vcmp.eq.s32.totalorder %v8039_v39, %v8015_v25 }
 0x2cb   : > { %4277 = vmatpush3.bf16.msra.mxu0 %v4276_v44  ;;  %v3042_v34 = vadd.f32 %v3010_v3, %v2933_v37  ;;  %v3120_v43 = vsel %vm3084_vm9, %v8014_v57, 0.0  ;;  %vm3191_vm11 = vcmp.eq.s32.totalorder %v8040_v55, %v8015_v25  ;;  %v3226_v10 = vsel %vm3190_vm10, %v8017_v19, 0.0 }
 0x2cc   : > { %v3151_v12 = vadd.f32 %v3119_v61, %v3041_v36  ;;  %v3227_v4 = vsel %vm3191_vm11, %v8017_v19, 0.0  ;;  %vm3297_vm12 = vcmp.eq.s32.totalorder %v8039_v39, %v8016_v52  ;;  %vm3298_vm13 = vcmp.eq.s32.totalorder %v8040_v55, %v8016_v52 }
 0x2cd   : > { %v3152_v14 = vadd.f32 %v3120_v43, %v3042_v34  ;;  %v3333_v1 = vsel %vm3297_vm12, %v8018_v46, 0.0  ;;  %v3334_v7 = vsel %vm3298_vm13, %v8018_v46, 0.0  ;;  %vm3404_vm14 = vcmp.eq.s32.totalorder %v8039_v39, %v8019_v50 }
 0x2ce   : > { %v3258_v48 = vadd.f32 %v3226_v10, %v3151_v12  ;;  %vm3405_vm15 = vcmp.eq.s32.totalorder %v8040_v55, %v8019_v50  ;;  %v3440_v24 = vsel %vm3404_vm14, %v8020_v47, 0.0  ;;  %vm2630_vm0 = vcmp.eq.s32.totalorder %v8045_v41, %v8004_v62 }
 0x2cf   : > { %v3259_v58 = vadd.f32 %v3227_v4, %v3152_v14  ;;  %v3441_v21 = vsel %vm3405_vm15, %v8020_v47, 0.0  ;;  %vm2631_vm1 = vcmp.eq.s32.totalorder %v8046_v40, %v8004_v62  ;;  %v2666_v15 = vsel %vm2630_vm0, %v8006_v45, 0.0 }
 0x2d0   : > { %v3365_v17 = vadd.f32 %v3333_v1, %v3258_v48  ;;  %v2667_v39 = vsel %vm2631_vm1, %v8006_v45, 0.0  ;;  %vm2739_vm2 = vcmp.eq.s32.totalorder %v8045_v41, %v8007_v5  ;;  %vm2740_vm3 = vcmp.eq.s32.totalorder %v8046_v40, %v8007_v5 }
 0x2d1   : > { %v3366_v55 = vadd.f32 %v3334_v7, %v3259_v58  ;;  %v2775_v38 = vsel %vm2739_vm2, %v8008_v31, 0.0  ;;  %v2776_v44 = vsel %vm2740_vm3, %v8008_v31, 0.0  ;;  %vm2852_vm4 = vcmp.eq.s32.totalorder %v8045_v41, %v8009_v42 }
 0x2d2   : > { %v3472_v37 = vadd.f32 %v3440_v24, %v3365_v17  ;;  %v2807_v32 = vadd.f32 %v2775_v38, %v2666_v15  ;;  %v2808_v3 = vadd.f32 %v2776_v44, %v2667_v39  ;;  %vm2853_vm5 = vcmp.eq.s32.totalorder %v8046_v40, %v8009_v42 }
 0x2d3   : > { %v3473_v36 = vadd.f32 %v3441_v21, %v3366_v55  ;;  %v2888_v61 = vsel %vm2852_vm4, %v8010_v16, 0.0  ;;  %v2889_v34 = vsel %vm2853_vm5, %v8010_v16, 0.0  ;;  %vm2961_vm6 = vcmp.eq.s32.totalorder %v8045_v41, %v8011_v11 }
 0x2d4   : > { %v2920_v43 = vadd.f32 %v2888_v61, %v2807_v32  ;;  %v2921_v10 = vadd.f32 %v2889_v34, %v2808_v3  ;;  %vm2962_vm7 = vcmp.eq.s32.totalorder %v8046_v40, %v8011_v11  ;;  %v2997_v12 = vsel %vm2961_vm6, %v8012_v9, 0.0  ;;  %v8047_v61 = vld [vmem:[#allocation55_spill] sm:$0xff]  ;;  %v8048_v34 = vld [vmem:[#allocation56_spill] sm:$0xff] }
 0x2d5   : > { %v4299_v4 = vpack.c.bf16 %v3473_v36, %v3472_v37  ;;  %v2998_v14 = vsel %vm2962_vm7, %v8012_v9, 0.0  ;;  %vm3071_vm8 = vcmp.eq.s32.totalorder %v8045_v41, %v8013_v29  ;;  %vm3072_vm9 = vcmp.eq.s32.totalorder %v8046_v40, %v8013_v29 }
 0x2d6   : > { %v3029_v1 = vadd.f32 %v2997_v12, %v2920_v43  ;;  %v3030_v7 = vadd.f32 %v2998_v14, %v2921_v10  ;;  %v3107_v48 = vsel %vm3071_vm8, %v8014_v57, 0.0  ;;  %v3108_v24 = vsel %vm3072_vm9, %v8014_v57, 0.0 }
 0x2d7   : > { %4300 = vmatpush3.bf16.msra.mxu1 %v4299_v4  ;;  %vm3178_vm10 = vcmp.eq.s32.totalorder %v8045_v41, %v8015_v25  ;;  %vm3179_vm11 = vcmp.eq.s32.totalorder %v8046_v40, %v8015_v25  ;;  %vm3285_vm12 = vcmp.eq.s32.totalorder %v8045_v41, %v8016_v52  ;;  %vm3286_vm13 = vcmp.eq.s32.totalorder %v8046_v40, %v8016_v52 }
 0x2d8   : > { %v3139_v58 = vadd.f32 %v3107_v48, %v3029_v1  ;;  %v3140_v21 = vadd.f32 %v3108_v24, %v3030_v7  ;;  %v3214_v15 = vsel %vm3178_vm10, %v8017_v19, 0.0  ;;  %v3215_v17 = vsel %vm3179_vm11, %v8017_v19, 0.0  ;;  %4301 = vmatprep.subr.bf16.mxu1 %v4501_v2 }
 0x2d9   : > { %v3321_v39 = vsel %vm3285_vm12, %v8018_v46, 0.0  ;;  %v3322_v55 = vsel %vm3286_vm13, %v8018_v46, 0.0  ;;  %vm3392_vm14 = vcmp.eq.s32.totalorder %v8045_v41, %v8019_v50  ;;  %vm3393_vm15 = vcmp.eq.s32.totalorder %v8046_v40, %v8019_v50  ;;  %v7410_v38 = vpop.f32.mrb[0].mxu0 }
 0x2da   : > { %v3246_v44 = vadd.f32 %v3214_v15, %v3139_v58  ;;  %v3247_v37 = vadd.f32 %v3215_v17, %v3140_v21  ;;  %v3428_v32 = vsel %vm3392_vm14, %v8020_v47, 0.0  ;;  %v3429_v3 = vsel %vm3393_vm15, %v8020_v47, 0.0  ;;  %v7414_v36 = vpop.f32.mrb[1].mxu0 }
 0x2db   : > { %vm1725_vm0 = vcmp.eq.s32.totalorder %v8047_v61, %v8021_v22  ;;  %vm1726_vm1 = vcmp.eq.s32.totalorder %v8048_v34, %v8021_v22  ;;  %vm1834_vm2 = vcmp.eq.s32.totalorder %v8047_v61, %v8024_v23  ;;  %vm1835_vm3 = vcmp.eq.s32.totalorder %v8048_v34, %v8024_v23 }
 0x2dc   : > { %v3353_v41 = vadd.f32 %v3321_v39, %v3246_v44  ;;  %v3354_v40 = vadd.f32 %v3322_v55, %v3247_v37  ;;  %v1761_v43 = vsel %vm1725_vm0, %v4752_v20, 0.0  ;;  %v1762_v10 = vsel %vm1726_vm1, %v4752_v20, 0.0 }
 0x2dd   : > { %v1870_v12 = vsel %vm1834_vm2, %v4758_v33, 0.0  ;;  %v1871_v4 = vsel %vm1835_vm3, %v4758_v33, 0.0  ;;  %vm1947_vm4 = vcmp.eq.s32.totalorder %v8047_v61, %v4773_v51  ;;  %vm1948_vm5 = vcmp.eq.s32.totalorder %v8048_v34, %v4773_v51 }
 0x2de   : > { %v3460_v14 = vadd.f32 %v3428_v32, %v3353_v41  ;;  %v3461_v1 = vadd.f32 %v3429_v3, %v3354_v40  ;;  %v1902_v7 = vadd.f32 %v1870_v12, %v1761_v43  ;;  %v1903_v48 = vadd.f32 %v1871_v4, %v1762_v10 }
 0x2df   : > { %v1983_v24 = vsel %vm1947_vm4, %v4755_v28, 0.0  ;;  %v1984_v58 = vsel %vm1948_vm5, %v4755_v28, 0.0  ;;  %vm2056_vm6 = vcmp.eq.s32.totalorder %v8047_v61, %v4779_v56  ;;  %vm2057_vm7 = vcmp.eq.s32.totalorder %v8048_v34, %v4779_v56 }
 0x2e0   : > { %v4278_v21 = vpack.c.bf16 %v3461_v1, %v3460_v14  ;;  %v2015_v15 = vadd.f32 %v1983_v24, %v1902_v7  ;;  %v2016_v17 = vadd.f32 %v1984_v58, %v1903_v48  ;;  %v2092_v39 = vsel %vm2056_vm6, %v4769_v49, 0.0 }
 0x2e1   : > { %v2093_v55 = vsel %vm2057_vm7, %v4769_v49, 0.0  ;;  %vm2166_vm8 = vcmp.eq.s32.totalorder %v8047_v61, %v4794_v13  ;;  %vm2167_vm9 = vcmp.eq.s32.totalorder %v8048_v34, %v4794_v13  ;;  %vm2273_vm10 = vcmp.eq.s32.totalorder %v8047_v61, %v4797_v8 }
 0x2e2   : > { %4279 = vmatprep.subr.bf16.mxu0 %v4278_v21  ;;  %v2124_v44 = vadd.f32 %v2092_v39, %v2015_v15  ;;  %v2125_v37 = vadd.f32 %v2093_v55, %v2016_v17  ;;  %v2202_v32 = vsel %vm2166_vm8, %v4776_v54, 0.0  ;;  %v2203_v3 = vsel %vm2167_vm9, %v4776_v54, 0.0 }
 0x2e3   : > { %vm2274_vm11 = vcmp.eq.s32.totalorder %v8048_v34, %v4797_v8  ;;  %v2309_v41 = vsel %vm2273_vm10, %v4782_v60, 0.0  ;;  %vm2380_vm12 = vcmp.eq.s32.totalorder %v8047_v61, %v4801_v35  ;;  %vm2381_vm13 = vcmp.eq.s32.totalorder %v8048_v34, %v4801_v35 }
 0x2e4   : > { %v2234_v40 = vadd.f32 %v2202_v32, %v2124_v44  ;;  %v2235_v43 = vadd.f32 %v2203_v3, %v2125_v37  ;;  %v2310_v10 = vsel %vm2274_vm11, %v4782_v60, 0.0  ;;  %v2416_v12 = vsel %vm2380_vm12, %v4787_v63, 0.0 }
 0x2e5   : > { %v2417_v4 = vsel %vm2381_vm13, %v4787_v63, 0.0  ;;  %vm2487_vm14 = vcmp.eq.s32.totalorder %v8047_v61, %v4807_v26  ;;  %vm2488_vm15 = vcmp.eq.s32.totalorder %v8048_v34, %v4807_v26  ;;  %vm2644_vm0 = vcmp.eq.s32.totalorder %v8043_v18, %v8004_v62  ;;  %v7464_v14 = vpop.f32.mrb[0].mxu1 }
 0x2e6   : > { %v2341_v1 = vadd.f32 %v2309_v41, %v2234_v40  ;;  %v2342_v7 = vadd.f32 %v2310_v10, %v2235_v43  ;;  %v2523_v48 = vsel %vm2487_vm14, %v7958_v59, 0.0  ;;  %v2524_v24 = vsel %vm2488_vm15, %v7958_v59, 0.0  ;;  %v7468_v58 = vpop.f32.mrb[1].mxu1 }
 0x2e7   : > { %vm2645_vm1 = vcmp.eq.s32.totalorder %v8044_v27, %v8004_v62  ;;  %v2680_v21 = vsel %vm2644_vm0, %v8006_v45, 0.0  ;;  %vm2753_vm2 = vcmp.eq.s32.totalorder %v8043_v18, %v8007_v5  ;;  %vm2754_vm3 = vcmp.eq.s32.totalorder %v8044_v27, %v8007_v5 }
 0x2e8   : > { %v2448_v15 = vadd.f32 %v2416_v12, %v2341_v1  ;;  %v2449_v17 = vadd.f32 %v2417_v4, %v2342_v7  ;;  %v2681_v39 = vsel %vm2645_vm1, %v8006_v45, 0.0  ;;  %v2789_v55 = vsel %vm2753_vm2, %v8008_v31, 0.0 }
 0x2e9   : > { %v2790_v44 = vsel %vm2754_vm3, %v8008_v31, 0.0  ;;  %v2821_v37 = vadd.f32 %v2789_v55, %v2680_v21  ;;  %vm2866_vm4 = vcmp.eq.s32.totalorder %v8043_v18, %v8009_v42  ;;  %vm2867_vm5 = vcmp.eq.s32.totalorder %v8044_v27, %v8009_v42 }
 0x2ea   : > { %v2555_v32 = vadd.f32 %v2523_v48, %v2448_v15  ;;  %v2556_v3 = vadd.f32 %v2524_v24, %v2449_v17  ;;  %v2822_v41 = vadd.f32 %v2790_v44, %v2681_v39  ;;  %v2902_v40 = vsel %vm2866_vm4, %v8010_v16, 0.0 }
 0x2eb   : > { %v2903_v43 = vsel %vm2867_vm5, %v8010_v16, 0.0  ;;  %v2934_v10 = vadd.f32 %v2902_v40, %v2821_v37  ;;  %vm2975_vm6 = vcmp.eq.s32.totalorder %v8043_v18, %v8011_v11  ;;  %vm2976_vm7 = vcmp.eq.s32.totalorder %v8044_v27, %v8011_v11 }
 0x2ec   : > { %v4280_v12 = vpack.c.bf16 %v2556_v3, %v2555_v32  ;;  %v2935_v4 = vadd.f32 %v2903_v43, %v2822_v41  ;;  %v3011_v1 = vsel %vm2975_vm6, %v8012_v9, 0.0  ;;  %v3012_v7 = vsel %vm2976_vm7, %v8012_v9, 0.0 }
 0x2ed   : > { %v3043_v48 = vadd.f32 %v3011_v1, %v2934_v10  ;;  %vm3085_vm8 = vcmp.eq.s32.totalorder %v8043_v18, %v8013_v29  ;;  %vm3086_vm9 = vcmp.eq.s32.totalorder %v8044_v27, %v8013_v29  ;;  %vm3192_vm10 = vcmp.eq.s32.totalorder %v8043_v18, %v8015_v25 }
 0x2ee   : > { %4281 = vmatpush3.bf16.msra.mxu0 %v4280_v12  ;;  %v3044_v24 = vadd.f32 %v3012_v7, %v2935_v4  ;;  %v3121_v21 = vsel %vm3085_vm8, %v8014_v57, 0.0  ;;  %v3122_v15 = vsel %vm3086_vm9, %v8014_v57, 0.0  ;;  %vm3193_vm11 = vcmp.eq.s32.totalorder %v8044_v27, %v8015_v25 }
 0x2ef   : > { %v3153_v17 = vadd.f32 %v3121_v21, %v3043_v48  ;;  %v3228_v39 = vsel %vm3192_vm10, %v8017_v19, 0.0  ;;  %v3229_v55 = vsel %vm3193_vm11, %v8017_v19, 0.0  ;;  %vm3299_vm12 = vcmp.eq.s32.totalorder %v8043_v18, %v8016_v52 }
 0x2f0   : > { %v3154_v44 = vadd.f32 %v3122_v15, %v3044_v24  ;;  %vm3300_vm13 = vcmp.eq.s32.totalorder %v8044_v27, %v8016_v52  ;;  %v3335_v37 = vsel %vm3299_vm12, %v8018_v46, 0.0  ;;  %vm3406_vm14 = vcmp.eq.s32.totalorder %v8043_v18, %v8019_v50 }
 0x2f1   : > { %v3260_v32 = vadd.f32 %v3228_v39, %v3153_v17  ;;  %v3336_v3 = vsel %vm3300_vm13, %v8018_v46, 0.0  ;;  %vm3407_vm15 = vcmp.eq.s32.totalorder %v8044_v27, %v8019_v50  ;;  %v3442_v41 = vsel %vm3406_vm14, %v8020_v47, 0.0 }
 0x2f2   : > { %v3261_v40 = vadd.f32 %v3229_v55, %v3154_v44  ;;  %v3443_v43 = vsel %vm3407_vm15, %v8020_v47, 0.0  ;;  %vm2632_vm0 = vcmp.eq.s32.totalorder %v6335_v30, %v8004_v62  ;;  %vm2633_vm1 = vcmp.eq.s32.totalorder %v6339_v6, %v8004_v62 }
 0x2f3   : > { %v3367_v10 = vadd.f32 %v3335_v37, %v3260_v32  ;;  %v2668_v18 = vsel %vm2632_vm0, %v8006_v45, 0.0  ;;  %v2669_v12 = vsel %vm2633_vm1, %v8006_v45, 0.0  ;;  %vm2741_vm2 = vcmp.eq.s32.totalorder %v6335_v30, %v8007_v5 }
 0x2f4   : > { %v3368_v27 = vadd.f32 %v3336_v3, %v3261_v40  ;;  %vm2742_vm3 = vcmp.eq.s32.totalorder %v6339_v6, %v8007_v5  ;;  %v2777_v4 = vsel %vm2741_vm2, %v8008_v31, 0.0  ;;  %vm2854_vm4 = vcmp.eq.s32.totalorder %v6335_v30, %v8009_v42 }
 0x2f5   : > { %v3474_v1 = vadd.f32 %v3442_v41, %v3367_v10  ;;  %v2778_v7 = vsel %vm2742_vm3, %v8008_v31, 0.0  ;;  %v2809_v48 = vadd.f32 %v2777_v4, %v2668_v18  ;;  %vm2855_vm5 = vcmp.eq.s32.totalorder %v6339_v6, %v8009_v42 }
 0x2f6   : > { %v3475_v24 = vadd.f32 %v3443_v43, %v3368_v27  ;;  %v2810_v21 = vadd.f32 %v2778_v7, %v2669_v12  ;;  %v2890_v15 = vsel %vm2854_vm4, %v8010_v16, 0.0  ;;  %v2891_v17 = vsel %vm2855_vm5, %v8010_v16, 0.0 }
 0x2f7   : > { %v2922_v39 = vadd.f32 %v2890_v15, %v2809_v48  ;;  %vm2963_vm6 = vcmp.eq.s32.totalorder %v6335_v30, %v8011_v11  ;;  %vm2964_vm7 = vcmp.eq.s32.totalorder %v6339_v6, %v8011_v11  ;;  %vm3073_vm8 = vcmp.eq.s32.totalorder %v6335_v30, %v8013_v29 }
 0x2f8   : > { %v4302_v55 = vpack.c.bf16 %v3475_v24, %v3474_v1  ;;  %v2923_v44 = vadd.f32 %v2891_v17, %v2810_v21  ;;  %v2999_v37 = vsel %vm2963_vm6, %v8012_v9, 0.0  ;;  %v3000_v32 = vsel %vm2964_vm7, %v8012_v9, 0.0 }
 0x2f9   : > { %v3031_v3 = vadd.f32 %v2999_v37, %v2922_v39  ;;  %vm3074_vm9 = vcmp.eq.s32.totalorder %v6339_v6, %v8013_v29  ;;  %v3109_v41 = vsel %vm3073_vm8, %v8014_v57, 0.0  ;;  %vm3180_vm10 = vcmp.eq.s32.totalorder %v6335_v30, %v8015_v25 }
 0x2fa   : > { %4303 = vmatpush3.bf16.msra.mxu1 %v4302_v55  ;;  %v3032_v40 = vadd.f32 %v3000_v32, %v2923_v44  ;;  %v3110_v43 = vsel %vm3074_vm9, %v8014_v57, 0.0  ;;  %vm3181_vm11 = vcmp.eq.s32.totalorder %v6339_v6, %v8015_v25  ;;  %v3216_v10 = vsel %vm3180_vm10, %v8017_v19, 0.0 }
 0x2fb   : > { %v3141_v18 = vadd.f32 %v3109_v41, %v3031_v3  ;;  %v3217_v12 = vsel %vm3181_vm11, %v8017_v19, 0.0  ;;  %vm3287_vm12 = vcmp.eq.s32.totalorder %v6335_v30, %v8016_v52  ;;  %vm3288_vm13 = vcmp.eq.s32.totalorder %v6339_v6, %v8016_v52  ;;  %4304 = vmatprep.subr.bf16.mxu1 %v4501_v2 }
 0x2fc   : > { %v3142_v27 = vadd.f32 %v3110_v43, %v3032_v40  ;;  %v3323_v4 = vsel %vm3287_vm12, %v8018_v46, 0.0  ;;  %v3324_v1 = vsel %vm3288_vm13, %v8018_v46, 0.0  ;;  %vm3394_vm14 = vcmp.eq.s32.totalorder %v6335_v30, %v8019_v50 }
 0x2fd   : > { %v3248_v7 = vadd.f32 %v3216_v10, %v3141_v18  ;;  %vm3395_vm15 = vcmp.eq.s32.totalorder %v6339_v6, %v8019_v50  ;;  %v3430_v48 = vsel %vm3394_vm14, %v8020_v47, 0.0  ;;  %vm1727_vm0 = vcmp.eq.s32.totalorder %v6342_v0, %v8021_v22 }
 0x2fe   : > { %v3249_v24 = vadd.f32 %v3217_v12, %v3142_v27  ;;  %v3431_v21 = vsel %vm3395_vm15, %v8020_v47, 0.0  ;;  %vm1728_vm1 = vcmp.eq.s32.totalorder %v6488_v53, %v8021_v22  ;;  %v1763_v15 = vsel %vm1727_vm0, %v4752_v20, 0.0 }
 0x2ff   : > { %v3355_v17 = vadd.f32 %v3323_v4, %v3248_v7  ;;  %v1764_v30 = vsel %vm1728_vm1, %v4752_v20, 0.0  ;;  %vm1836_vm2 = vcmp.eq.s32.totalorder %v6342_v0, %v8024_v23  ;;  %vm1837_vm3 = vcmp.eq.s32.totalorder %v6488_v53, %v8024_v23 }
 0x300   : > { %v3356_v6 = vadd.f32 %v3324_v1, %v3249_v24  ;;  %v1872_v39 = vsel %vm1836_vm2, %v4758_v33, 0.0  ;;  %v1873_v55 = vsel %vm1837_vm3, %v4758_v33, 0.0  ;;  %vm1949_vm4 = vcmp.eq.s32.totalorder %v6342_v0, %v4773_v51 }
 0x301   : > { %v3462_v22 = vadd.f32 %v3430_v48, %v3355_v17  ;;  %v1904_v44 = vadd.f32 %v1872_v39, %v1763_v15  ;;  %v1905_v37 = vadd.f32 %v1873_v55, %v1764_v30  ;;  %vm1950_vm5 = vcmp.eq.s32.totalorder %v6488_v53, %v4773_v51 }
 0x302   : > { %v3463_v20 = vadd.f32 %v3431_v21, %v3356_v6  ;;  %v1985_v32 = vsel %vm1949_vm4, %v4755_v28, 0.0  ;;  %v1986_v3 = vsel %vm1950_vm5, %v4755_v28, 0.0  ;;  %vm2058_vm6 = vcmp.eq.s32.totalorder %v6342_v0, %v4779_v56 }
 0x303   : > { %v2017_v23 = vadd.f32 %v1985_v32, %v1904_v44  ;;  %v2018_v41 = vadd.f32 %v1986_v3, %v1905_v37  ;;  %vm2059_vm7 = vcmp.eq.s32.totalorder %v6488_v53, %v4779_v56  ;;  %v2094_v33 = vsel %vm2058_vm6, %v4769_v49, 0.0 }
 0x304   : > { %v4282_v40 = vpack.c.bf16 %v3463_v20, %v3462_v22  ;;  %v2095_v43 = vsel %vm2059_vm7, %v4769_v49, 0.0  ;;  %vm2168_vm8 = vcmp.eq.s32.totalorder %v6342_v0, %v4794_v13  ;;  %vm2169_vm9 = vcmp.eq.s32.totalorder %v6488_v53, %v4794_v13 }
 0x305   : > { %v2126_v28 = vadd.f32 %v2094_v33, %v2017_v23  ;;  %v2127_v51 = vadd.f32 %v2095_v43, %v2018_v41  ;;  %v2204_v10 = vsel %vm2168_vm8, %v4776_v54, 0.0  ;;  %v2205_v18 = vsel %vm2169_vm9, %v4776_v54, 0.0  ;;  %v3516_v41 = vld [vmem:[%s4632_s7 + $0x20] sm:$0xff] }
 0x306   : > { %4283 = vmatprep.subr.bf16.mxu0 %v4282_v40  ;;  %vm2275_vm10 = vcmp.eq.s32.totalorder %v6342_v0, %v4797_v8  ;;  %vm2276_vm11 = vcmp.eq.s32.totalorder %v6488_v53, %v4797_v8  ;;  %vm2382_vm12 = vcmp.eq.s32.totalorder %v6342_v0, %v4801_v35  ;;  %vm2383_vm13 = vcmp.eq.s32.totalorder %v6488_v53, %v4801_v35 }
 0x307   : > { %v2236_v49 = vadd.f32 %v2204_v10, %v2126_v28  ;;  %v2237_v56 = vadd.f32 %v2205_v18, %v2127_v51  ;;  %v2311_v13 = vsel %vm2275_vm10, %v4782_v60, 0.0  ;;  %v2312_v12 = vsel %vm2276_vm11, %v4782_v60, 0.0 }
 0x308   : > { %v2418_v54 = vsel %vm2382_vm12, %v4787_v63, 0.0  ;;  %v2419_v27 = vsel %vm2383_vm13, %v4787_v63, 0.0  ;;  %vm2489_vm14 = vcmp.eq.s32.totalorder %v6342_v0, %v4807_v26  ;;  %vm2490_vm15 = vcmp.eq.s32.totalorder %v6488_v53, %v4807_v26 }
 0x309   : > { %v2343_v8 = vadd.f32 %v2311_v13, %v2236_v49  ;;  %v2344_v4 = vadd.f32 %v2312_v12, %v2237_v56  ;;  %v2525_v35 = vsel %vm2489_vm14, %v7958_v59, 0.0  ;;  %v2526_v1 = vsel %vm2490_vm15, %v7958_v59, 0.0 }
 0x30a   : > { %vm2646_vm0 = vcmp.eq.s32.totalorder %v8047_v61, %v8004_v62  ;;  %vm2647_vm1 = vcmp.eq.s32.totalorder %v8048_v34, %v8004_v62  ;;  %vm2755_vm2 = vcmp.eq.s32.totalorder %v8047_v61, %v8007_v5  ;;  %vm2756_vm3 = vcmp.eq.s32.totalorder %v8048_v34, %v8007_v5 }
 0x30b   : > { %v2450_v60 = vadd.f32 %v2418_v54, %v2343_v8  ;;  %v2451_v26 = vadd.f32 %v2419_v27, %v2344_v4  ;;  %v2682_v63 = vsel %vm2646_vm0, %v8006_v45, 0.0  ;;  %v2683_v7 = vsel %vm2647_vm1, %v8006_v45, 0.0 }
 0x30c   : > { %v2791_v59 = vsel %vm2755_vm2, %v8008_v31, 0.0  ;;  %v2792_v48 = vsel %vm2756_vm3, %v8008_v31, 0.0  ;;  %vm2868_vm4 = vcmp.eq.s32.totalorder %v8047_v61, %v8009_v42  ;;  %vm2869_vm5 = vcmp.eq.s32.totalorder %v8048_v34, %v8009_v42 }
 0x30d   : > { %v2557_v24 = vadd.f32 %v2525_v35, %v2450_v60  ;;  %v2558_v21 = vadd.f32 %v2526_v1, %v2451_v26  ;;  %v2823_v15 = vadd.f32 %v2791_v59, %v2682_v63  ;;  %v2824_v17 = vadd.f32 %v2792_v48, %v2683_v7 }
 0x30e   : > { %v2904_v30 = vsel %vm2868_vm4, %v8010_v16, 0.0  ;;  %v2905_v6 = vsel %vm2869_vm5, %v8010_v16, 0.0  ;;  %vm2977_vm6 = vcmp.eq.s32.totalorder %v8047_v61, %v8011_v11  ;;  %vm2978_vm7 = vcmp.eq.s32.totalorder %v8048_v34, %v8011_v11 }
 0x30f   : > { %v4284_v39 = vpack.c.bf16 %v2558_v21, %v2557_v24  ;;  %v2936_v55 = vadd.f32 %v2904_v30, %v2823_v15  ;;  %v2937_v22 = vadd.f32 %v2905_v6, %v2824_v17  ;;  %v3013_v44 = vsel %vm2977_vm6, %v8012_v9, 0.0 }
 0x310   : > { %v3014_v37 = vsel %vm2978_vm7, %v8012_v9, 0.0  ;;  %vm3087_vm8 = vcmp.eq.s32.totalorder %v8047_v61, %v8013_v29  ;;  %vm3088_vm9 = vcmp.eq.s32.totalorder %v8048_v34, %v8013_v29  ;;  %vm3194_vm10 = vcmp.eq.s32.totalorder %v8047_v61, %v8015_v25 }
 0x311   : > { %4285 = vmatpush3.bf16.msra.mxu0 %v4284_v39  ;;  %v3045_v20 = vadd.f32 %v3013_v44, %v2936_v55  ;;  %v3046_v32 = vadd.f32 %v3014_v37, %v2937_v22  ;;  %v3123_v3 = vsel %vm3087_vm8, %v8014_v57, 0.0  ;;  %v3124_v23 = vsel %vm3088_vm9, %v8014_v57, 0.0  ;;  %v3518_v55 = vld [vmem:[%s4632_s7 + $0x30] sm:$0xff] }
 0x312   : > { %vm3195_vm11 = vcmp.eq.s32.totalorder %v8048_v34, %v8015_v25  ;;  %v3230_v33 = vsel %vm3194_vm10, %v8017_v19, 0.0  ;;  %vm3301_vm12 = vcmp.eq.s32.totalorder %v8047_v61, %v8016_v52  ;;  %vm3302_vm13 = vcmp.eq.s32.totalorder %v8048_v34, %v8016_v52 }
 0x313   : > { %v3155_v40 = vadd.f32 %v3123_v3, %v3045_v20  ;;  %v3156_v43 = vadd.f32 %v3124_v23, %v3046_v32  ;;  %v3231_v28 = vsel %vm3195_vm11, %v8017_v19, 0.0  ;;  %v3337_v51 = vsel %vm3301_vm12, %v8018_v46, 0.0 }
 0x314   : > { %v3338_v10 = vsel %vm3302_vm13, %v8018_v46, 0.0  ;;  %vm3408_vm14 = vcmp.eq.s32.totalorder %v8047_v61, %v8019_v50  ;;  %vm3409_vm15 = vcmp.eq.s32.totalorder %v8048_v34, %v8019_v50  ;;  %3836 = vmatmul.mubr.f32.vlgmr.msra.gmra.mrb[2].mxu0 %v3516_v41  ;;  %vm2648_vm0 = vcmp.eq.s32.totalorder %v6342_v0, %v8004_v62 }
 0x315   : > { %v3262_v18 = vadd.f32 %v3230_v33, %v3155_v40  ;;  %v3263_v49 = vadd.f32 %v3231_v28, %v3156_v43  ;;  %v3444_v56 = vsel %vm3408_vm14, %v8020_v47, 0.0  ;;  %v3445_v13 = vsel %vm3409_vm15, %v8020_v47, 0.0 }
 0x316   : > { %vm2649_vm1 = vcmp.eq.s32.totalorder %v6488_v53, %v8004_v62  ;;  %v2684_v12 = vsel %vm2648_vm0, %v8006_v45, 0.0  ;;  %vm2757_vm2 = vcmp.eq.s32.totalorder %v6342_v0, %v8007_v5  ;;  %vm2758_vm3 = vcmp.eq.s32.totalorder %v6488_v53, %v8007_v5 }
 0x317   : > { %v3369_v61 = vadd.f32 %v3337_v51, %v3262_v18  ;;  %v3370_v34 = vadd.f32 %v3338_v10, %v3263_v49  ;;  %v2685_v54 = vsel %vm2649_vm1, %v8006_v45, 0.0  ;;  %v2793_v27 = vsel %vm2757_vm2, %v8008_v31, 0.0 }
 0x318   : > { %v2794_v8 = vsel %vm2758_vm3, %v8008_v31, 0.0  ;;  %v2825_v4 = vadd.f32 %v2793_v27, %v2684_v12  ;;  %vm2870_vm4 = vcmp.eq.s32.totalorder %v6342_v0, %v8009_v42  ;;  %vm2871_vm5 = vcmp.eq.s32.totalorder %v6488_v53, %v8009_v42 }
 0x319   : > { %v3476_v62 = vadd.f32 %v3444_v56, %v3369_v61  ;;  %v3477_v35 = vadd.f32 %v3445_v13, %v3370_v34  ;;  %v2826_v1 = vadd.f32 %v2794_v8, %v2685_v54  ;;  %v2906_v5 = vsel %vm2870_vm4, %v8010_v16, 0.0 }
 0x31a   : > { %v2907_v60 = vsel %vm2871_vm5, %v8010_v16, 0.0  ;;  %v2938_v26 = vadd.f32 %v2906_v5, %v2825_v4  ;;  %vm2979_vm6 = vcmp.eq.s32.totalorder %v6342_v0, %v8011_v11  ;;  %vm2980_vm7 = vcmp.eq.s32.totalorder %v6488_v53, %v8011_v11 }
 0x31b   : > { %v4305_v45 = vpack.c.bf16 %v3477_v35, %v3476_v62  ;;  %v2939_v31 = vadd.f32 %v2907_v60, %v2826_v1  ;;  %v3015_v63 = vsel %vm2979_vm6, %v8012_v9, 0.0  ;;  %v3016_v42 = vsel %vm2980_vm7, %v8012_v9, 0.0 }
 0x31c   : > { %v3047_v7 = vadd.f32 %v3015_v63, %v2938_v26  ;;  %vm3089_vm8 = vcmp.eq.s32.totalorder %v6342_v0, %v8013_v29  ;;  %vm3090_vm9 = vcmp.eq.s32.totalorder %v6488_v53, %v8013_v29  ;;  %vm3196_vm10 = vcmp.eq.s32.totalorder %v6342_v0, %v8015_v25 }
 0x31d   : > { %4306 = vmatpush3.bf16.msra.mxu1 %v4305_v45  ;;  %v3048_v16 = vadd.f32 %v3016_v42, %v2939_v31  ;;  %v3125_v11 = vsel %vm3089_vm8, %v8014_v57, 0.0  ;;  %v3126_v59 = vsel %vm3090_vm9, %v8014_v57, 0.0  ;;  %vm3197_vm11 = vcmp.eq.s32.totalorder %v6488_v53, %v8015_v25 }
 0x31e   : > { %4307 = vmatprep.subr.bf16.mxu1 %v4501_v2  ;;  %v3157_v9 = vadd.f32 %v3125_v11, %v3047_v7  ;;  %v3232_v48 = vsel %vm3196_vm10, %v8017_v19, 0.0  ;;  %v3233_v24 = vsel %vm3197_vm11, %v8017_v19, 0.0  ;;  %vm3303_vm12 = vcmp.eq.s32.totalorder %v6342_v0, %v8016_v52 }
 0x31f   : > { %v3158_v29 = vadd.f32 %v3126_v59, %v3048_v16  ;;  %vm3304_vm13 = vcmp.eq.s32.totalorder %v6488_v53, %v8016_v52  ;;  %v3339_v21 = vsel %vm3303_vm12, %v8018_v46, 0.0  ;;  %vm3410_vm14 = vcmp.eq.s32.totalorder %v6342_v0, %v8019_v50 }
 0x320   : > { %v3264_v57 = vadd.f32 %v3232_v48, %v3157_v9  ;;  %v3340_v25 = vsel %vm3304_vm13, %v8018_v46, 0.0  ;;  %vm3411_vm15 = vcmp.eq.s32.totalorder %v6488_v53, %v8019_v50  ;;  %v3446_v2 = vsel %vm3410_vm14, %v8020_v47, 0.0 }
 0x321   : > { %v3265_v19 = vadd.f32 %v3233_v24, %v3158_v29  ;;  %v3447_v17 = vsel %vm3411_vm15, %v8020_v47, 0.0  ;;  %vm4502_vm0 = vmmov 0   ;;  %v4503_v52 = vmov 0.0  }
 0x322   : > { %v3371_v15 = vadd.f32 %v3339_v21, %v3264_v57  ;;  %4187 = vmatprep.mubr.msk.f32.mxu1 %vm4502_vm0, %v4503_v52  ;;  %v4067_v0 = vadd.f32 %v7414_v36, %v7410_v38  ;;  %v4102_v46 = vadd.f32 %v7468_v58, %v7464_v14 }
 0x323   : > { %v3372_v30 = vadd.f32 %v3340_v25, %v3265_v19 }
 0x324   : > { %v3478_v53 = vadd.f32 %v3446_v2, %v3371_v15  ;;  %v3768_v50 = vadd.f32 %v4102_v46, %v4067_v0 }
 0x325   : > { %v3479_v6 = vadd.f32 %v3447_v17, %v3372_v30 }
 0x327   : > { %v4308_v39 = vpack.c.bf16 %v3479_v6, %v3478_v53 }
 0x329   : > { %4309 = vmatpush3.bf16.msra.mxu1 %v4308_v39 }
 0x32c   : > { %4188 = vmatmul.mubr.f32.vlgmr.msra.gmra.mrb[2].mxu1 %v3518_v55 }
 0x3e7   : > { %v4135_v47 = vpop.f32.mrb[2].mxu0 }
 0x3e8   : > { %v4136_v22 = vpop.f32.mrb[3].mxu0 }
 0x3e9   : > { %v4137_v44 = vadd.f32 %v4136_v22, %v4135_v47 }
 0x3eb   : > { %v3838_v37 = vadd.f32 %v4137_v44, %v3768_v50 }
 0x3ff   : > { %v3907_v38 = vpop.f32.mrb[2].mxu1 }
 0x400   : > { %v3908_v36 = vadd.f32 %v3907_v38, %v3838_v37  ;;  %v4189_v14 = vpop.f32.mrb[3].mxu1 }
 0x402   : > { %3911 = vst [vmem:[%s194_s16] sm:$0xff] %v3908_v36 }
 0x403   : > { %4429 = shalt.err (!%p4426_p5)
}
 0x404   : > { %s4430_s29 = scalar_lea.hbm %s7721_s25, 128  ;;  %s4434_s3 = scalar_lea.hbm %s7771_s2, 512 }
 0x405   : > { %p4431_p6 = scmp.ne.s32.totalorder %s7721_s25, %s4430_s29  ;;  %p4435_p4 = scmp.lt.u32.totalorder %s7721_s25, %s7771_s2 }
 0x406   : > { %p4436_p2 = scmp.lt.u32.totalorder %s4434_s3, %s4430_s29  ;;  %p4438_p8 = scmp.lt.u32.totalorder %s4430_s29, %s7721_s25 }
 0x407   : > { %p4432_p7 = pnand %p4431_p6, %p8049_p11 }
 0x408   : > { %p4437_p9 = por %p4436_p2, %p4435_p4 }
 0x409   : > { %p4433_p0 = pneg %p4432_p7 }
 0x40a   : > { %p4439_p13 = por %p4438_p8, %p4437_p9 }
 0x40c   : > { %p4440_p10 = pnand %p4439_p13, %p4433_p0 }
 0x40e   : > { %4443 = shalt.err (!%p4440_p10)
}
 0x40f   : > { %4323 = dma.vmem_to_hbm [thread:$0]  (%p8049_p11), %s7723_s18, 128, %s7721_s25, %s3913_s26  }
 0x410 PF: > { %p4334_p12 = scmp.ge.s32.totalorder %s4498_s14, 2  ;;  %s3939_s8 = sand.u32 1, %s4478_s9  }
 0x411   : > { %p8050_p1 = scmp.ne.s32.totalorder %s7899_s24, 0  ;;  %s3940_s21 = scalar_lea.sflag [#allocation5], %s3939_s8 }
 0x413   : > { %p4330_p3 = pnand %p4334_p12, %p8050_p1 }
 0x415   : > { %4473 = dma.done.wait (!%p4330_p3), %s3940_s21, 128  }
 0x416   : > { %4475 = vsyncadd (!%p4330_p3), %s3940_s21, 4294967168  ;;  %s18_s14 = sadd.s32 1, %s4498_s14   ;;  %s8051_s9 = smov %s4482_s10 }
 0x417   : > { %p15_p5 = scmp.ge.s32.totalorder %s18_s14, 6   ;;  %s8052_s10 = smov %s4486_s11 }
 0x418   : > { %s8053_s11 = smov %s4576_s23  ;;  %s8054_s12 = smov %s4494_s13 }
 0x419   : > { %s8055_s13 = smov %s8057_s17  ;;  %17 = sbr.rel (!%p15_p5) target bundleno = 6 (0x6), region = 76 }
 0x420   :  { %3945 = vsyncpa [#allocation4], 1 }
 0x421   :  { %3947 = vsyncpa [#allocation4 + $0x1], 1 }
 0x422   :  { %3948 = vsyncpa [#allocation5], 1 }
 0x423   :  { %3950 = vsyncpa [#allocation5 + $0x1], 1 }

</bundles_post_ra>
